<compile_context>
chip_gen: v6e
topology: v6e:2x2x1
jax: 0.10.0
libtpu: 0.0.40
codegen_flags: <defaults>
</compile_context>

<pallas_src>
import functools

import jax
import jax.numpy as jnp
from jax.experimental import pallas as pl
from jax.experimental.pallas import tpu as pltpu


_VMEM = pl.BlockSpec(memory_space=pltpu.MemorySpace.VMEM)
_SMEM = pl.BlockSpec(memory_space=pltpu.MemorySpace.SMEM)


# ----------------------------------------------------------------------------
# Fused Pallas kernel
# ----------------------------------------------------------------------------
def _per_branch_bn(x2, eps):
    """BatchNorm1d (training mode, biased variance, identity affine) applied
    independently to each branch.  x2: (2, B, D) float32.

    Single subtraction pass: xc is bound once and reused for variance and the
    normalized output (two-pass variance kept for numerical stability)."""
    mean = jnp.mean(x2, axis=1, keepdims=True)
    xc = x2 - mean
    var = jnp.mean(xc * xc, axis=1, keepdims=True)
    return xc * jax.lax.rsqrt(var + eps)


def _bt_fused_kernel(y1_ref, y2_ref, wbb_ref, *rest, n_proj, b, eps, bs, lmbda):
    """Fused Barlow Twins forward.

    rest = (proj_w0 ... proj_w{n_proj-1}, out)
      y1_ref / y2_ref : (B, in_dim) inputs (any float dtype; cast in-kernel)
      wbb_ref, proj_w*: bf16 weight matrices (stored bf16, no per-call cast)
      out             : (1, 1) f32 in SMEM -- scalar loss
    """
    proj_refs = rest[:n_proj]
    o_ref = rest[n_proj]

    # Backbone stand-in: flatten -> Linear(in_dim, 512, bias=False).
    # TODO(synk): the real get_model(...) ResNet backbone is external to the
    # module and is not reproduced here.
    wbb = wbb_ref[...]
    h1 = jnp.dot(y1_ref[...].astype(jnp.bfloat16), wbb,
                 preferred_element_type=jnp.float32)             # (B, 512) f32
    h2 = jnp.dot(y2_ref[...].astype(jnp.bfloat16), wbb,
                 preferred_element_type=jnp.float32)             # (B, 512) f32
    # Stack the two views into one (2B, 512) batch purely in VMEM (f32 rows
    # are sublane-aligned since b % 8 == 0), so the projector runs once.
    h = jnp.concatenate([h1, h2], axis=0)                        # (2B, 512) f32

    # Projector: [Linear(no bias) -> BN1d -> ReLU] x (L-1) -> Linear(no bias)
    # TODO(synk): projector BatchNorm1d learnable affine params / running-stat
    # tracking are not modeled; identity affine matches PyTorch at default init.
    for i, w_ref in enumerate(proj_refs):
        h = jnp.dot(h.astype(jnp.bfloat16), w_ref[...],
                    preferred_element_type=jnp.float32)          # (2B, d_i) f32
        if i < n_proj - 1:
            d = h.shape[1]
            h2b = _per_branch_bn(h.reshape(2, b, d), eps)        # per-branch BN
            h = jnp.maximum(h2b, 0.0).reshape(2 * b, d)          # ReLU

    # Final affine-free BatchNorm1d (self.bn), per branch, folded into loss.
    d = h.shape[1]
    zn = _per_branch_bn(h.reshape(2, b, d), eps)
    z1n = zn[0]                                                  # (B, D) f32
    z2n = zn[1]                                                  # (B, D) f32

    inv_bs = 1.0 / bs
    # c = bn(z1).T @ bn(z2) / bs   (contract over the batch axis)
    # TODO(synk): at large D this must be computed blockwise (never
    # materializing the full DxD matrix) with bf16 MXU operands.
    c = jax.lax.dot_general(z1n, z2n, (((0,), (0,)), ((), ())),
                            preferred_element_type=jnp.float32) * inv_bs
    # TODO(synk): torch.distributed.all_reduce(c) is the identity on a single
    # device; multi-host all-reduce is out of scope for this kernel.

    # loss = sum_i (c_ii - 1)^2 + lmbda * sum_{i != j} c_ij^2
    #      = sum_i [(c_ii - 1)^2 - lmbda * c_ii^2] + lmbda * sum_{ij} c_ij^2
    # diag(c) computed directly from the branches: c_ii = sum_b z1n*z2n / bs,
    # so no iota / eye masks over the (D, D) matrix are needed.
    total_sq = jnp.sum(c * c)
    diag = jnp.sum(z1n * z2n, axis=0, keepdims=True) * inv_bs    # (1, D)
    on_diag = jnp.sum((diag - 1.0) ** 2)
    diag_sq = jnp.sum(diag * diag)
    o_ref[0, 0] = on_diag + lmbda * (total_sq - diag_sq)


# ----------------------------------------------------------------------------
# Wrapper: one pallas_call for the whole forward
# ----------------------------------------------------------------------------
def barlow_twins_forward(params, y1, y2, *, bs=None, btlmbda=0.0051, eps=1e-5):
    b = y1.shape[0]
    assert y2.shape[0] == b, "y1 / y2 must share the batch size"
    assert b % 8 == 0, "batch must be a multiple of 8 (sublane alignment)"
    if bs is None:
        bs = b  # derive from the actual per-branch batch (== args.bs on 1 dev)

    # flatten NCHW -> (B, C*H*W); no cross-view concat (done in-kernel).
    y1f = y1.reshape(b, -1)
    y2f = y2.reshape(b, -1)
    in_dim = y1f.shape[1]

    wbb = params["backbone_w"]                 # bf16, stored once at init
    proj_ws = list(params["projector_ws"])     # bf16, stored once at init
    sizes = [wbb.shape[1]] + [w.shape[1] for w in proj_ws]
    dims = [in_dim] + sizes

    # Gate the whole-resident design on layer width.
    # TODO(synk): for widths >= 4096 switch to the tiled grid+BlockSpec
    # weight-streaming path (VMEM-limited on v7x's 64 MiB, default scoped
    # limits everywhere); not needed for this configuration.
    if max(dims) >= 4096:
        raise NotImplementedError(
            "wide projector requires the tiled weight-streaming path")

    # Cost estimate (lets XLA overlap this call with the input pipeline).
    n = 2 * b
    matmul_flops = sum(2 * n * dims[i] * dims[i + 1] for i in range(len(dims) - 1))
    c_flops = 2 * b * sizes[-1] * sizes[-1]
    transcendentals = sum(2 * s for s in sizes[1:])          # rsqrt per BN feat
    bytes_accessed = (2 * b * in_dim * y1f.dtype.itemsize
                      + sum(dims[i] * dims[i + 1] for i in range(len(dims) - 1))
                      * wbb.dtype.itemsize
                      + 4)
    cost = pl.CostEstimate(flops=int(matmul_flops + c_flops),
                           transcendentals=int(transcendentals),
                           bytes_accessed=int(bytes_accessed))

    # VMEM budget: inputs + weights + a few live f32 activation copies + c.
    weight_bytes = sum(dims[i] * dims[i + 1] for i in range(len(dims) - 1)) * 2
    input_bytes = 2 * b * in_dim * y1f.dtype.itemsize
    act_bytes = n * max(dims) * 4 * 6
    c_bytes = sizes[-1] * sizes[-1] * 4
    vmem_limit = int(min(100 * 2**20,
                         max(16 * 2**20,
                             2 * (weight_bytes + input_bytes + act_bytes
                                  + c_bytes))))

    kernel = functools.partial(
        _bt_fused_kernel, n_proj=len(proj_ws), b=b,
        eps=float(eps), bs=float(bs), lmbda=float(btlmbda))

    out = pl.pallas_call(
        kernel,
        out_shape=jax.ShapeDtypeStruct((1, 1), jnp.float32),
        in_specs=[_VMEM] * (3 + len(proj_ws)),
        out_specs=_SMEM,
        compiler_params=pltpu.CompilerParams(vmem_limit_bytes=vmem_limit),
        cost_estimate=cost,
    )(y1f, y2f, wbb, *proj_ws)
    return out[0, 0]


# ----------------------------------------------------------------------------
# Parameter init (deterministic) -- weights stored in bf16 ONCE here, so the
# forward never pays a per-step f32->bf16 cast over the weights.
# ----------------------------------------------------------------------------
def init_params(key, in_dim, sizes, dtype=jnp.bfloat16):
    """sizes = [512, h1, ..., hL]."""
    k_bb, *k_proj = jax.random.split(key, len(sizes))
    backbone_w = (jax.random.normal(k_bb, (in_dim, sizes[0]), jnp.float32)
                  / jnp.sqrt(jnp.float32(in_dim))).astype(dtype)
    proj_ws = []
    for i in range(len(sizes) - 1):
        w = (jax.random.normal(k_proj[i], (sizes[i], sizes[i + 1]), jnp.float32)
             / jnp.sqrt(jnp.float32(sizes[i]))).astype(dtype)
        proj_ws.append(w)
    return {"backbone_w": backbone_w, "projector_ws": proj_ws}


# ----------------------------------------------------------------------------
# main
# ----------------------------------------------------------------------------
if __name__ == "__main__":
    # small shapes consistent with the module's forward
    B, C, H, W = 8, 4, 16, 16          # NCHW inputs (B multiple of 8)
    projector = "128-128-128"          # args.projector
    btlmbda = 0.0051                   # args.btlmbda

    sizes = [512] + list(map(int, projector.split("-")))
    in_dim = C * H * W

    key = jax.random.PRNGKey(0)
    k_params, k_y1, k_y2 = jax.random.split(key, 3)
    params = init_params(k_params, in_dim, sizes)

    y1 = jax.random.normal(k_y1, (B, C, H, W), jnp.float32)
    y2 = jax.random.normal(k_y2, (B, C, H, W), jnp.float32)

    loss = barlow_twins_forward(params, y1, y2, btlmbda=btlmbda)  # bs = B
    loss = jax.block_until_ready(loss)

    assert loss.shape == () and jnp.isfinite(loss), f"bad loss: {loss}"
    print("KERNEL_OK")
</pallas_src>

<mosaic_0001>
module attributes {stable_mosaic.version = 11 : i64} {
  func.func @_bt_fused_kernel(%arg0: memref<8x1024xf32, #tpu.memory_space<vmem>>, %arg1: memref<8x1024xf32, #tpu.memory_space<vmem>>, %arg2: memref<1024x512xbf16, #tpu.memory_space<vmem>>, %arg3: memref<512x128xbf16, #tpu.memory_space<vmem>>, %arg4: memref<128x128xbf16, #tpu.memory_space<vmem>>, %arg5: memref<128x128xbf16, #tpu.memory_space<vmem>>, %arg6: memref<1x1xf32, #tpu.memory_space<smem>>) attributes {dimension_semantics = [], scalar_prefetch = 0 : i64, scratch_operands = 0 : i64, tpu.core_type = #tpu.core_type<tc>} {
    %c0 = arith.constant 0 : index
    %c0_0 = arith.constant 0 : index
    %0 = vector.load %arg2[%c0, %c0_0] : memref<1024x512xbf16, #tpu.memory_space<vmem>>, vector<1024x512xbf16>
    %c0_1 = arith.constant 0 : index
    %c0_2 = arith.constant 0 : index
    %1 = vector.load %arg0[%c0_1, %c0_2] : memref<8x1024xf32, #tpu.memory_space<vmem>>, vector<8x1024xf32>
    %2 = arith.truncf %1 : vector<8x1024xf32> to vector<8x1024xbf16>
    %cst = arith.constant dense<0.000000e+00> : vector<8x512xf32>
    %3 = tpu.matmul %2, %0, %cst {dimension_numbers = #tpu.dot_dimension_numbers<[1], [0], [0], [1], [0, 0, 1, 1], [], []>} : vector<8x1024xbf16>, vector<1024x512xbf16>, vector<8x512xf32> -> vector<8x512xf32>
    %c0_3 = arith.constant 0 : index
    %c0_4 = arith.constant 0 : index
    %4 = vector.load %arg1[%c0_3, %c0_4] : memref<8x1024xf32, #tpu.memory_space<vmem>>, vector<8x1024xf32>
    %5 = arith.truncf %4 : vector<8x1024xf32> to vector<8x1024xbf16>
    %cst_5 = arith.constant dense<0.000000e+00> : vector<8x512xf32>
    %6 = tpu.matmul %5, %0, %cst_5 {dimension_numbers = #tpu.dot_dimension_numbers<[1], [0], [0], [1], [0, 0, 1, 1], [], []>} : vector<8x1024xbf16>, vector<1024x512xbf16>, vector<8x512xf32> -> vector<8x512xf32>
    %7 = tpu.concatenate %3, %6 in 0 : vector<8x512xf32>, vector<8x512xf32> -> vector<16x512xf32>
    %8 = arith.truncf %7 : vector<16x512xf32> to vector<16x512xbf16>
    %c0_6 = arith.constant 0 : index
    %c0_7 = arith.constant 0 : index
    %9 = vector.load %arg3[%c0_6, %c0_7] : memref<512x128xbf16, #tpu.memory_space<vmem>>, vector<512x128xbf16>
    %cst_8 = arith.constant dense<0.000000e+00> : vector<16x128xf32>
    %10 = tpu.matmul %8, %9, %cst_8 {dimension_numbers = #tpu.dot_dimension_numbers<[1], [0], [0], [1], [0, 0, 1, 1], [], []>} : vector<16x512xbf16>, vector<512x128xbf16>, vector<16x128xf32> -> vector<16x128xf32>
    %11 = vector.shape_cast %10 : vector<16x128xf32> to vector<2x8x128xf32>
    %cst_9 = arith.constant dense<0.000000e+00> : vector<2x128xf32>
    %12 = vector.multi_reduction <add>, %11, %cst_9 [1] : vector<2x8x128xf32> to vector<2x128xf32>
    %13 = vector.shape_cast %12 : vector<2x128xf32> to vector<2x1x128xf32>
    %cst_10 = arith.constant 8.000000e+00 : f32
    %14 = vector.broadcast %cst_10 : f32 to vector<2x1x128xf32>
    %15 = arith.divf %13, %14 : vector<2x1x128xf32>
    %16 = vector.broadcast %15 : vector<2x1x128xf32> to vector<2x8x128xf32>
    %17 = arith.subf %11, %16 : vector<2x8x128xf32>
    %18 = arith.mulf %17, %17 : vector<2x8x128xf32>
    %cst_11 = arith.constant dense<0.000000e+00> : vector<2x128xf32>
    %19 = vector.multi_reduction <add>, %18, %cst_11 [1] : vector<2x8x128xf32> to vector<2x128xf32>
    %20 = vector.shape_cast %19 : vector<2x128xf32> to vector<2x1x128xf32>
    %cst_12 = arith.constant 8.000000e+00 : f32
    %21 = vector.broadcast %cst_12 : f32 to vector<2x1x128xf32>
    %22 = arith.divf %20, %21 : vector<2x1x128xf32>
    %cst_13 = arith.constant 9.99999974E-6 : f32
    %23 = vector.broadcast %cst_13 : f32 to vector<2x1x128xf32>
    %24 = arith.addf %22, %23 : vector<2x1x128xf32>
    %25 = math.rsqrt %24 : vector<2x1x128xf32>
    %26 = vector.broadcast %25 : vector<2x1x128xf32> to vector<2x8x128xf32>
    %27 = arith.mulf %17, %26 : vector<2x8x128xf32>
    %cst_14 = arith.constant 0.000000e+00 : f32
    %28 = vector.broadcast %cst_14 : f32 to vector<2x8x128xf32>
    %29 = arith.maximumf %27, %28 : vector<2x8x128xf32>
    %30 = vector.shape_cast %29 : vector<2x8x128xf32> to vector<16x128xf32>
    %31 = arith.truncf %30 : vector<16x128xf32> to vector<16x128xbf16>
    %c0_15 = arith.constant 0 : index
    %c0_16 = arith.constant 0 : index
    %32 = vector.load %arg4[%c0_15, %c0_16] : memref<128x128xbf16, #tpu.memory_space<vmem>>, vector<128x128xbf16>
    %cst_17 = arith.constant dense<0.000000e+00> : vector<16x128xf32>
    %33 = tpu.matmul %31, %32, %cst_17 {dimension_numbers = #tpu.dot_dimension_numbers<[1], [0], [0], [1], [0, 0, 1, 1], [], []>} : vector<16x128xbf16>, vector<128x128xbf16>, vector<16x128xf32> -> vector<16x128xf32>
    %34 = vector.shape_cast %33 : vector<16x128xf32> to vector<2x8x128xf32>
    %cst_18 = arith.constant dense<0.000000e+00> : vector<2x128xf32>
    %35 = vector.multi_reduction <add>, %34, %cst_18 [1] : vector<2x8x128xf32> to vector<2x128xf32>
    %36 = vector.shape_cast %35 : vector<2x128xf32> to vector<2x1x128xf32>
    %cst_19 = arith.constant 8.000000e+00 : f32
    %37 = vector.broadcast %cst_19 : f32 to vector<2x1x128xf32>
    %38 = arith.divf %36, %37 : vector<2x1x128xf32>
    %39 = vector.broadcast %38 : vector<2x1x128xf32> to vector<2x8x128xf32>
    %40 = arith.subf %34, %39 : vector<2x8x128xf32>
    %41 = arith.mulf %40, %40 : vector<2x8x128xf32>
    %cst_20 = arith.constant dense<0.000000e+00> : vector<2x128xf32>
    %42 = vector.multi_reduction <add>, %41, %cst_20 [1] : vector<2x8x128xf32> to vector<2x128xf32>
    %43 = vector.shape_cast %42 : vector<2x128xf32> to vector<2x1x128xf32>
    %cst_21 = arith.constant 8.000000e+00 : f32
    %44 = vector.broadcast %cst_21 : f32 to vector<2x1x128xf32>
    %45 = arith.divf %43, %44 : vector<2x1x128xf32>
    %cst_22 = arith.constant 9.99999974E-6 : f32
    %46 = vector.broadcast %cst_22 : f32 to vector<2x1x128xf32>
    %47 = arith.addf %45, %46 : vector<2x1x128xf32>
    %48 = math.rsqrt %47 : vector<2x1x128xf32>
    %49 = vector.broadcast %48 : vector<2x1x128xf32> to vector<2x8x128xf32>
    %50 = arith.mulf %40, %49 : vector<2x8x128xf32>
    %cst_23 = arith.constant 0.000000e+00 : f32
    %51 = vector.broadcast %cst_23 : f32 to vector<2x8x128xf32>
    %52 = arith.maximumf %50, %51 : vector<2x8x128xf32>
    %53 = vector.shape_cast %52 : vector<2x8x128xf32> to vector<16x128xf32>
    %54 = arith.truncf %53 : vector<16x128xf32> to vector<16x128xbf16>
    %c0_24 = arith.constant 0 : index
    %c0_25 = arith.constant 0 : index
    %55 = vector.load %arg5[%c0_24, %c0_25] : memref<128x128xbf16, #tpu.memory_space<vmem>>, vector<128x128xbf16>
    %cst_26 = arith.constant dense<0.000000e+00> : vector<16x128xf32>
    %56 = tpu.matmul %54, %55, %cst_26 {dimension_numbers = #tpu.dot_dimension_numbers<[1], [0], [0], [1], [0, 0, 1, 1], [], []>} : vector<16x128xbf16>, vector<128x128xbf16>, vector<16x128xf32> -> vector<16x128xf32>
    %57 = vector.shape_cast %56 : vector<16x128xf32> to vector<2x8x128xf32>
    %cst_27 = arith.constant dense<0.000000e+00> : vector<2x128xf32>
    %58 = vector.multi_reduction <add>, %57, %cst_27 [1] : vector<2x8x128xf32> to vector<2x128xf32>
    %59 = vector.shape_cast %58 : vector<2x128xf32> to vector<2x1x128xf32>
    %cst_28 = arith.constant 8.000000e+00 : f32
    %60 = vector.broadcast %cst_28 : f32 to vector<2x1x128xf32>
    %61 = arith.divf %59, %60 : vector<2x1x128xf32>
    %62 = vector.broadcast %61 : vector<2x1x128xf32> to vector<2x8x128xf32>
    %63 = arith.subf %57, %62 : vector<2x8x128xf32>
    %64 = arith.mulf %63, %63 : vector<2x8x128xf32>
    %cst_29 = arith.constant dense<0.000000e+00> : vector<2x128xf32>
    %65 = vector.multi_reduction <add>, %64, %cst_29 [1] : vector<2x8x128xf32> to vector<2x128xf32>
    %66 = vector.shape_cast %65 : vector<2x128xf32> to vector<2x1x128xf32>
    %cst_30 = arith.constant 8.000000e+00 : f32
    %67 = vector.broadcast %cst_30 : f32 to vector<2x1x128xf32>
    %68 = arith.divf %66, %67 : vector<2x1x128xf32>
    %cst_31 = arith.constant 9.99999974E-6 : f32
    %69 = vector.broadcast %cst_31 : f32 to vector<2x1x128xf32>
    %70 = arith.addf %68, %69 : vector<2x1x128xf32>
    %71 = math.rsqrt %70 : vector<2x1x128xf32>
    %72 = vector.broadcast %71 : vector<2x1x128xf32> to vector<2x8x128xf32>
    %73 = arith.mulf %63, %72 : vector<2x8x128xf32>
    %74 = vector.extract_strided_slice %73 {offsets = [0, 0, 0], sizes = [1, 8, 128], strides = [1, 1, 1]} : vector<2x8x128xf32> to vector<1x8x128xf32>
    %75 = vector.shape_cast %74 : vector<1x8x128xf32> to vector<8x128xf32>
    %76 = vector.extract_strided_slice %73 {offsets = [1, 0, 0], sizes = [1, 8, 128], strides = [1, 1, 1]} : vector<2x8x128xf32> to vector<1x8x128xf32>
    %77 = vector.shape_cast %76 : vector<1x8x128xf32> to vector<8x128xf32>
    %cst_32 = arith.constant dense<0.000000e+00> : vector<128x128xf32>
    %78 = tpu.matmul %75, %77, %cst_32 {dimension_numbers = #tpu.dot_dimension_numbers<[0], [0], [1], [1], [0, 1, 1, 1], [], []>} : vector<8x128xf32>, vector<8x128xf32>, vector<128x128xf32> -> vector<128x128xf32>
    %cst_33 = arith.constant 1.250000e-01 : f32
    %79 = vector.broadcast %cst_33 : f32 to vector<128x128xf32>
    %80 = arith.mulf %78, %79 : vector<128x128xf32>
    %81 = arith.mulf %80, %80 : vector<128x128xf32>
    %82 = vector.shape_cast %81 : vector<128x128xf32> to vector<1x128x128xf32>
    %cst_34 = arith.constant dense<0.000000e+00> : vector<1xf32>
    %83 = vector.multi_reduction <add>, %82, %cst_34 [1, 2] : vector<1x128x128xf32> to vector<1xf32>
    %84 = vector.shape_cast %83 : vector<1xf32> to vector<1x1x1xf32>
    %85 = vector.extract %84[0, 0, 0] : f32 from vector<1x1x1xf32>
    %86 = arith.mulf %75, %77 : vector<8x128xf32>
    %cst_35 = arith.constant dense<0.000000e+00> : vector<128xf32>
    %87 = vector.multi_reduction <add>, %86, %cst_35 [0] : vector<8x128xf32> to vector<128xf32>
    %88 = vector.shape_cast %87 : vector<128xf32> to vector<1x128xf32>
    %cst_36 = arith.constant 1.250000e-01 : f32
    %89 = vector.broadcast %cst_36 : f32 to vector<1x128xf32>
    %90 = arith.mulf %88, %89 : vector<1x128xf32>
    %cst_37 = arith.constant 1.000000e+00 : f32
    %91 = vector.broadcast %cst_37 : f32 to vector<1x128xf32>
    %92 = arith.subf %90, %91 : vector<1x128xf32>
    %93 = arith.mulf %92, %92 : vector<1x128xf32>
    %94 = vector.shape_cast %93 : vector<1x128xf32> to vector<1x1x128xf32>
    %cst_38 = arith.constant dense<0.000000e+00> : vector<1xf32>
    %95 = vector.multi_reduction <add>, %94, %cst_38 [1, 2] : vector<1x1x128xf32> to vector<1xf32>
    %96 = vector.shape_cast %95 : vector<1xf32> to vector<1x1x1xf32>
    %97 = vector.extract %96[0, 0, 0] : f32 from vector<1x1x1xf32>
    %98 = arith.mulf %90, %90 : vector<1x128xf32>
    %99 = vector.shape_cast %98 : vector<1x128xf32> to vector<1x1x128xf32>
    %cst_39 = arith.constant dense<0.000000e+00> : vector<1xf32>
    %100 = vector.multi_reduction <add>, %99, %cst_39 [1, 2] : vector<1x1x128xf32> to vector<1xf32>
    %101 = vector.shape_cast %100 : vector<1xf32> to vector<1x1x1xf32>
    %102 = vector.extract %101[0, 0, 0] : f32 from vector<1x1x1xf32>
    %103 = arith.subf %85, %102 : f32
    %cst_40 = arith.constant 5.100000e-03 : f32
    %104 = arith.mulf %cst_40, %103 : f32
    %105 = arith.addf %97, %104 : f32
    %c0_41 = arith.constant 0 : index
    %c0_42 = arith.constant 0 : index
    %106 = memref.load %arg6[%c0_41, %c0_42] : memref<1x1xf32, #tpu.memory_space<smem>>
    memref.store %105, %arg6[%c0_41, %c0_42] : memref<1x1xf32, #tpu.memory_space<smem>>
    return
  }
}

</mosaic_0001>

<bundles_post_ra>
// kernel: tpu_custom_call.1
= control target key start
LH: loop header
LB: loop body
LE: loop exit
PB: predicated region body
PF: predicated region fallthrough
CT: control target
= control target key end

     0   :  { %11 = vsyncpa [#allocation3], 0  ;;  %s5113_s0 = inlined_call_operand.hbm [shape: f32[8,1024], index: 0, kind: input, shape index: {}]   ;;  %s5114_s1 = inlined_call_operand.hbm [shape: f32[8,1024], index: 1, kind: input, shape index: {}]   ;;  %s5115_s2 = inlined_call_operand.hbm [shape: bf16[1024,512], index: 2, kind: input, shape index: {}]   ;;  %s5116_s3 = inlined_call_operand.hbm [shape: bf16[512,128], index: 3, kind: input, shape index: {}]   ;;  %s5117_s4 = inlined_call_operand.hbm [shape: bf16[128,128], index: 4, kind: input, shape index: {}]   ;;  %s5118_s5 = inlined_call_operand.hbm [shape: bf16[128,128], index: 5, kind: input, shape index: {}]   ;;  %s5119_s6 = inlined_call_operand.hbm [shape: f32[1,1], index: 6, kind: output, shape index: {}]  }
   0x1   :  { %12 = vsyncpa [#allocation6], 0 }
   0x2   :  { %13 = vsyncpa [#allocation9], 0 }
   0x3   :  { %14 = vsyncpa [#allocation12], 0 }
   0x4   :  { %15 = vsyncpa [#allocation4], 0  ;;  %s4578_s21 = smov [#allocation5]   ;;  %s4579_s23 = smov [#allocation8]  }
   0x5   :  { %s32_s22 = sshll.u32 %s4578_s21, 4  ;;  %s53_s24 = sshll.u32 %s4579_s23, 4  ;;  %s33_s22 = int_to_ptr.vmem [resolvable:$true] %s32_s22  ;;  %s54_s24 = int_to_ptr.vmem [resolvable:$true] %s53_s24 }
   0x6   :  { %s4448_s25 = scalar_lea.vmem %s33_s22, 1024  ;;  %p4453_p1 = scmp.lt.s32.totalorder %s33_s22, %s33_s22 }
   0x7   :  { %p4449_p0 = scmp.ne.s32.totalorder %s33_s22, %s4448_s25  ;;  %p4454_p2 = scmp.lt.s32.totalorder %s4448_s25, %s4448_s25 }
   0x9   :  { %p4455_p3 = por %p4454_p2, %p4453_p1 }
   0xb   :  { %p4456_p4 = pnand %p4455_p3, %p4449_p0 }
   0xd   :  { %4459 = shalt.err (!%p4456_p4)
}
   0xe   :  { %35 = dma.hbm_to_vmem [thread:$0]  %s5114_s1, 1024, %s33_s22, [#allocation6]  }
   0xf   :  { %s4468_s28 = scalar_lea.vmem %s54_s24, 4096  ;;  %p4473_p6 = scmp.lt.s32.totalorder %s54_s24, %s54_s24 }
  0x10   :  { %p4469_p5 = scmp.ne.s32.totalorder %s54_s24, %s4468_s28  ;;  %p4474_p7 = scmp.lt.s32.totalorder %s4468_s28, %s4468_s28 }
  0x12   :  { %p4475_p8 = por %p4474_p7, %p4473_p6 }
  0x14   :  { %p4476_p9 = pnand %p4475_p8, %p4469_p5 }
  0x16   :  { %4479 = shalt.err (!%p4476_p9)
}
  0x17   :  { %s4580_s29 = smov 64   ;;  %s4581_s30 = smov 4  }
  0x18   :  { %59 = dma.hbm_to_vmem [thread:$0]  %s5116_s3, 4096, %s54_s24, [#allocation9], %s4580_s29, %s4580_s29, %s4581_s30  }
  0x19   :  { %s4582_s9 = smov [#allocation2]   ;;  %s4583_s11 = smov [#allocation7]  }
  0x1a   :  { %s22_s10 = sshll.u32 %s4582_s9, 4  ;;  %s41_s1 = sshll.u32 %s4583_s11, 4  ;;  %s23_s10 = int_to_ptr.vmem [resolvable:$true] %s22_s10  ;;  %s42_s1 = int_to_ptr.vmem [resolvable:$true] %s41_s1 }
  0x1b   :  { %s4488_s12 = scalar_lea.vmem %s23_s10, 1024  ;;  %p4493_p11 = scmp.lt.s32.totalorder %s23_s10, %s23_s10 }
  0x1c   :  { %p4489_p10 = scmp.ne.s32.totalorder %s23_s10, %s4488_s12  ;;  %p4494_p12 = scmp.lt.s32.totalorder %s4488_s12, %s4488_s12 }
  0x1e   :  { %p4495_p13 = por %p4494_p12, %p4493_p11 }
  0x20   :  { %p4496_p0 = pnand %p4495_p13, %p4489_p10 }
  0x22   :  { %4499 = shalt.err (!%p4496_p0)
}
  0x23   :  { %25 = dma.hbm_to_vmem [thread:$0]  %s5113_s0, 1024, %s23_s10, [#allocation3]  }
  0x24   :  { %s4508_s15 = scalar_lea.vmem %s42_s1, 32768  ;;  %p4513_p2 = scmp.lt.s32.totalorder %s42_s1, %s42_s1 }
  0x25   :  { %p4509_p1 = scmp.ne.s32.totalorder %s42_s1, %s4508_s15  ;;  %p4514_p3 = scmp.lt.s32.totalorder %s4508_s15, %s4508_s15 }
  0x27   :  { %p4515_p4 = por %p4514_p3, %p4513_p2 }
  0x29   :  { %p4516_p5 = pnand %p4515_p4, %p4509_p1 }
  0x2b   :  { %4519 = shalt.err (!%p4516_p5)
}
  0x2c   :  { %s4584_s3 = smov 256   ;;  %s4585_s16 = smov 16  }
  0x2d   :  { %47 = dma.hbm_to_vmem [thread:$0]  %s5115_s2, 32768, %s42_s1, [#allocation6], %s4584_s3, %s4584_s3, %s4585_s16  }
  0x2e   :  { %s4586_s19 = smov [#allocation10]   ;;  %s4587_s21 = smov [#allocation11]  }
  0x2f   :  { %s65_s20 = sshll.u32 %s4586_s19, 4  ;;  %s77_s22 = sshll.u32 %s4587_s21, 4  ;;  %s66_s20 = int_to_ptr.vmem [resolvable:$true] %s65_s20  ;;  %s78_s22 = int_to_ptr.vmem [resolvable:$true] %s77_s22 }
  0x30   :  { %s4528_s0 = scalar_lea.vmem %s66_s20, 1024  ;;  %p4533_p7 = scmp.lt.s32.totalorder %s66_s20, %s66_s20 }
  0x31   :  { %p4529_p6 = scmp.ne.s32.totalorder %s66_s20, %s4528_s0  ;;  %p4534_p8 = scmp.lt.s32.totalorder %s4528_s0, %s4528_s0 }
  0x33   :  { %p4535_p9 = por %p4534_p8, %p4533_p7 }
  0x35   :  { %p4536_p10 = pnand %p4535_p9, %p4529_p6 }
  0x37   :  { %4539 = shalt.err (!%p4536_p10)
}
  0x38   :  { %71 = dma.hbm_to_vmem [thread:$0]  %s5117_s4, 1024, %s66_s20, [#allocation9], %s4580_s29, %s4580_s29, %s4581_s30  }
  0x39   :  { %s4548_s2 = scalar_lea.vmem %s78_s22, 1024  ;;  %p4553_p12 = scmp.lt.s32.totalorder %s78_s22, %s78_s22 }
  0x3a   :  { %p4549_p11 = scmp.ne.s32.totalorder %s78_s22, %s4548_s2  ;;  %p4554_p13 = scmp.lt.s32.totalorder %s4548_s2, %s4548_s2 }
  0x3c   :  { %p4555_p0 = por %p4554_p13, %p4553_p12 }
  0x3e   :  { %p4556_p1 = pnand %p4555_p0, %p4549_p11 }
  0x40   :  { %4559 = shalt.err (!%p4556_p1)
}
  0x41   :  { %83 = dma.hbm_to_vmem [thread:$0]  %s5118_s5, 1024, %s78_s22, [#allocation12], %s4580_s29, %s4580_s29, %s4581_s30  }
  0x42   :  { %4568 = dma.done.wait [#allocation3], 1024  }
  0x43   :  { %4569 = vsyncadd [#allocation3], 4294966272 }
  0x44   :  { %4570 = dma.done.wait [#allocation6], 33792  }
  0x45   :  { %4571 = vsyncadd [#allocation6], 4294933504 }
  0x46   :  { %4572 = dma.done.wait [#allocation9], 5120  }
  0x47   :  { %4573 = vsyncadd [#allocation9], 4294962176 }
  0x48   :  { %4574 = dma.done.wait [#allocation12], 1024  }
  0x49   :  { %4575 = vsyncadd [#allocation12], 4294966272  ;;  %v3823_v0 = vld [vmem:[#allocation7 + $0xe4] ss:$16 sps:$4 sm:$0xff]   ;;  %v3827_v2 = vld [vmem:[#allocation7 + $0xe0] ss:$16 sps:$4 sm:$0xff]  }
  0x4a   :  { %v3825_v1 = vld [vmem:[#allocation7 + $0x2e4] ss:$16 sps:$4 sm:$0xff]   ;;  %1655 = vmatprep.subr.bf16.mxu0 %v3823_v0  ;;  %v3828_v3 = vld [vmem:[#allocation7 + $0x2e0] ss:$16 sps:$4 sm:$0xff]   ;;  %v360_v46 = vld [vmem:[#allocation2 + $0x8] sm:$0xff]  ;;  %vm4589_vm0 = vmmov 0  }
  0x4b   :  { %1696 = vmatprep.subr.bf16.mxu1 %v3825_v1  ;;  %v3829_v4 = vld [vmem:[#allocation7 + $0xc4] ss:$16 sps:$4 sm:$0xff]   ;;  %1656 = vmatpush1.bf16.msra.mxu0 %v3827_v2  ;;  %v3833_v6 = vld [vmem:[#allocation7 + $0xc0] ss:$16 sps:$4 sm:$0xff]   ;;  %v4653_v49 = vpack.c.bf16 %v360_v46, %v360_v46  ;;  %v362_v50 = vld [vmem:[#allocation2 + $0x18] sm:$0xff]  ;;  %vm3292_vm1 = vcmask 1040384  }
  0x4c   :  { %1697 = vmatpush1.bf16.msra.mxu1 %v3828_v3  ;;  %v3831_v5 = vld [vmem:[#allocation7 + $0x2c4] ss:$16 sps:$4 sm:$0xff]   ;;  %1657 = vmatprep.subr.bf16.mxu0 %v3829_v4  ;;  %v3834_v7 = vld [vmem:[#allocation7 + $0x2c0] ss:$16 sps:$4 sm:$0xff]   ;;  %v4655_v52 = vpack.c.bf16 %v362_v50, %v362_v50  ;;  %vm3032_vm2 = vcmask 64512   ;;  %s4590_s7 = smov [#allocation13]  }
  0x4d   :  { %1698 = vmatprep.subr.bf16.mxu1 %v3831_v5  ;;  %v3835_v8 = vld [vmem:[#allocation7 + $0xa4] ss:$16 sps:$4 sm:$0xff]   ;;  %v3839_v10 = vld [vmem:[#allocation7 + $0xa0] ss:$16 sps:$4 sm:$0xff]   ;;  %1687 = vmatprep.mubr.bf16.mxu0 %v4653_v49 }
  0x4e   :  { %v3837_v9 = vld [vmem:[#allocation7 + $0x2a4] ss:$16 sps:$4 sm:$0xff]   ;;  %v3840_v11 = vld [vmem:[#allocation7 + $0x2a0] ss:$16 sps:$4 sm:$0xff]   ;;  %1728 = vmatprep.mubr.bf16.mxu1 %v4655_v52 }
  0x4f   :  { %1658 = vmatpush1.bf16.msra.mxu0 %v3833_v6  ;;  %v3841_v12 = vld [vmem:[#allocation7 + $0x84] ss:$16 sps:$4 sm:$0xff]   ;;  %v3845_v14 = vld [vmem:[#allocation7 + $0x80] ss:$16 sps:$4 sm:$0xff]  }
  0x50   :  { %1699 = vmatpush1.bf16.msra.mxu1 %v3834_v7  ;;  %1659 = vmatprep.subr.bf16.mxu0 %v3835_v8  ;;  %v3843_v13 = vld [vmem:[#allocation7 + $0x284] ss:$16 sps:$4 sm:$0xff]   ;;  %v3846_v15 = vld [vmem:[#allocation7 + $0x280] ss:$16 sps:$4 sm:$0xff]  }
  0x51   :  { %1700 = vmatprep.subr.bf16.mxu1 %v3837_v9  ;;  %v3847_v16 = vld [vmem:[#allocation7 + $0x64] ss:$16 sps:$4 sm:$0xff]   ;;  %v3851_v18 = vld [vmem:[#allocation7 + $0x60] ss:$16 sps:$4 sm:$0xff]  }
  0x52   :  { %v3849_v17 = vld [vmem:[#allocation7 + $0x264] ss:$16 sps:$4 sm:$0xff]   ;;  %v3852_v19 = vld [vmem:[#allocation7 + $0x260] ss:$16 sps:$4 sm:$0xff]  }
  0x53   :  { %1660 = vmatpush1.bf16.msra.mxu0 %v3839_v10  ;;  %v3853_v20 = vld [vmem:[#allocation7 + $0x44] ss:$16 sps:$4 sm:$0xff]   ;;  %v3857_v22 = vld [vmem:[#allocation7 + $0x40] ss:$16 sps:$4 sm:$0xff]  }
  0x54   :  { %1701 = vmatpush1.bf16.msra.mxu1 %v3840_v11  ;;  %1661 = vmatprep.subr.bf16.mxu0 %v3841_v12  ;;  %v3855_v21 = vld [vmem:[#allocation7 + $0x244] ss:$16 sps:$4 sm:$0xff]   ;;  %v3858_v23 = vld [vmem:[#allocation7 + $0x240] ss:$16 sps:$4 sm:$0xff]  }
  0x55   :  { %1702 = vmatprep.subr.bf16.mxu1 %v3843_v13  ;;  %v3859_v24 = vld [vmem:[#allocation7 + $0x24] ss:$16 sps:$4 sm:$0xff]   ;;  %v3863_v26 = vld [vmem:[#allocation7 + $0x20] ss:$16 sps:$4 sm:$0xff]  }
  0x56   :  { %v3861_v25 = vld [vmem:[#allocation7 + $0x224] ss:$16 sps:$4 sm:$0xff]   ;;  %v3864_v27 = vld [vmem:[#allocation7 + $0x220] ss:$16 sps:$4 sm:$0xff]  }
  0x57   :  { %1662 = vmatpush1.bf16.msra.mxu0 %v3845_v14  ;;  %v3865_v28 = vld [vmem:[#allocation7 + $0x4] ss:$16 sps:$4 sm:$0xff]   ;;  %v3869_v30 = vld [vmem:[#allocation7] ss:$16 sps:$4 sm:$0xff]  }
  0x58   :  { %1703 = vmatpush1.bf16.msra.mxu1 %v3846_v15  ;;  %1663 = vmatprep.subr.bf16.mxu0 %v3847_v16  ;;  %v3867_v29 = vld [vmem:[#allocation7 + $0x204] ss:$16 sps:$4 sm:$0xff]   ;;  %v3870_v31 = vld [vmem:[#allocation7 + $0x200] ss:$16 sps:$4 sm:$0xff]  }
  0x59   :  { %1704 = vmatprep.subr.bf16.mxu1 %v3849_v17  ;;  %v3871_v32 = vld [vmem:[#allocation7 + $0x1e4] ss:$16 sps:$4 sm:$0xff]   ;;  %v3875_v34 = vld [vmem:[#allocation7 + $0x1e0] ss:$16 sps:$4 sm:$0xff]  }
  0x5a   :  { %v3873_v33 = vld [vmem:[#allocation7 + $0x3e4] ss:$16 sps:$4 sm:$0xff]   ;;  %v3876_v35 = vld [vmem:[#allocation7 + $0x3e0] ss:$16 sps:$4 sm:$0xff]  }
  0x5b   :  { %1664 = vmatpush1.bf16.msra.mxu0 %v3851_v18  ;;  %v3877_v36 = vld [vmem:[#allocation7 + $0x1c4] ss:$16 sps:$4 sm:$0xff]   ;;  %v3881_v38 = vld [vmem:[#allocation7 + $0x1c0] ss:$16 sps:$4 sm:$0xff]  }
  0x5c   :  { %1705 = vmatpush1.bf16.msra.mxu1 %v3852_v19  ;;  %1665 = vmatprep.subr.bf16.mxu0 %v3853_v20  ;;  %v3879_v37 = vld [vmem:[#allocation7 + $0x3c4] ss:$16 sps:$4 sm:$0xff]   ;;  %v3882_v39 = vld [vmem:[#allocation7 + $0x3c0] ss:$16 sps:$4 sm:$0xff]  }
  0x5d   :  { %1706 = vmatprep.subr.bf16.mxu1 %v3855_v21  ;;  %v3883_v40 = vld [vmem:[#allocation7 + $0x1a4] ss:$16 sps:$4 sm:$0xff]   ;;  %v3887_v42 = vld [vmem:[#allocation7 + $0x1a0] ss:$16 sps:$4 sm:$0xff]  }
  0x5e   :  { %v3885_v41 = vld [vmem:[#allocation7 + $0x3a4] ss:$16 sps:$4 sm:$0xff]   ;;  %v3888_v43 = vld [vmem:[#allocation7 + $0x3a0] ss:$16 sps:$4 sm:$0xff]  }
  0x5f   :  { %1666 = vmatpush1.bf16.msra.mxu0 %v3857_v22  ;;  %v3889_v44 = vld [vmem:[#allocation7 + $0x184] ss:$16 sps:$4 sm:$0xff]   ;;  %v3893_v47 = vld [vmem:[#allocation7 + $0x180] ss:$16 sps:$4 sm:$0xff]  }
  0x60   :  { %1707 = vmatpush1.bf16.msra.mxu1 %v3858_v23  ;;  %1667 = vmatprep.subr.bf16.mxu0 %v3859_v24  ;;  %v3891_v45 = vld [vmem:[#allocation7 + $0x384] ss:$16 sps:$4 sm:$0xff]   ;;  %v3894_v48 = vld [vmem:[#allocation7 + $0x380] ss:$16 sps:$4 sm:$0xff]  }
  0x61   :  { %1708 = vmatprep.subr.bf16.mxu1 %v3861_v25  ;;  %v3895_v51 = vld [vmem:[#allocation7 + $0x164] ss:$16 sps:$4 sm:$0xff]   ;;  %v3899_v54 = vld [vmem:[#allocation7 + $0x160] ss:$16 sps:$4 sm:$0xff]  }
  0x62   :  { %v3897_v53 = vld [vmem:[#allocation7 + $0x364] ss:$16 sps:$4 sm:$0xff]   ;;  %v3900_v55 = vld [vmem:[#allocation7 + $0x360] ss:$16 sps:$4 sm:$0xff]  }
  0x63   :  { %1668 = vmatpush1.bf16.msra.mxu0 %v3863_v26  ;;  %v3901_v56 = vld [vmem:[#allocation7 + $0x144] ss:$16 sps:$4 sm:$0xff]   ;;  %v3905_v58 = vld [vmem:[#allocation7 + $0x140] ss:$16 sps:$4 sm:$0xff]  }
  0x64   :  { %1709 = vmatpush1.bf16.msra.mxu1 %v3864_v27  ;;  %1669 = vmatprep.subr.bf16.mxu0 %v3865_v28  ;;  %v3903_v57 = vld [vmem:[#allocation7 + $0x344] ss:$16 sps:$4 sm:$0xff]   ;;  %v3906_v59 = vld [vmem:[#allocation7 + $0x340] ss:$16 sps:$4 sm:$0xff]  }
  0x65   :  { %1710 = vmatprep.subr.bf16.mxu1 %v3867_v29  ;;  %v3907_v60 = vld [vmem:[#allocation7 + $0x124] ss:$16 sps:$4 sm:$0xff]   ;;  %v3911_v62 = vld [vmem:[#allocation7 + $0x120] ss:$16 sps:$4 sm:$0xff]  }
  0x66   :  { %v3909_v61 = vld [vmem:[#allocation7 + $0x324] ss:$16 sps:$4 sm:$0xff]   ;;  %v3912_v63 = vld [vmem:[#allocation7 + $0x320] ss:$16 sps:$4 sm:$0xff]  }
  0x67   :  { %1670 = vmatpush1.bf16.msra.mxu0 %v3869_v30  ;;  %v3913_v0 = vld [vmem:[#allocation7 + $0x104] ss:$16 sps:$4 sm:$0xff]   ;;  %v3917_v2 = vld [vmem:[#allocation7 + $0x100] ss:$16 sps:$4 sm:$0xff]  }
  0x68   :  { %1711 = vmatpush1.bf16.msra.mxu1 %v3870_v31  ;;  %1671 = vmatprep.subr.bf16.mxu0 %v3871_v32  ;;  %v3915_v1 = vld [vmem:[#allocation7 + $0x304] ss:$16 sps:$4 sm:$0xff]   ;;  %v3918_v3 = vld [vmem:[#allocation7 + $0x300] ss:$16 sps:$4 sm:$0xff]  }
  0x69   :  { %1712 = vmatprep.subr.bf16.mxu1 %v3873_v33  ;;  %v359_v4 = vld [vmem:[#allocation2] sm:$0xff]  ;;  %v361_v5 = vld [vmem:[#allocation2 + $0x10] sm:$0xff] }
  0x6a   :  { %v3921_v6 = vld [vmem:[#allocation7 + $0x4e4] ss:$16 sps:$4 sm:$0xff]   ;;  %v4659_v8 = vpack.c.bf16 %v359_v4, %v359_v4  ;;  %v4661_v9 = vpack.c.bf16 %v361_v5, %v361_v5  ;;  %v3919_v10 = vld [vmem:[#allocation7 + $0x4e0] ss:$16 sps:$4 sm:$0xff]  }
  0x6b   :  { %1672 = vmatpush2.bf16.msra.mxu0 %v3875_v34  ;;  %v3924_v7 = vld [vmem:[#allocation7 + $0x6e4] ss:$16 sps:$4 sm:$0xff]   ;;  %v3922_v11 = vld [vmem:[#allocation7 + $0x6e0] ss:$16 sps:$4 sm:$0xff]   ;;  %v364_v34 = vld [vmem:[#allocation2 + $0x28] sm:$0xff] }
  0x6c   :  { %1713 = vmatpush2.bf16.msra.mxu1 %v3876_v35  ;;  %1673 = vmatprep.subr.bf16.mxu0 %v3877_v36  ;;  %v3927_v12 = vld [vmem:[#allocation7 + $0x4c4] ss:$16 sps:$4 sm:$0xff]   ;;  %v3925_v14 = vld [vmem:[#allocation7 + $0x4c0] ss:$16 sps:$4 sm:$0xff]  }
  0x6d   :  { %1714 = vmatprep.subr.bf16.mxu1 %v3879_v37  ;;  %v3930_v13 = vld [vmem:[#allocation7 + $0x6c4] ss:$16 sps:$4 sm:$0xff]   ;;  %v3928_v15 = vld [vmem:[#allocation7 + $0x6c0] ss:$16 sps:$4 sm:$0xff]   ;;  %v4665_v37 = vpack.c.bf16 %v364_v34, %v364_v34  ;;  %v4033_v34 = vld [vmem:[#allocation7 + $0x88] ss:$16 sps:$4 sm:$0xff]  }
  0x6e   :  { %v3933_v16 = vld [vmem:[#allocation7 + $0x4a4] ss:$16 sps:$4 sm:$0xff]   ;;  %v3931_v18 = vld [vmem:[#allocation7 + $0x4a0] ss:$16 sps:$4 sm:$0xff]  }
  0x6f   :  { %1674 = vmatpush2.bf16.msra.mxu0 %v3881_v38  ;;  %v3936_v17 = vld [vmem:[#allocation7 + $0x6a4] ss:$16 sps:$4 sm:$0xff]   ;;  %v3934_v19 = vld [vmem:[#allocation7 + $0x6a0] ss:$16 sps:$4 sm:$0xff]   ;;  %v366_v38 = vld [vmem:[#allocation2 + $0x38] sm:$0xff] }
  0x70   :  { %1715 = vmatpush2.bf16.msra.mxu1 %v3882_v39  ;;  %1675 = vmatprep.subr.bf16.mxu0 %v3883_v40  ;;  %v3939_v20 = vld [vmem:[#allocation7 + $0x484] ss:$16 sps:$4 sm:$0xff]   ;;  %v3937_v22 = vld [vmem:[#allocation7 + $0x480] ss:$16 sps:$4 sm:$0xff]   ;;  %v4667_v40 = vpack.c.bf16 %v366_v38, %v366_v38  ;;  %v4044_v38 = vld [vmem:[#allocation7 + $0x26c] ss:$16 sps:$4 sm:$0xff]  }
  0x71   :  { %1716 = vmatprep.subr.bf16.mxu1 %v3885_v41  ;;  %v3942_v21 = vld [vmem:[#allocation7 + $0x684] ss:$16 sps:$4 sm:$0xff]   ;;  %v3940_v23 = vld [vmem:[#allocation7 + $0x680] ss:$16 sps:$4 sm:$0xff]  }
  0x72   :  { %v3945_v24 = vld [vmem:[#allocation7 + $0x464] ss:$16 sps:$4 sm:$0xff]   ;;  %v3943_v26 = vld [vmem:[#allocation7 + $0x460] ss:$16 sps:$4 sm:$0xff]  }
  0x73   :  { %1676 = vmatpush2.bf16.msra.mxu0 %v3887_v42  ;;  %v3948_v25 = vld [vmem:[#allocation7 + $0x664] ss:$16 sps:$4 sm:$0xff]   ;;  %v3946_v27 = vld [vmem:[#allocation7 + $0x660] ss:$16 sps:$4 sm:$0xff]  }
  0x74   :  { %1717 = vmatpush2.bf16.msra.mxu1 %v3888_v43  ;;  %1677 = vmatprep.subr.bf16.mxu0 %v3889_v44  ;;  %v3951_v28 = vld [vmem:[#allocation7 + $0x444] ss:$16 sps:$4 sm:$0xff]   ;;  %v3949_v30 = vld [vmem:[#allocation7 + $0x440] ss:$16 sps:$4 sm:$0xff]  }
  0x75   :  { %1718 = vmatprep.subr.bf16.mxu1 %v3891_v45  ;;  %v3954_v29 = vld [vmem:[#allocation7 + $0x644] ss:$16 sps:$4 sm:$0xff]   ;;  %v3952_v31 = vld [vmem:[#allocation7 + $0x640] ss:$16 sps:$4 sm:$0xff]  }
  0x76   :  { %v3957_v32 = vld [vmem:[#allocation7 + $0x424] ss:$16 sps:$4 sm:$0xff]   ;;  %v3955_v35 = vld [vmem:[#allocation7 + $0x420] ss:$16 sps:$4 sm:$0xff]  }
  0x77   :  { %1678 = vmatpush2.bf16.msra.mxu0 %v3893_v47  ;;  %v3960_v33 = vld [vmem:[#allocation7 + $0x624] ss:$16 sps:$4 sm:$0xff]   ;;  %v3958_v36 = vld [vmem:[#allocation7 + $0x620] ss:$16 sps:$4 sm:$0xff]  }
  0x78   :  { %1719 = vmatpush2.bf16.msra.mxu1 %v3894_v48  ;;  %1679 = vmatprep.subr.bf16.mxu0 %v3895_v51  ;;  %v3963_v39 = vld [vmem:[#allocation7 + $0x404] ss:$16 sps:$4 sm:$0xff]   ;;  %v3961_v42 = vld [vmem:[#allocation7 + $0x400] ss:$16 sps:$4 sm:$0xff]  }
  0x79   :  { %1720 = vmatprep.subr.bf16.mxu1 %v3897_v53  ;;  %v3966_v41 = vld [vmem:[#allocation7 + $0x604] ss:$16 sps:$4 sm:$0xff]   ;;  %v3964_v43 = vld [vmem:[#allocation7 + $0x600] ss:$16 sps:$4 sm:$0xff]  }
  0x7a   :  { %v3969_v44 = vld [vmem:[#allocation7 + $0x5e4] ss:$16 sps:$4 sm:$0xff]   ;;  %v3967_v46 = vld [vmem:[#allocation7 + $0x5e0] ss:$16 sps:$4 sm:$0xff]  }
  0x7b   :  { %1680 = vmatpush2.bf16.msra.mxu0 %v3899_v54  ;;  %v3972_v45 = vld [vmem:[#allocation7 + $0x7e4] ss:$16 sps:$4 sm:$0xff]   ;;  %v3970_v47 = vld [vmem:[#allocation7 + $0x7e0] ss:$16 sps:$4 sm:$0xff]  }
  0x7c   :  { %1721 = vmatpush2.bf16.msra.mxu1 %v3900_v55  ;;  %1681 = vmatprep.subr.bf16.mxu0 %v3901_v56  ;;  %v3975_v48 = vld [vmem:[#allocation7 + $0x5c4] ss:$16 sps:$4 sm:$0xff]   ;;  %v3973_v51 = vld [vmem:[#allocation7 + $0x5c0] ss:$16 sps:$4 sm:$0xff]  }
  0x7d   :  { %1722 = vmatprep.subr.bf16.mxu1 %v3903_v57  ;;  %v3978_v50 = vld [vmem:[#allocation7 + $0x7c4] ss:$16 sps:$4 sm:$0xff]   ;;  %v3976_v53 = vld [vmem:[#allocation7 + $0x7c0] ss:$16 sps:$4 sm:$0xff]  }
  0x7e   :  { %v3981_v54 = vld [vmem:[#allocation7 + $0x5a4] ss:$16 sps:$4 sm:$0xff]   ;;  %v3979_v56 = vld [vmem:[#allocation7 + $0x5a0] ss:$16 sps:$4 sm:$0xff]  }
  0x7f   :  { %1682 = vmatpush2.bf16.msra.mxu0 %v3905_v58  ;;  %v3984_v55 = vld [vmem:[#allocation7 + $0x7a4] ss:$16 sps:$4 sm:$0xff]   ;;  %v3982_v57 = vld [vmem:[#allocation7 + $0x7a0] ss:$16 sps:$4 sm:$0xff]  }
  0x80   :  { %1723 = vmatpush2.bf16.msra.mxu1 %v3906_v59  ;;  %1683 = vmatprep.subr.bf16.mxu0 %v3907_v60  ;;  %v3987_v58 = vld [vmem:[#allocation7 + $0x584] ss:$16 sps:$4 sm:$0xff]   ;;  %v3985_v60 = vld [vmem:[#allocation7 + $0x580] ss:$16 sps:$4 sm:$0xff]  }
  0x81   :  { %1724 = vmatprep.subr.bf16.mxu1 %v3909_v61  ;;  %v3990_v59 = vld [vmem:[#allocation7 + $0x784] ss:$16 sps:$4 sm:$0xff]   ;;  %v3988_v61 = vld [vmem:[#allocation7 + $0x780] ss:$16 sps:$4 sm:$0xff]  }
  0x82   :  { %v3997_v4 = vld [vmem:[#allocation7 + $0x540] ss:$16 sps:$4 sm:$0xff]  }
  0x83   :  { %1684 = vmatpush2.bf16.msra.mxu0 %v3911_v62  ;;  %v3993_v62 = vld [vmem:[#allocation7 + $0x564] ss:$16 sps:$4 sm:$0xff]   ;;  %v4000_v5 = vld [vmem:[#allocation7 + $0x740] ss:$16 sps:$4 sm:$0xff]  }
  0x84   :  { %1725 = vmatpush2.bf16.msra.mxu1 %v3912_v63  ;;  %1685 = vmatprep.subr.bf16.mxu0 %v3913_v0  ;;  %v3996_v63 = vld [vmem:[#allocation7 + $0x764] ss:$16 sps:$4 sm:$0xff]   ;;  %v3991_v0 = vld [vmem:[#allocation7 + $0x560] ss:$16 sps:$4 sm:$0xff]  }
  0x85   :  { %1726 = vmatprep.subr.bf16.mxu1 %v3915_v1  ;;  %v3994_v1 = vld [vmem:[#allocation7 + $0x760] ss:$16 sps:$4 sm:$0xff]  }
  0x87   :  { %1686 = vmatpush2.bf16.msra.mxu0 %v3917_v2  ;;  %v3999_v2 = vld [vmem:[#allocation7 + $0x544] ss:$16 sps:$4 sm:$0xff]  }
  0x88   :  { %1727 = vmatpush2.bf16.msra.mxu1 %v3918_v3  ;;  %1737 = vmatprep.subr.bf16.mxu0 %v3921_v6  ;;  %v4002_v3 = vld [vmem:[#allocation7 + $0x744] ss:$16 sps:$4 sm:$0xff]  }
  0x89   :  { %1778 = vmatprep.subr.bf16.mxu1 %v3924_v7  ;;  %v4005_v6 = vld [vmem:[#allocation7 + $0x524] ss:$16 sps:$4 sm:$0xff]  }
  0x8a   :  { %1688 = vmatmul.mubr.bf16.vlgmr.msra.gmra.mxu0 %v4659_v8  ;;  %v4008_v7 = vld [vmem:[#allocation7 + $0x724] ss:$16 sps:$4 sm:$0xff]  }
  0x8b   :  { %1729 = vmatmul.mubr.bf16.vlgmr.msra.gmra.mxu1 %v4661_v9  ;;  %1738 = vmatpush1.bf16.msra.mxu0 %v3919_v10  ;;  %v4003_v10 = vld [vmem:[#allocation7 + $0x520] ss:$16 sps:$4 sm:$0xff]  }
  0x8c   :  { %1779 = vmatpush1.bf16.msra.mxu1 %v3922_v11  ;;  %1739 = vmatprep.subr.bf16.mxu0 %v3927_v12  ;;  %v4006_v11 = vld [vmem:[#allocation7 + $0x720] ss:$16 sps:$4 sm:$0xff]   ;;  %v4011_v12 = vld [vmem:[#allocation7 + $0x504] ss:$16 sps:$4 sm:$0xff]  }
  0x8d   :  { %1780 = vmatprep.subr.bf16.mxu1 %v3930_v13  ;;  %1769 = vmatprep.mubr.bf16.mxu0 %v4665_v37  ;;  %v4014_v13 = vld [vmem:[#allocation7 + $0x704] ss:$16 sps:$4 sm:$0xff]  }
  0x8e   :  { %1810 = vmatprep.mubr.bf16.mxu1 %v4667_v40 }
  0x8f   :  { %1740 = vmatpush1.bf16.msra.mxu0 %v3925_v14  ;;  %v4009_v14 = vld [vmem:[#allocation7 + $0x500] ss:$16 sps:$4 sm:$0xff]  }
  0x90   :  { %1781 = vmatpush1.bf16.msra.mxu1 %v3928_v15  ;;  %1741 = vmatprep.subr.bf16.mxu0 %v3933_v16  ;;  %v4012_v15 = vld [vmem:[#allocation7 + $0x700] ss:$16 sps:$4 sm:$0xff]  }
  0x91   :  { %1782 = vmatprep.subr.bf16.mxu1 %v3936_v17  ;;  %v363_v16 = vld [vmem:[#allocation2 + $0x20] sm:$0xff]  ;;  %v365_v17 = vld [vmem:[#allocation2 + $0x30] sm:$0xff] }
  0x93   :  { %1742 = vmatpush1.bf16.msra.mxu0 %v3931_v18  ;;  %v4017_v18 = vld [vmem:[#allocation7 + $0xec] ss:$16 sps:$4 sm:$0xff]  }
  0x94   :  { %1783 = vmatpush1.bf16.msra.mxu1 %v3934_v19  ;;  %1743 = vmatprep.subr.bf16.mxu0 %v3939_v20  ;;  %v4020_v19 = vld [vmem:[#allocation7 + $0x2ec] ss:$16 sps:$4 sm:$0xff]   ;;  %v4671_v20 = vpack.c.bf16 %v363_v16, %v363_v16 }
  0x95   :  { %1784 = vmatprep.subr.bf16.mxu1 %v3942_v21  ;;  %v4673_v21 = vpack.c.bf16 %v365_v17, %v365_v17  ;;  %v4706_v16 = vld [vmem:[#allocation7 + $0x12c] ss:$16 sps:$4 sm:$0xff]  }
  0x96   :  { %v4708_v17 = vld [vmem:[#allocation7 + $0x32c] ss:$16 sps:$4 sm:$0xff]  }
  0x97   :  { %1744 = vmatpush1.bf16.msra.mxu0 %v3937_v22  ;;  %v4015_v22 = vld [vmem:[#allocation7 + $0xe8] ss:$16 sps:$4 sm:$0xff]  }
  0x98   :  { %1785 = vmatpush1.bf16.msra.mxu1 %v3940_v23  ;;  %1745 = vmatprep.subr.bf16.mxu0 %v3945_v24  ;;  %v4018_v23 = vld [vmem:[#allocation7 + $0x2e8] ss:$16 sps:$4 sm:$0xff]   ;;  %v4023_v24 = vld [vmem:[#allocation7 + $0xcc] ss:$16 sps:$4 sm:$0xff]  }
  0x99   :  { %1786 = vmatprep.subr.bf16.mxu1 %v3948_v25  ;;  %v4026_v25 = vld [vmem:[#allocation7 + $0x2cc] ss:$16 sps:$4 sm:$0xff]  }
  0x9b   :  { %1746 = vmatpush1.bf16.msra.mxu0 %v3943_v26  ;;  %v4021_v26 = vld [vmem:[#allocation7 + $0xc8] ss:$16 sps:$4 sm:$0xff]  }
  0x9c   :  { %1787 = vmatpush1.bf16.msra.mxu1 %v3946_v27  ;;  %1747 = vmatprep.subr.bf16.mxu0 %v3951_v28  ;;  %v4024_v27 = vld [vmem:[#allocation7 + $0x2c8] ss:$16 sps:$4 sm:$0xff]   ;;  %v4029_v28 = vld [vmem:[#allocation7 + $0xac] ss:$16 sps:$4 sm:$0xff]  }
  0x9d   :  { %1788 = vmatprep.subr.bf16.mxu1 %v3954_v29  ;;  %v4032_v29 = vld [vmem:[#allocation7 + $0x2ac] ss:$16 sps:$4 sm:$0xff]  }
  0x9f   :  { %1748 = vmatpush1.bf16.msra.mxu0 %v3949_v30  ;;  %v4027_v30 = vld [vmem:[#allocation7 + $0xa8] ss:$16 sps:$4 sm:$0xff]  }
  0xa0   :  { %1789 = vmatpush1.bf16.msra.mxu1 %v3952_v31  ;;  %1749 = vmatprep.subr.bf16.mxu0 %v3957_v32  ;;  %v4030_v31 = vld [vmem:[#allocation7 + $0x2a8] ss:$16 sps:$4 sm:$0xff]   ;;  %v4035_v32 = vld [vmem:[#allocation7 + $0x8c] ss:$16 sps:$4 sm:$0xff]  }
  0xa1   :  { %1790 = vmatprep.subr.bf16.mxu1 %v3960_v33  ;;  %v4038_v33 = vld [vmem:[#allocation7 + $0x28c] ss:$16 sps:$4 sm:$0xff]  }
  0xa3   :  { %1750 = vmatpush1.bf16.msra.mxu0 %v3955_v35  ;;  %v4036_v35 = vld [vmem:[#allocation7 + $0x288] ss:$16 sps:$4 sm:$0xff]  }
  0xa4   :  { %1791 = vmatpush1.bf16.msra.mxu1 %v3958_v36  ;;  %1751 = vmatprep.subr.bf16.mxu0 %v3963_v39  ;;  %v4041_v36 = vld [vmem:[#allocation7 + $0x6c] ss:$16 sps:$4 sm:$0xff]   ;;  %v4039_v39 = vld [vmem:[#allocation7 + $0x68] ss:$16 sps:$4 sm:$0xff]  }
  0xa5   :  { %1792 = vmatprep.subr.bf16.mxu1 %v3966_v41  ;;  %v4050_v41 = vld [vmem:[#allocation7 + $0x24c] ss:$16 sps:$4 sm:$0xff]  }
  0xa7   :  { %1752 = vmatpush1.bf16.msra.mxu0 %v3961_v42  ;;  %v4045_v42 = vld [vmem:[#allocation7 + $0x48] ss:$16 sps:$4 sm:$0xff]  }
  0xa8   :  { %1793 = vmatpush1.bf16.msra.mxu1 %v3964_v43  ;;  %1753 = vmatprep.subr.bf16.mxu0 %v3969_v44  ;;  %v4048_v43 = vld [vmem:[#allocation7 + $0x248] ss:$16 sps:$4 sm:$0xff]   ;;  %v4053_v44 = vld [vmem:[#allocation7 + $0x2c] ss:$16 sps:$4 sm:$0xff]  }
  0xa9   :  { %1794 = vmatprep.subr.bf16.mxu1 %v3972_v45  ;;  %v4056_v45 = vld [vmem:[#allocation7 + $0x22c] ss:$16 sps:$4 sm:$0xff]  }
  0xab   :  { %1754 = vmatpush2.bf16.msra.mxu0 %v3967_v46  ;;  %v4051_v46 = vld [vmem:[#allocation7 + $0x28] ss:$16 sps:$4 sm:$0xff]  }
  0xac   :  { %1795 = vmatpush2.bf16.msra.mxu1 %v3970_v47  ;;  %1755 = vmatprep.subr.bf16.mxu0 %v3975_v48  ;;  %v4054_v47 = vld [vmem:[#allocation7 + $0x228] ss:$16 sps:$4 sm:$0xff]   ;;  %v4059_v48 = vld [vmem:[#allocation7 + $0xc] ss:$16 sps:$4 sm:$0xff]  }
  0xad   :  { %1796 = vmatprep.subr.bf16.mxu1 %v3978_v50  ;;  %v4062_v50 = vld [vmem:[#allocation7 + $0x20c] ss:$16 sps:$4 sm:$0xff]  }
  0xaf   :  { %1756 = vmatpush2.bf16.msra.mxu0 %v3973_v51  ;;  %v4057_v51 = vld [vmem:[#allocation7 + $0x8] ss:$16 sps:$4 sm:$0xff]  }
  0xb0   :  { %1797 = vmatpush2.bf16.msra.mxu1 %v3976_v53  ;;  %1757 = vmatprep.subr.bf16.mxu0 %v3981_v54  ;;  %v4060_v53 = vld [vmem:[#allocation7 + $0x208] ss:$16 sps:$4 sm:$0xff]   ;;  %v4065_v54 = vld [vmem:[#allocation7 + $0x1ec] ss:$16 sps:$4 sm:$0xff]  }
  0xb1   :  { %1798 = vmatprep.subr.bf16.mxu1 %v3984_v55  ;;  %v4068_v55 = vld [vmem:[#allocation7 + $0x3ec] ss:$16 sps:$4 sm:$0xff]  }
  0xb3   :  { %1758 = vmatpush2.bf16.msra.mxu0 %v3979_v56  ;;  %v4063_v56 = vld [vmem:[#allocation7 + $0x1e8] ss:$16 sps:$4 sm:$0xff]  }
  0xb4   :  { %1799 = vmatpush2.bf16.msra.mxu1 %v3982_v57  ;;  %1759 = vmatprep.subr.bf16.mxu0 %v3987_v58  ;;  %v4066_v57 = vld [vmem:[#allocation7 + $0x3e8] ss:$16 sps:$4 sm:$0xff]   ;;  %v4071_v58 = vld [vmem:[#allocation7 + $0x1cc] ss:$16 sps:$4 sm:$0xff]  }
  0xb5   :  { %1800 = vmatprep.subr.bf16.mxu1 %v3990_v59  ;;  %v4074_v59 = vld [vmem:[#allocation7 + $0x3cc] ss:$16 sps:$4 sm:$0xff]  }
  0xb7   :  { %1760 = vmatpush2.bf16.msra.mxu0 %v3985_v60  ;;  %v4069_v60 = vld [vmem:[#allocation7 + $0x1c8] ss:$16 sps:$4 sm:$0xff]  }
  0xb8   :  { %1801 = vmatpush2.bf16.msra.mxu1 %v3988_v61  ;;  %1761 = vmatprep.subr.bf16.mxu0 %v3993_v62  ;;  %v4072_v61 = vld [vmem:[#allocation7 + $0x3c8] ss:$16 sps:$4 sm:$0xff]   ;;  %v4077_v62 = vld [vmem:[#allocation7 + $0x1ac] ss:$16 sps:$4 sm:$0xff]  }
  0xb9   :  { %1802 = vmatprep.subr.bf16.mxu1 %v3996_v63  ;;  %v4080_v63 = vld [vmem:[#allocation7 + $0x3ac] ss:$16 sps:$4 sm:$0xff]  }
  0xbb   :  { %1762 = vmatpush2.bf16.msra.mxu0 %v3991_v0  ;;  %v4075_v0 = vld [vmem:[#allocation7 + $0x1a8] ss:$16 sps:$4 sm:$0xff]  }
  0xbc   :  { %1803 = vmatpush2.bf16.msra.mxu1 %v3994_v1  ;;  %1763 = vmatprep.subr.bf16.mxu0 %v3999_v2  ;;  %v4078_v1 = vld [vmem:[#allocation7 + $0x3a8] ss:$16 sps:$4 sm:$0xff]   ;;  %v4083_v2 = vld [vmem:[#allocation7 + $0x18c] ss:$16 sps:$4 sm:$0xff]  }
  0xbd   :  { %1804 = vmatprep.subr.bf16.mxu1 %v4002_v3  ;;  %v4679_v3 = vld [vmem:[#allocation7 + $0x38c] ss:$16 sps:$4 sm:$0xff]  }
  0xbf   :  { %1764 = vmatpush2.bf16.msra.mxu0 %v3997_v4  ;;  %v4681_v4 = vld [vmem:[#allocation7 + $0x188] ss:$16 sps:$4 sm:$0xff]  }
  0xc0   :  { %1805 = vmatpush2.bf16.msra.mxu1 %v4000_v5  ;;  %1765 = vmatprep.subr.bf16.mxu0 %v4005_v6  ;;  %v4683_v5 = vld [vmem:[#allocation7 + $0x388] ss:$16 sps:$4 sm:$0xff]   ;;  %v4685_v6 = vld [vmem:[#allocation7 + $0x16c] ss:$16 sps:$4 sm:$0xff]  }
  0xc1   :  { %1806 = vmatprep.subr.bf16.mxu1 %v4008_v7  ;;  %v4688_v7 = vld [vmem:[#allocation7 + $0x36c] ss:$16 sps:$4 sm:$0xff]  }
  0xc3   :  { %1766 = vmatpush2.bf16.msra.mxu0 %v4003_v10  ;;  %v4690_v10 = vld [vmem:[#allocation7 + $0x168] ss:$16 sps:$4 sm:$0xff]  }
  0xc4   :  { %1807 = vmatpush2.bf16.msra.mxu1 %v4006_v11  ;;  %1767 = vmatprep.subr.bf16.mxu0 %v4011_v12  ;;  %v4692_v11 = vld [vmem:[#allocation7 + $0x368] ss:$16 sps:$4 sm:$0xff]   ;;  %v4694_v12 = vld [vmem:[#allocation7 + $0x14c] ss:$16 sps:$4 sm:$0xff]  }
  0xc5   :  { %1808 = vmatprep.subr.bf16.mxu1 %v4014_v13  ;;  %v4696_v13 = vld [vmem:[#allocation7 + $0x34c] ss:$16 sps:$4 sm:$0xff]  }
  0xc7   :  { %1768 = vmatpush2.bf16.msra.mxu0 %v4009_v14  ;;  %v4702_v14 = vld [vmem:[#allocation7 + $0x148] ss:$16 sps:$4 sm:$0xff]  }
  0xc8   :  { %1809 = vmatpush2.bf16.msra.mxu1 %v4012_v15  ;;  %1819 = vmatprep.subr.bf16.mxu0 %v4017_v18  ;;  %v4704_v15 = vld [vmem:[#allocation7 + $0x348] ss:$16 sps:$4 sm:$0xff]  }
  0xc9   :  { %1860 = vmatprep.subr.bf16.mxu1 %v4020_v19  ;;  %v4714_v18 = vld [vmem:[#allocation7 + $0x128] ss:$16 sps:$4 sm:$0xff]  }
  0xca   :  { %1770 = vmatmul.mubr.bf16.vlgmr.msra.gmra.mxu0 %v4671_v20  ;;  %v4716_v19 = vld [vmem:[#allocation7 + $0x328] ss:$16 sps:$4 sm:$0xff]  }
  0xcb   :  { %1811 = vmatmul.mubr.bf16.vlgmr.msra.gmra.mxu1 %v4673_v21  ;;  %1820 = vmatpush1.bf16.msra.mxu0 %v4015_v22  ;;  %v4718_v22 = vld [vmem:[#allocation7 + $0x10c] ss:$16 sps:$4 sm:$0xff]  }
  0xcc   :  { %1861 = vmatpush1.bf16.msra.mxu1 %v4018_v23  ;;  %1821 = vmatprep.subr.bf16.mxu0 %v4023_v24  ;;  %v4720_v23 = vld [vmem:[#allocation7 + $0x30c] ss:$16 sps:$4 sm:$0xff]   ;;  %v4726_v24 = vld [vmem:[#allocation7 + $0x108] ss:$16 sps:$4 sm:$0xff]  }
  0xcd   :  { %1862 = vmatprep.subr.bf16.mxu1 %v4026_v25  ;;  %1851 = vmatprep.mubr.bf16.mxu0 %v4653_v49  ;;  %v4042_v49 = vld [vmem:[#allocation7 + $0x268] ss:$16 sps:$4 sm:$0xff]  }
  0xce   :  { %1892 = vmatprep.mubr.bf16.mxu1 %v4655_v52  ;;  %v4047_v52 = vld [vmem:[#allocation7 + $0x4c] ss:$16 sps:$4 sm:$0xff]   ;;  %v4728_v25 = vld [vmem:[#allocation7 + $0x308] ss:$16 sps:$4 sm:$0xff]  }
  0xcf   :  { %1822 = vmatpush1.bf16.msra.mxu0 %v4021_v26  ;;  %v4730_v26 = vld [vmem:[#allocation7 + $0x4ec] ss:$16 sps:$4 sm:$0xff]  }
  0xd0   :  { %1863 = vmatpush1.bf16.msra.mxu1 %v4024_v27  ;;  %1823 = vmatprep.subr.bf16.mxu0 %v4029_v28  ;;  %v4732_v27 = vld [vmem:[#allocation7 + $0x6ec] ss:$16 sps:$4 sm:$0xff]   ;;  %v4738_v28 = vld [vmem:[#allocation7 + $0x4e8] ss:$16 sps:$4 sm:$0xff]  }
  0xd1   :  { %1864 = vmatprep.subr.bf16.mxu1 %v4032_v29  ;;  %v4740_v29 = vld [vmem:[#allocation7 + $0x6e8] ss:$16 sps:$4 sm:$0xff]  }
  0xd3   :  { %1824 = vmatpush1.bf16.msra.mxu0 %v4027_v30  ;;  %v4744_v30 = vld [vmem:[#allocation7 + $0x4cc] ss:$16 sps:$4 sm:$0xff]  }
  0xd4   :  { %1865 = vmatpush1.bf16.msra.mxu1 %v4030_v31  ;;  %1825 = vmatprep.subr.bf16.mxu0 %v4035_v32  ;;  %v4746_v31 = vld [vmem:[#allocation7 + $0x6cc] ss:$16 sps:$4 sm:$0xff]   ;;  %v4750_v32 = vld [vmem:[#allocation7 + $0x4c8] ss:$16 sps:$4 sm:$0xff]  }
  0xd5   :  { %1866 = vmatprep.subr.bf16.mxu1 %v4038_v33  ;;  %v4752_v33 = vld [vmem:[#allocation7 + $0x6c8] ss:$16 sps:$4 sm:$0xff]  }
  0xd7   :  { %1826 = vmatpush1.bf16.msra.mxu0 %v4033_v34  ;;  %v4756_v34 = vld [vmem:[#allocation7 + $0x4ac] ss:$16 sps:$4 sm:$0xff]  }
  0xd8   :  { %1867 = vmatpush1.bf16.msra.mxu1 %v4036_v35  ;;  %1827 = vmatprep.subr.bf16.mxu0 %v4041_v36  ;;  %v4758_v35 = vld [vmem:[#allocation7 + $0x6ac] ss:$16 sps:$4 sm:$0xff]   ;;  %v4764_v36 = vld [vmem:[#allocation7 + $0x4a8] ss:$16 sps:$4 sm:$0xff]  }
  0xd9   :  { %1868 = vmatprep.subr.bf16.mxu1 %v4044_v38  ;;  %v4766_v38 = vld [vmem:[#allocation7 + $0x6a8] ss:$16 sps:$4 sm:$0xff]  }
  0xdb   :  { %1828 = vmatpush1.bf16.msra.mxu0 %v4039_v39  ;;  %v4778_v39 = vld [vmem:[#allocation7 + $0x488] ss:$16 sps:$4 sm:$0xff]  }
  0xdc   :  { %1869 = vmatpush1.bf16.msra.mxu1 %v4042_v49  ;;  %1829 = vmatprep.subr.bf16.mxu0 %v4047_v52  ;;  %v4780_v49 = vld [vmem:[#allocation7 + $0x688] ss:$16 sps:$4 sm:$0xff]   ;;  %v4782_v52 = vld [vmem:[#allocation7 + $0x46c] ss:$16 sps:$4 sm:$0xff]  }
  0xdd   :  { %1870 = vmatprep.subr.bf16.mxu1 %v4050_v41  ;;  %v4794_v41 = vld [vmem:[#allocation7 + $0x668] ss:$16 sps:$4 sm:$0xff]  }
  0xdf   :  { %1830 = vmatpush1.bf16.msra.mxu0 %v4045_v42  ;;  %v4798_v42 = vld [vmem:[#allocation7 + $0x44c] ss:$16 sps:$4 sm:$0xff]  }
  0xe0   :  { %1871 = vmatpush1.bf16.msra.mxu1 %v4048_v43  ;;  %1831 = vmatprep.subr.bf16.mxu0 %v4053_v44  ;;  %v4800_v43 = vld [vmem:[#allocation7 + $0x64c] ss:$16 sps:$4 sm:$0xff]   ;;  %v4804_v44 = vld [vmem:[#allocation7 + $0x448] ss:$16 sps:$4 sm:$0xff]  }
  0xe1   :  { %1872 = vmatprep.subr.bf16.mxu1 %v4056_v45  ;;  %v4806_v45 = vld [vmem:[#allocation7 + $0x648] ss:$16 sps:$4 sm:$0xff]  }
  0xe2   :  { %5161 = vst [vmem:[#allocation19_spill] sm:$0xff] %v4806_v45 }
  0xe3   :  { %1832 = vmatpush1.bf16.msra.mxu0 %v4051_v46  ;;  %v4810_v46 = vld [vmem:[#allocation7 + $0x42c] ss:$16 sps:$4 sm:$0xff]  }
  0xe4   :  { %1873 = vmatpush1.bf16.msra.mxu1 %v4054_v47  ;;  %1833 = vmatprep.subr.bf16.mxu0 %v4059_v48  ;;  %5162 = vst [vmem:[#allocation20_spill] sm:$0xff] %v4810_v46  ;;  %v4812_v47 = vld [vmem:[#allocation7 + $0x62c] ss:$16 sps:$4 sm:$0xff]   ;;  %v4816_v48 = vld [vmem:[#allocation7 + $0x428] ss:$16 sps:$4 sm:$0xff]  }
  0xe5   :  { %1874 = vmatprep.subr.bf16.mxu1 %v4062_v50  ;;  %5163 = vst [vmem:[#allocation21_spill] sm:$0xff] %v4812_v47  ;;  %5164 = vst [vmem:[#allocation22_spill] sm:$0xff] %v4816_v48  ;;  %v4818_v50 = vld [vmem:[#allocation7 + $0x628] ss:$16 sps:$4 sm:$0xff]  }
  0xe6   :  { %5165 = vst [vmem:[#allocation23_spill] sm:$0xff] %v4818_v50 }
  0xe7   :  { %1834 = vmatpush1.bf16.msra.mxu0 %v4057_v51  ;;  %v4822_v51 = vld [vmem:[#allocation7 + $0x40c] ss:$16 sps:$4 sm:$0xff]  }
  0xe8   :  { %1875 = vmatpush1.bf16.msra.mxu1 %v4060_v53  ;;  %1835 = vmatprep.subr.bf16.mxu0 %v4065_v54  ;;  %5166 = vst [vmem:[#allocation24_spill] sm:$0xff] %v4822_v51  ;;  %v4824_v53 = vld [vmem:[#allocation7 + $0x60c] ss:$16 sps:$4 sm:$0xff]   ;;  %v4828_v54 = vld [vmem:[#allocation7 + $0x408] ss:$16 sps:$4 sm:$0xff]  }
  0xe9   :  { %1876 = vmatprep.subr.bf16.mxu1 %v4068_v55  ;;  %5167 = vst [vmem:[#allocation25_spill] sm:$0xff] %v4824_v53  ;;  %5168 = vst [vmem:[#allocation26_spill] sm:$0xff] %v4828_v54  ;;  %v4830_v55 = vld [vmem:[#allocation7 + $0x608] ss:$16 sps:$4 sm:$0xff]  }
  0xea   :  { %5169 = vst [vmem:[#allocation27_spill] sm:$0xff] %v4830_v55 }
  0xeb   :  { %1836 = vmatpush2.bf16.msra.mxu0 %v4063_v56  ;;  %v4834_v56 = vld [vmem:[#allocation7 + $0x5ec] ss:$16 sps:$4 sm:$0xff]  }
  0xec   :  { %1877 = vmatpush2.bf16.msra.mxu1 %v4066_v57  ;;  %1837 = vmatprep.subr.bf16.mxu0 %v4071_v58  ;;  %5170 = vst [vmem:[#allocation28_spill] sm:$0xff] %v4834_v56  ;;  %v4836_v57 = vld [vmem:[#allocation7 + $0x7ec] ss:$16 sps:$4 sm:$0xff]   ;;  %v4840_v58 = vld [vmem:[#allocation7 + $0x5e8] ss:$16 sps:$4 sm:$0xff]  }
  0xed   :  { %1878 = vmatprep.subr.bf16.mxu1 %v4074_v59  ;;  %5171 = vst [vmem:[#allocation29_spill] sm:$0xff] %v4836_v57  ;;  %5172 = vst [vmem:[#allocation30_spill] sm:$0xff] %v4840_v58  ;;  %v4842_v59 = vld [vmem:[#allocation7 + $0x7e8] ss:$16 sps:$4 sm:$0xff]  }
  0xee   :  { %5173 = vst [vmem:[#allocation31_spill] sm:$0xff] %v4842_v59 }
  0xef   :  { %1838 = vmatpush2.bf16.msra.mxu0 %v4069_v60  ;;  %v4846_v60 = vld [vmem:[#allocation7 + $0x5cc] ss:$16 sps:$4 sm:$0xff]  }
  0xf0   :  { %1879 = vmatpush2.bf16.msra.mxu1 %v4072_v61  ;;  %1839 = vmatprep.subr.bf16.mxu0 %v4077_v62  ;;  %5174 = vst [vmem:[#allocation32_spill] sm:$0xff] %v4846_v60  ;;  %v4848_v61 = vld [vmem:[#allocation7 + $0x7cc] ss:$16 sps:$4 sm:$0xff]   ;;  %v4852_v62 = vld [vmem:[#allocation7 + $0x5c8] ss:$16 sps:$4 sm:$0xff]  }
  0xf1   :  { %1880 = vmatprep.subr.bf16.mxu1 %v4080_v63  ;;  %5175 = vst [vmem:[#allocation33_spill] sm:$0xff] %v4848_v61  ;;  %5176 = vst [vmem:[#allocation34_spill] sm:$0xff] %v4852_v62  ;;  %v4854_v63 = vld [vmem:[#allocation7 + $0x7c8] ss:$16 sps:$4 sm:$0xff]  }
  0xf2   :  { %5177 = vst [vmem:[#allocation35_spill] sm:$0xff] %v4854_v63 }
  0xf3   :  { %1840 = vmatpush2.bf16.msra.mxu0 %v4075_v0  ;;  %v4858_v0 = vld [vmem:[#allocation7 + $0x5ac] ss:$16 sps:$4 sm:$0xff]  }
  0xf4   :  { %1881 = vmatpush2.bf16.msra.mxu1 %v4078_v1  ;;  %1841 = vmatprep.subr.bf16.mxu0 %v4083_v2  ;;  %5178 = vst [vmem:[#allocation36_spill] sm:$0xff] %v4858_v0  ;;  %v4860_v1 = vld [vmem:[#allocation7 + $0x7ac] ss:$16 sps:$4 sm:$0xff]   ;;  %v4864_v2 = vld [vmem:[#allocation7 + $0x5a8] ss:$16 sps:$4 sm:$0xff]  }
  0xf5   :  { %1882 = vmatprep.subr.bf16.mxu1 %v4679_v3  ;;  %5179 = vst [vmem:[#allocation37_spill] sm:$0xff] %v4860_v1  ;;  %5180 = vst [vmem:[#allocation38_spill] sm:$0xff] %v4864_v2 }
  0xf7   :  { %1842 = vmatpush2.bf16.msra.mxu0 %v4681_v4 }
  0xf8   :  { %1883 = vmatpush2.bf16.msra.mxu1 %v4683_v5  ;;  %1843 = vmatprep.subr.bf16.mxu0 %v4685_v6 }
  0xf9   :  { %1884 = vmatprep.subr.bf16.mxu1 %v4688_v7 }
  0xfb   :  { %1844 = vmatpush2.bf16.msra.mxu0 %v4690_v10 }
  0xfc   :  { %1885 = vmatpush2.bf16.msra.mxu1 %v4692_v11  ;;  %1845 = vmatprep.subr.bf16.mxu0 %v4694_v12 }
  0xfd   :  { %1886 = vmatprep.subr.bf16.mxu1 %v4696_v13 }
  0xff   :  { %1846 = vmatpush2.bf16.msra.mxu0 %v4702_v14 }
 0x100   :  { %1887 = vmatpush2.bf16.msra.mxu1 %v4704_v15  ;;  %1847 = vmatprep.subr.bf16.mxu0 %v4706_v16 }
 0x101   :  { %1888 = vmatprep.subr.bf16.mxu1 %v4708_v17 }
 0x103   :  { %1848 = vmatpush2.bf16.msra.mxu0 %v4714_v18 }
 0x104   :  { %1889 = vmatpush2.bf16.msra.mxu1 %v4716_v19  ;;  %1849 = vmatprep.subr.bf16.mxu0 %v4718_v22 }
 0x105   :  { %1890 = vmatprep.subr.bf16.mxu1 %v4720_v23 }
 0x107   :  { %1850 = vmatpush2.bf16.msra.mxu0 %v4726_v24 }
 0x108   :  { %1891 = vmatpush2.bf16.msra.mxu1 %v4728_v25  ;;  %1901 = vmatprep.subr.bf16.mxu0 %v4730_v26 }
 0x109   :  { %1942 = vmatprep.subr.bf16.mxu1 %v4732_v27 }
 0x10a   :  { %1852 = vmatmul.mubr.bf16.vlgmr.msra.gmra.mxu0 %v4659_v8  ;;  %v4770_v8 = vld [vmem:[#allocation7 + $0x48c] ss:$16 sps:$4 sm:$0xff]  }
 0x10b   :  { %1893 = vmatmul.mubr.bf16.vlgmr.msra.gmra.mxu1 %v4661_v9  ;;  %1902 = vmatpush1.bf16.msra.mxu0 %v4738_v28  ;;  %v4772_v9 = vld [vmem:[#allocation7 + $0x68c] ss:$16 sps:$4 sm:$0xff]  }
 0x10c   :  { %1943 = vmatpush1.bf16.msra.mxu1 %v4740_v29  ;;  %1903 = vmatprep.subr.bf16.mxu0 %v4744_v30 }
 0x10d   :  { %1944 = vmatprep.subr.bf16.mxu1 %v4746_v31  ;;  %1933 = vmatprep.mubr.bf16.mxu0 %v4665_v37  ;;  %v4784_v37 = vld [vmem:[#allocation7 + $0x66c] ss:$16 sps:$4 sm:$0xff]  }
 0x10e   :  { %1974 = vmatprep.mubr.bf16.mxu1 %v4667_v40  ;;  %v4792_v40 = vld [vmem:[#allocation7 + $0x468] ss:$16 sps:$4 sm:$0xff]  }
 0x10f   :  { %1904 = vmatpush1.bf16.msra.mxu0 %v4750_v32 }
 0x110   :  { %1945 = vmatpush1.bf16.msra.mxu1 %v4752_v33  ;;  %1905 = vmatprep.subr.bf16.mxu0 %v4756_v34 }
 0x111   :  { %1946 = vmatprep.subr.bf16.mxu1 %v4758_v35 }
 0x113   :  { %1906 = vmatpush1.bf16.msra.mxu0 %v4764_v36 }
 0x114   :  { %1947 = vmatpush1.bf16.msra.mxu1 %v4766_v38  ;;  %1907 = vmatprep.subr.bf16.mxu0 %v4770_v8 }
 0x115   :  { %1948 = vmatprep.subr.bf16.mxu1 %v4772_v9 }
 0x117   :  { %1908 = vmatpush1.bf16.msra.mxu0 %v4778_v39 }
 0x118   :  { %1949 = vmatpush1.bf16.msra.mxu1 %v4780_v49  ;;  %1909 = vmatprep.subr.bf16.mxu0 %v4782_v52 }
 0x119   :  { %1950 = vmatprep.subr.bf16.mxu1 %v4784_v37 }
 0x11b   :  { %1910 = vmatpush1.bf16.msra.mxu0 %v4792_v40 }
 0x11c   :  { %1951 = vmatpush1.bf16.msra.mxu1 %v4794_v41  ;;  %1911 = vmatprep.subr.bf16.mxu0 %v4798_v42 }
 0x11d   :  { %1952 = vmatprep.subr.bf16.mxu1 %v4800_v43 }
 0x11f   :  { %1912 = vmatpush1.bf16.msra.mxu0 %v4804_v44 }
 0x120   :  { %1953 = vmatpush1.bf16.msra.mxu1 %v4806_v45  ;;  %1913 = vmatprep.subr.bf16.mxu0 %v4810_v46  ;;  %v4339_v45 = vld [vmem:[#allocation7 + $0x4a4] ss:$16 sps:$4 sm:$0xff]  }
 0x121   :  { %1954 = vmatprep.subr.bf16.mxu1 %v4812_v47 }
 0x123   :  { %1914 = vmatpush1.bf16.msra.mxu0 %v4816_v48  ;;  %v4335_v48 = vld [vmem:[#allocation7 + $0x4c4] ss:$16 sps:$4 sm:$0xff]  }
 0x124   :  { %1955 = vmatpush1.bf16.msra.mxu1 %v4818_v50  ;;  %1915 = vmatprep.subr.bf16.mxu0 %v4822_v51  ;;  %v4329_v51 = vld [vmem:[#allocation7 + $0x100] ss:$16 sps:$4 sm:$0xff]  }
 0x125   :  { %1956 = vmatprep.subr.bf16.mxu1 %v4824_v53  ;;  %v4276_v53 = vld [vmem:[#allocation7 + $0x2a4] ss:$16 sps:$4 sm:$0xff]  }
 0x127   :  { %1916 = vmatpush1.bf16.msra.mxu0 %v4828_v54  ;;  %v4271_v54 = vld [vmem:[#allocation7 + $0xc4] ss:$16 sps:$4 sm:$0xff]  }
 0x128   :  { %1957 = vmatpush1.bf16.msra.mxu1 %v4830_v55  ;;  %1917 = vmatprep.subr.bf16.mxu0 %v4834_v56 }
 0x129   :  { %1958 = vmatprep.subr.bf16.mxu1 %v4836_v57  ;;  %v4268_v57 = vld [vmem:[#allocation7 + $0x2e4] ss:$16 sps:$4 sm:$0xff]  }
 0x12b   :  { %1918 = vmatpush2.bf16.msra.mxu0 %v4840_v58  ;;  %v4866_v58 = vld [vmem:[#allocation7 + $0x7a8] ss:$16 sps:$4 sm:$0xff]  }
 0x12c   :  { %1959 = vmatpush2.bf16.msra.mxu1 %v4842_v59  ;;  %1919 = vmatprep.subr.bf16.mxu0 %v4846_v60  ;;  %5181 = vst [vmem:[#allocation39_spill] sm:$0xff] %v4866_v58  ;;  %v4870_v59 = vld [vmem:[#allocation7 + $0x58c] ss:$16 sps:$4 sm:$0xff]  }
 0x12d   :  { %1960 = vmatprep.subr.bf16.mxu1 %v4848_v61  ;;  %5182 = vst [vmem:[#allocation40_spill] sm:$0xff] %v4870_v59  ;;  %v4872_v60 = vld [vmem:[#allocation7 + $0x78c] ss:$16 sps:$4 sm:$0xff]   ;;  %v4876_v61 = vld [vmem:[#allocation7 + $0x588] ss:$16 sps:$4 sm:$0xff]  }
 0x12e   :  { %5183 = vst [vmem:[#allocation41_spill] sm:$0xff] %v4872_v60  ;;  %5184 = vst [vmem:[#allocation42_spill] sm:$0xff] %v4876_v61 }
 0x12f   :  { %1920 = vmatpush2.bf16.msra.mxu0 %v4852_v62  ;;  %v4878_v62 = vld [vmem:[#allocation7 + $0x788] ss:$16 sps:$4 sm:$0xff]  }
 0x130   :  { %1961 = vmatpush2.bf16.msra.mxu1 %v4854_v63  ;;  %1921 = vmatprep.subr.bf16.mxu0 %v4858_v0  ;;  %5185 = vst [vmem:[#allocation43_spill] sm:$0xff] %v4878_v62  ;;  %v4882_v63 = vld [vmem:[#allocation7 + $0x56c] ss:$16 sps:$4 sm:$0xff]  }
 0x131   :  { %1962 = vmatprep.subr.bf16.mxu1 %v4860_v1  ;;  %5186 = vst [vmem:[#allocation44_spill] sm:$0xff] %v4882_v63  ;;  %v4884_v0 = vld [vmem:[#allocation7 + $0x76c] ss:$16 sps:$4 sm:$0xff]   ;;  %v4888_v1 = vld [vmem:[#allocation7 + $0x568] ss:$16 sps:$4 sm:$0xff]  }
 0x132   :  { %5187 = vst [vmem:[#allocation45_spill] sm:$0xff] %v4884_v0  ;;  %5188 = vst [vmem:[#allocation46_spill] sm:$0xff] %v4888_v1 }
 0x133   :  { %1922 = vmatpush2.bf16.msra.mxu0 %v4864_v2  ;;  %v4890_v2 = vld [vmem:[#allocation7 + $0x768] ss:$16 sps:$4 sm:$0xff]  }
 0x134   :  { %1963 = vmatpush2.bf16.msra.mxu1 %v4866_v58  ;;  %1923 = vmatprep.subr.bf16.mxu0 %v4870_v59  ;;  %5189 = vst [vmem:[#allocation47_spill] sm:$0xff] %v4890_v2  ;;  %v4894_v58 = vld [vmem:[#allocation7 + $0x54c] ss:$16 sps:$4 sm:$0xff]  }
 0x135   :  { %1964 = vmatprep.subr.bf16.mxu1 %v4872_v60  ;;  %5190 = vst [vmem:[#allocation48_spill] sm:$0xff] %v4894_v58  ;;  %v4896_v59 = vld [vmem:[#allocation7 + $0x74c] ss:$16 sps:$4 sm:$0xff]   ;;  %v4900_v60 = vld [vmem:[#allocation7 + $0x548] ss:$16 sps:$4 sm:$0xff]  }
 0x136   :  { %5191 = vst [vmem:[#allocation49_spill] sm:$0xff] %v4896_v59  ;;  %5192 = vst [vmem:[#allocation50_spill] sm:$0xff] %v4900_v60 }
 0x137   :  { %1924 = vmatpush2.bf16.msra.mxu0 %v4876_v61  ;;  %v4902_v61 = vld [vmem:[#allocation7 + $0x748] ss:$16 sps:$4 sm:$0xff]  }
 0x138   :  { %1965 = vmatpush2.bf16.msra.mxu1 %v4878_v62  ;;  %1925 = vmatprep.subr.bf16.mxu0 %v4882_v63  ;;  %5193 = vst [vmem:[#allocation51_spill] sm:$0xff] %v4902_v61  ;;  %v4906_v62 = vld [vmem:[#allocation7 + $0x52c] ss:$16 sps:$4 sm:$0xff]  }
 0x139   :  { %1966 = vmatprep.subr.bf16.mxu1 %v4884_v0  ;;  %5194 = vst [vmem:[#allocation52_spill] sm:$0xff] %v4906_v62  ;;  %v4908_v63 = vld [vmem:[#allocation7 + $0x72c] ss:$16 sps:$4 sm:$0xff]   ;;  %v4912_v0 = vld [vmem:[#allocation7 + $0x528] ss:$16 sps:$4 sm:$0xff]  }
 0x13a   :  { %5195 = vst [vmem:[#allocation53_spill] sm:$0xff] %v4908_v63  ;;  %5196 = vst [vmem:[#allocation54_spill] sm:$0xff] %v4912_v0 }
 0x13b   :  { %1926 = vmatpush2.bf16.msra.mxu0 %v4888_v1  ;;  %v4914_v1 = vld [vmem:[#allocation7 + $0x728] ss:$16 sps:$4 sm:$0xff]  }
 0x13c   :  { %1967 = vmatpush2.bf16.msra.mxu1 %v4890_v2  ;;  %1927 = vmatprep.subr.bf16.mxu0 %v4894_v58  ;;  %5197 = vst [vmem:[#allocation55_spill] sm:$0xff] %v4914_v1  ;;  %v4918_v2 = vld [vmem:[#allocation7 + $0x50c] ss:$16 sps:$4 sm:$0xff]  }
 0x13d   :  { %1968 = vmatprep.subr.bf16.mxu1 %v4896_v59  ;;  %5198 = vst [vmem:[#allocation56_spill] sm:$0xff] %v4918_v2  ;;  %v4920_v58 = vld [vmem:[#allocation7 + $0x70c] ss:$16 sps:$4 sm:$0xff]   ;;  %v4924_v59 = vld [vmem:[#allocation7 + $0x508] ss:$16 sps:$4 sm:$0xff]  }
 0x13e   :  { %5199 = vst [vmem:[#allocation57_spill] sm:$0xff] %v4920_v58  ;;  %5200 = vst [vmem:[#allocation58_spill] sm:$0xff] %v4924_v59 }
 0x13f   :  { %1928 = vmatpush2.bf16.msra.mxu0 %v4900_v60  ;;  %v4926_v60 = vld [vmem:[#allocation7 + $0x708] ss:$16 sps:$4 sm:$0xff]  }
 0x140   :  { %1969 = vmatpush2.bf16.msra.mxu1 %v4902_v61  ;;  %1929 = vmatprep.subr.bf16.mxu0 %v4906_v62  ;;  %5201 = vst [vmem:[#allocation59_spill] sm:$0xff] %v4926_v60  ;;  %v1984_v61 = vld [vmem:[#allocation5 + $0x8] sm:$0xff]  ;;  %v1986_v62 = vld [vmem:[#allocation5 + $0x18] sm:$0xff] }
 0x141   :  { %1970 = vmatprep.subr.bf16.mxu1 %v4908_v63  ;;  %v4267_v63 = vld [vmem:[#allocation7 + $0xe4] ss:$16 sps:$4 sm:$0xff]  }
 0x143   :  { %1930 = vmatpush2.bf16.msra.mxu0 %v4912_v0  ;;  %v4932_v0 = vpack.c.bf16 %v1984_v61, %v1984_v61 }
 0x144   :  { %1971 = vmatpush2.bf16.msra.mxu1 %v4914_v1  ;;  %1931 = vmatprep.subr.bf16.mxu0 %v4918_v2  ;;  %v4934_v1 = vpack.c.bf16 %v1986_v62, %v1986_v62  ;;  %v4269_v2 = vld [vmem:[#allocation7 + $0xe0] ss:$16 sps:$4 sm:$0xff]  }
 0x145   :  { %1972 = vmatprep.subr.bf16.mxu1 %v4920_v58 }
 0x147   :  { %1932 = vmatpush2.bf16.msra.mxu0 %v4924_v59  ;;  %v4270_v59 = vld [vmem:[#allocation7 + $0x2e0] ss:$16 sps:$4 sm:$0xff]  }
 0x148   :  { %1973 = vmatpush2.bf16.msra.mxu1 %v4926_v60  ;;  %1999 = vmatprep.subr.bf16.mxu0 %v4267_v63 }
 0x149   :  { %2040 = vmatprep.subr.bf16.mxu1 %v4268_v57  ;;  %v4272_v57 = vld [vmem:[#allocation7 + $0x2c4] ss:$16 sps:$4 sm:$0xff]  }
 0x14a   :  { %v1689_v56 = vpop.f32.mrf.mxu0  ;;  %1934 = vmatmul.mubr.bf16.vlgmr.msra.gmra.mxu0 %v4671_v20 }
 0x14b   :  { %v1730_v55 = vpop.f32.mrf.mxu1  ;;  %1975 = vmatmul.mubr.bf16.vlgmr.msra.gmra.mxu1 %v4673_v21  ;;  %2000 = vmatpush1.bf16.msra.mxu0 %v4269_v2  ;;  %v4275_v2 = vld [vmem:[#allocation7 + $0xa4] ss:$16 sps:$4 sm:$0xff]  }
 0x14c   :  { %v4938_v58 = vadd.f32 %v1730_v55, %v1689_v56  ;;  %2041 = vmatpush1.bf16.msra.mxu1 %v4270_v59  ;;  %v1691_v60 = vpop.f32.mrf.mxu0  ;;  %2001 = vmatprep.subr.bf16.mxu0 %v4271_v54  ;;  %v4273_v55 = vld [vmem:[#allocation7 + $0xc0] ss:$16 sps:$4 sm:$0xff]  }
 0x14d   :  { %v1732_v63 = vpop.f32.mrf.mxu1  ;;  %2042 = vmatprep.subr.bf16.mxu1 %v4272_v57  ;;  %2031 = vmatprep.mubr.bf16.mxu0 %v4932_v0  ;;  %v4274_v56 = vld [vmem:[#allocation7 + $0x2c0] ss:$16 sps:$4 sm:$0xff]   ;;  %v4280_v57 = vld [vmem:[#allocation7 + $0x284] ss:$16 sps:$4 sm:$0xff]  }
 0x14e   :  { %v4940_v61 = vadd.f32 %v1732_v63, %v1691_v60  ;;  %2072 = vmatprep.mubr.bf16.mxu1 %v4934_v1  ;;  %v1693_v20 = vpop.f32.mrf.mxu0  ;;  %v4277_v54 = vld [vmem:[#allocation7 + $0xa0] ss:$16 sps:$4 sm:$0xff]   ;;  %v4279_v63 = vld [vmem:[#allocation7 + $0x84] ss:$16 sps:$4 sm:$0xff]  }
 0x14f   :  { %v1734_v21 = vpop.f32.mrf.mxu1  ;;  %2002 = vmatpush1.bf16.msra.mxu0 %v4273_v55  ;;  %v4278_v60 = vld [vmem:[#allocation7 + $0x2a0] ss:$16 sps:$4 sm:$0xff]   ;;  %v4283_v55 = vld [vmem:[#allocation7 + $0x64] ss:$16 sps:$4 sm:$0xff]  }
 0x150   :  { %2043 = vmatpush1.bf16.msra.mxu1 %v4274_v56  ;;  %v1694_v62 = vpop.f32.mrf.mxu0  ;;  %2003 = vmatprep.subr.bf16.mxu0 %v4275_v2  ;;  %v4281_v20 = vld [vmem:[#allocation7 + $0x80] ss:$16 sps:$4 sm:$0xff]   ;;  %v4284_v56 = vld [vmem:[#allocation7 + $0x264] ss:$16 sps:$4 sm:$0xff]  }
 0x151   :  { %v1735_v59 = vpop.f32.mrf.mxu1  ;;  %2044 = vmatprep.subr.bf16.mxu1 %v4276_v53  ;;  %v4282_v21 = vld [vmem:[#allocation7 + $0x280] ss:$16 sps:$4 sm:$0xff]   ;;  %v4287_v53 = vld [vmem:[#allocation7 + $0x44] ss:$16 sps:$4 sm:$0xff]  }
 0x152   :  { %v4285_v62 = vld [vmem:[#allocation7 + $0x60] ss:$16 sps:$4 sm:$0xff]   ;;  %v4288_v2 = vld [vmem:[#allocation7 + $0x244] ss:$16 sps:$4 sm:$0xff]  }
 0x153   :  { %2004 = vmatpush1.bf16.msra.mxu0 %v4277_v54  ;;  %v4286_v59 = vld [vmem:[#allocation7 + $0x260] ss:$16 sps:$4 sm:$0xff]  }
 0x154   :  { %2045 = vmatpush1.bf16.msra.mxu1 %v4278_v60  ;;  %2005 = vmatprep.subr.bf16.mxu0 %v4279_v63  ;;  %v4289_v54 = vld [vmem:[#allocation7 + $0x40] ss:$16 sps:$4 sm:$0xff]   ;;  %v4291_v63 = vld [vmem:[#allocation7 + $0x24] ss:$16 sps:$4 sm:$0xff]  }
 0x155   :  { %2046 = vmatprep.subr.bf16.mxu1 %v4280_v57  ;;  %v4290_v60 = vld [vmem:[#allocation7 + $0x240] ss:$16 sps:$4 sm:$0xff]   ;;  %v4292_v57 = vld [vmem:[#allocation7 + $0x224] ss:$16 sps:$4 sm:$0xff]  }
 0x157   :  { %2006 = vmatpush1.bf16.msra.mxu0 %v4281_v20  ;;  %v4293_v20 = vld [vmem:[#allocation7 + $0x20] ss:$16 sps:$4 sm:$0xff]  }
 0x158   :  { %2047 = vmatpush1.bf16.msra.mxu1 %v4282_v21  ;;  %2007 = vmatprep.subr.bf16.mxu0 %v4283_v55  ;;  %v4294_v21 = vld [vmem:[#allocation7 + $0x220] ss:$16 sps:$4 sm:$0xff]   ;;  %v4295_v55 = vld [vmem:[#allocation7 + $0x4] ss:$16 sps:$4 sm:$0xff]  }
 0x159   :  { %2048 = vmatprep.subr.bf16.mxu1 %v4284_v56  ;;  %v4296_v56 = vld [vmem:[#allocation7 + $0x204] ss:$16 sps:$4 sm:$0xff]  }
 0x15b   :  { %2008 = vmatpush1.bf16.msra.mxu0 %v4285_v62  ;;  %v4297_v62 = vld [vmem:[#allocation7] ss:$16 sps:$4 sm:$0xff]  }
 0x15c   :  { %2049 = vmatpush1.bf16.msra.mxu1 %v4286_v59  ;;  %2009 = vmatprep.subr.bf16.mxu0 %v4287_v53  ;;  %v4298_v59 = vld [vmem:[#allocation7 + $0x200] ss:$16 sps:$4 sm:$0xff]   ;;  %v4299_v53 = vld [vmem:[#allocation7 + $0x1e4] ss:$16 sps:$4 sm:$0xff]  }
 0x15d   :  { %2050 = vmatprep.subr.bf16.mxu1 %v4288_v2  ;;  %v4300_v2 = vld [vmem:[#allocation7 + $0x3e4] ss:$16 sps:$4 sm:$0xff]  }
 0x15f   :  { %2010 = vmatpush1.bf16.msra.mxu0 %v4289_v54  ;;  %v4301_v54 = vld [vmem:[#allocation7 + $0x1e0] ss:$16 sps:$4 sm:$0xff]  }
 0x160   :  { %2051 = vmatpush1.bf16.msra.mxu1 %v4290_v60  ;;  %2011 = vmatprep.subr.bf16.mxu0 %v4291_v63  ;;  %v4302_v60 = vld [vmem:[#allocation7 + $0x3e0] ss:$16 sps:$4 sm:$0xff]   ;;  %v4303_v63 = vld [vmem:[#allocation7 + $0x1c4] ss:$16 sps:$4 sm:$0xff]  }
 0x161   :  { %2052 = vmatprep.subr.bf16.mxu1 %v4292_v57  ;;  %v4304_v57 = vld [vmem:[#allocation7 + $0x3c4] ss:$16 sps:$4 sm:$0xff]  }
 0x163   :  { %2012 = vmatpush1.bf16.msra.mxu0 %v4293_v20  ;;  %v4305_v20 = vld [vmem:[#allocation7 + $0x1c0] ss:$16 sps:$4 sm:$0xff]  }
 0x164   :  { %2053 = vmatpush1.bf16.msra.mxu1 %v4294_v21  ;;  %2013 = vmatprep.subr.bf16.mxu0 %v4295_v55  ;;  %v4306_v21 = vld [vmem:[#allocation7 + $0x3c0] ss:$16 sps:$4 sm:$0xff]   ;;  %v4307_v55 = vld [vmem:[#allocation7 + $0x1a4] ss:$16 sps:$4 sm:$0xff]  }
 0x165   :  { %2054 = vmatprep.subr.bf16.mxu1 %v4296_v56  ;;  %v4308_v56 = vld [vmem:[#allocation7 + $0x3a4] ss:$16 sps:$4 sm:$0xff]  }
 0x167   :  { %2014 = vmatpush1.bf16.msra.mxu0 %v4297_v62  ;;  %v4309_v62 = vld [vmem:[#allocation7 + $0x1a0] ss:$16 sps:$4 sm:$0xff]  }
 0x168   :  { %2055 = vmatpush1.bf16.msra.mxu1 %v4298_v59  ;;  %2015 = vmatprep.subr.bf16.mxu0 %v4299_v53  ;;  %v4310_v59 = vld [vmem:[#allocation7 + $0x3a0] ss:$16 sps:$4 sm:$0xff]   ;;  %v4311_v53 = vld [vmem:[#allocation7 + $0x184] ss:$16 sps:$4 sm:$0xff]  }
 0x169   :  { %2056 = vmatprep.subr.bf16.mxu1 %v4300_v2  ;;  %v4312_v2 = vld [vmem:[#allocation7 + $0x384] ss:$16 sps:$4 sm:$0xff]  }
 0x16b   :  { %2016 = vmatpush2.bf16.msra.mxu0 %v4301_v54  ;;  %v4313_v54 = vld [vmem:[#allocation7 + $0x180] ss:$16 sps:$4 sm:$0xff]  }
 0x16c   :  { %2057 = vmatpush2.bf16.msra.mxu1 %v4302_v60  ;;  %2017 = vmatprep.subr.bf16.mxu0 %v4303_v63  ;;  %v4314_v60 = vld [vmem:[#allocation7 + $0x380] ss:$16 sps:$4 sm:$0xff]   ;;  %v4315_v63 = vld [vmem:[#allocation7 + $0x164] ss:$16 sps:$4 sm:$0xff]  }
 0x16d   :  { %2058 = vmatprep.subr.bf16.mxu1 %v4304_v57  ;;  %v4316_v57 = vld [vmem:[#allocation7 + $0x364] ss:$16 sps:$4 sm:$0xff]  }
 0x16f   :  { %2018 = vmatpush2.bf16.msra.mxu0 %v4305_v20  ;;  %v4317_v20 = vld [vmem:[#allocation7 + $0x160] ss:$16 sps:$4 sm:$0xff]  }
 0x170   :  { %2059 = vmatpush2.bf16.msra.mxu1 %v4306_v21  ;;  %2019 = vmatprep.subr.bf16.mxu0 %v4307_v55  ;;  %v4318_v21 = vld [vmem:[#allocation7 + $0x360] ss:$16 sps:$4 sm:$0xff]   ;;  %v4319_v55 = vld [vmem:[#allocation7 + $0x144] ss:$16 sps:$4 sm:$0xff]  }
 0x171   :  { %2060 = vmatprep.subr.bf16.mxu1 %v4308_v56  ;;  %v4320_v56 = vld [vmem:[#allocation7 + $0x344] ss:$16 sps:$4 sm:$0xff]  }
 0x173   :  { %2020 = vmatpush2.bf16.msra.mxu0 %v4309_v62  ;;  %v4321_v62 = vld [vmem:[#allocation7 + $0x140] ss:$16 sps:$4 sm:$0xff]  }
 0x174   :  { %2061 = vmatpush2.bf16.msra.mxu1 %v4310_v59  ;;  %2021 = vmatprep.subr.bf16.mxu0 %v4311_v53  ;;  %v4322_v59 = vld [vmem:[#allocation7 + $0x340] ss:$16 sps:$4 sm:$0xff]   ;;  %v4323_v53 = vld [vmem:[#allocation7 + $0x124] ss:$16 sps:$4 sm:$0xff]  }
 0x175   :  { %2062 = vmatprep.subr.bf16.mxu1 %v4312_v2  ;;  %v4324_v2 = vld [vmem:[#allocation7 + $0x324] ss:$16 sps:$4 sm:$0xff]  }
 0x177   :  { %2022 = vmatpush2.bf16.msra.mxu0 %v4313_v54  ;;  %v4325_v54 = vld [vmem:[#allocation7 + $0x120] ss:$16 sps:$4 sm:$0xff]  }
 0x178   :  { %2063 = vmatpush2.bf16.msra.mxu1 %v4314_v60  ;;  %2023 = vmatprep.subr.bf16.mxu0 %v4315_v63  ;;  %v4326_v60 = vld [vmem:[#allocation7 + $0x320] ss:$16 sps:$4 sm:$0xff]  }
 0x179   :  { %2064 = vmatprep.subr.bf16.mxu1 %v4316_v57  ;;  %v1983_v63 = vld [vmem:[#allocation5] sm:$0xff]  ;;  %v1985_v57 = vld [vmem:[#allocation5 + $0x10] sm:$0xff] }
 0x17b   :  { %2024 = vmatpush2.bf16.msra.mxu0 %v4317_v20  ;;  %v4327_v20 = vld [vmem:[#allocation7 + $0x104] ss:$16 sps:$4 sm:$0xff]  }
 0x17c   :  { %2065 = vmatpush2.bf16.msra.mxu1 %v4318_v21  ;;  %2025 = vmatprep.subr.bf16.mxu0 %v4319_v55  ;;  %v4328_v21 = vld [vmem:[#allocation7 + $0x304] ss:$16 sps:$4 sm:$0xff]   ;;  %v4944_v55 = vpack.c.bf16 %v1983_v63, %v1983_v63 }
 0x17d   :  { %2066 = vmatprep.subr.bf16.mxu1 %v4320_v56  ;;  %v4946_v56 = vpack.c.bf16 %v1985_v57, %v1985_v57  ;;  %v4333_v57 = vld [vmem:[#allocation7 + $0x4e0] ss:$16 sps:$4 sm:$0xff]  }
 0x17f   :  { %2026 = vmatpush2.bf16.msra.mxu0 %v4321_v62  ;;  %v1988_v62 = vld [vmem:[#allocation5 + $0x28] sm:$0xff] }
 0x180   :  { %2067 = vmatpush2.bf16.msra.mxu1 %v4322_v59  ;;  %2027 = vmatprep.subr.bf16.mxu0 %v4323_v53  ;;  %v1990_v59 = vld [vmem:[#allocation5 + $0x38] sm:$0xff]  ;;  %v4330_v53 = vld [vmem:[#allocation7 + $0x300] ss:$16 sps:$4 sm:$0xff]  }
 0x181   :  { %2068 = vmatprep.subr.bf16.mxu1 %v4324_v2  ;;  %v4331_v2 = vld [vmem:[#allocation7 + $0x4e4] ss:$16 sps:$4 sm:$0xff]   ;;  %v4950_v50 = vpack.c.bf16 %v1990_v59, %v1990_v59 }
 0x183   :  { %2028 = vmatpush2.bf16.msra.mxu0 %v4325_v54  ;;  %v4332_v54 = vld [vmem:[#allocation7 + $0x6e4] ss:$16 sps:$4 sm:$0xff]  }
 0x184   :  { %2069 = vmatpush2.bf16.msra.mxu1 %v4326_v60  ;;  %2029 = vmatprep.subr.bf16.mxu0 %v4327_v20  ;;  %v4948_v60 = vpack.c.bf16 %v1988_v62, %v1988_v62  ;;  %v4336_v62 = vld [vmem:[#allocation7 + $0x6c4] ss:$16 sps:$4 sm:$0xff]  }
 0x185   :  { %2070 = vmatprep.subr.bf16.mxu1 %v4328_v21 }
 0x187   :  { %2030 = vmatpush2.bf16.msra.mxu0 %v4329_v51  ;;  %v4334_v51 = vld [vmem:[#allocation7 + $0x6e0] ss:$16 sps:$4 sm:$0xff]  }
 0x188   :  { %2071 = vmatpush2.bf16.msra.mxu1 %v4330_v53  ;;  %2081 = vmatprep.subr.bf16.mxu0 %v4331_v2 }
 0x189   :  { %2122 = vmatprep.subr.bf16.mxu1 %v4332_v54 }
 0x18a   :  { %v1771_v20 = vpop.f32.mrf.mxu0  ;;  %2032 = vmatmul.mubr.bf16.vlgmr.msra.gmra.mxu0 %v4944_v55 }
 0x18b   :  { %v1812_v21 = vpop.f32.mrf.mxu1  ;;  %2073 = vmatmul.mubr.bf16.vlgmr.msra.gmra.mxu1 %v4946_v56  ;;  %v1772_v63 = vadd.f32 %v1771_v20, %v4938_v58  ;;  %2082 = vmatpush1.bf16.msra.mxu0 %v4333_v57  ;;  %v4337_v57 = vld [vmem:[#allocation7 + $0x4c0] ss:$16 sps:$4 sm:$0xff]  }
 0x18c   :  { %2123 = vmatpush1.bf16.msra.mxu1 %v4334_v51  ;;  %v1773_v53 = vpop.f32.mrf.mxu0  ;;  %2083 = vmatprep.subr.bf16.mxu0 %v4335_v48  ;;  %v4338_v51 = vld [vmem:[#allocation7 + $0x6c0] ss:$16 sps:$4 sm:$0xff]  }
 0x18d   :  { %v1814_v2 = vpop.f32.mrf.mxu1  ;;  %2124 = vmatprep.subr.bf16.mxu1 %v4336_v62  ;;  %v4955_v59 = vadd.f32 %v1812_v21, %v1772_v63  ;;  %v1774_v54 = vadd.f32 %v1773_v53, %v4940_v61  ;;  %2113 = vmatprep.mubr.bf16.mxu0 %v4948_v60  ;;  %v4340_v21 = vld [vmem:[#allocation7 + $0x6a4] ss:$16 sps:$4 sm:$0xff]   ;;  %v4341_v63 = vld [vmem:[#allocation7 + $0x4a0] ss:$16 sps:$4 sm:$0xff]  }
 0x18e   :  { %2154 = vmatprep.mubr.bf16.mxu1 %v4950_v50  ;;  %v1775_v47 = vpop.f32.mrf.mxu0  ;;  %v4342_v61 = vld [vmem:[#allocation7 + $0x6a0] ss:$16 sps:$4 sm:$0xff]   ;;  %v4343_v53 = vld [vmem:[#allocation7 + $0x484] ss:$16 sps:$4 sm:$0xff]  }
 0x18f   :  { %5202 = vst [vmem:[#allocation60_spill] sm:$0xff] %v4955_v59  ;;  %v1816_v58 = vpop.f32.mrf.mxu1  ;;  %v4960_v20 = vadd.f32 %v1814_v2, %v1774_v54  ;;  %2084 = vmatpush1.bf16.msra.mxu0 %v4337_v57  ;;  %v4344_v47 = vld [vmem:[#allocation7 + $0x684] ss:$16 sps:$4 sm:$0xff]   ;;  %v4345_v2 = vld [vmem:[#allocation7 + $0x480] ss:$16 sps:$4 sm:$0xff]  }
 0x190   :  { %2125 = vmatpush1.bf16.msra.mxu1 %v4338_v51  ;;  %v1776_v46 = vpop.f32.mrf.mxu0  ;;  %2085 = vmatprep.subr.bf16.mxu0 %v4339_v45  ;;  %v4346_v62 = vld [vmem:[#allocation7 + $0x680] ss:$16 sps:$4 sm:$0xff]   ;;  %v4347_v54 = vld [vmem:[#allocation7 + $0x464] ss:$16 sps:$4 sm:$0xff]   ;;  %v4404_v59 = vld [vmem:[#allocation7 + $0x2ac] ss:$16 sps:$4 sm:$0xff]  }
 0x191   :  { %5203 = vst [vmem:[#allocation61_spill] sm:$0xff] %v4960_v20  ;;  %v1817_v48 = vpop.f32.mrf.mxu1  ;;  %2126 = vmatprep.subr.bf16.mxu1 %v4340_v21  ;;  %v4348_v46 = vld [vmem:[#allocation7 + $0x664] ss:$16 sps:$4 sm:$0xff]   ;;  %v4349_v58 = vld [vmem:[#allocation7 + $0x460] ss:$16 sps:$4 sm:$0xff]  }
 0x192   :  { %v4350_v45 = vld [vmem:[#allocation7 + $0x660] ss:$16 sps:$4 sm:$0xff]   ;;  %v4351_v57 = vld [vmem:[#allocation7 + $0x444] ss:$16 sps:$4 sm:$0xff]   ;;  %v4403_v20 = vld [vmem:[#allocation7 + $0xac] ss:$16 sps:$4 sm:$0xff]  }
 0x193   :  { %2086 = vmatpush1.bf16.msra.mxu0 %v4341_v63  ;;  %v4352_v51 = vld [vmem:[#allocation7 + $0x644] ss:$16 sps:$4 sm:$0xff]   ;;  %v4353_v48 = vld [vmem:[#allocation7 + $0x440] ss:$16 sps:$4 sm:$0xff]  }
 0x194   :  { %2127 = vmatpush1.bf16.msra.mxu1 %v4342_v61  ;;  %2087 = vmatprep.subr.bf16.mxu0 %v4343_v53  ;;  %v4354_v21 = vld [vmem:[#allocation7 + $0x640] ss:$16 sps:$4 sm:$0xff]   ;;  %v4355_v63 = vld [vmem:[#allocation7 + $0x424] ss:$16 sps:$4 sm:$0xff]  }
 0x195   :  { %2128 = vmatprep.subr.bf16.mxu1 %v4344_v47  ;;  %v4356_v61 = vld [vmem:[#allocation7 + $0x624] ss:$16 sps:$4 sm:$0xff]   ;;  %v4357_v53 = vld [vmem:[#allocation7 + $0x420] ss:$16 sps:$4 sm:$0xff]  }
 0x196   :  { %v4358_v47 = vld [vmem:[#allocation7 + $0x620] ss:$16 sps:$4 sm:$0xff]  }
 0x197   :  { %2088 = vmatpush1.bf16.msra.mxu0 %v4345_v2  ;;  %v4359_v2 = vld [vmem:[#allocation7 + $0x404] ss:$16 sps:$4 sm:$0xff]  }
 0x198   :  { %2129 = vmatpush1.bf16.msra.mxu1 %v4346_v62  ;;  %2089 = vmatprep.subr.bf16.mxu0 %v4347_v54  ;;  %v4360_v62 = vld [vmem:[#allocation7 + $0x604] ss:$16 sps:$4 sm:$0xff]   ;;  %v4361_v54 = vld [vmem:[#allocation7 + $0x400] ss:$16 sps:$4 sm:$0xff]  }
 0x199   :  { %2130 = vmatprep.subr.bf16.mxu1 %v4348_v46  ;;  %v4362_v46 = vld [vmem:[#allocation7 + $0x600] ss:$16 sps:$4 sm:$0xff]  }
 0x19b   :  { %2090 = vmatpush1.bf16.msra.mxu0 %v4349_v58  ;;  %v4363_v58 = vld [vmem:[#allocation7 + $0x5e4] ss:$16 sps:$4 sm:$0xff]  }
 0x19c   :  { %2131 = vmatpush1.bf16.msra.mxu1 %v4350_v45  ;;  %2091 = vmatprep.subr.bf16.mxu0 %v4351_v57  ;;  %v4364_v45 = vld [vmem:[#allocation7 + $0x7e4] ss:$16 sps:$4 sm:$0xff]   ;;  %v4365_v57 = vld [vmem:[#allocation7 + $0x5e0] ss:$16 sps:$4 sm:$0xff]  }
 0x19d   :  { %2132 = vmatprep.subr.bf16.mxu1 %v4352_v51  ;;  %v4366_v51 = vld [vmem:[#allocation7 + $0x7e0] ss:$16 sps:$4 sm:$0xff]  }
 0x19f   :  { %2092 = vmatpush1.bf16.msra.mxu0 %v4353_v48  ;;  %v4367_v48 = vld [vmem:[#allocation7 + $0x5c4] ss:$16 sps:$4 sm:$0xff]  }
 0x1a0   :  { %2133 = vmatpush1.bf16.msra.mxu1 %v4354_v21  ;;  %2093 = vmatprep.subr.bf16.mxu0 %v4355_v63  ;;  %v4368_v21 = vld [vmem:[#allocation7 + $0x7c4] ss:$16 sps:$4 sm:$0xff]   ;;  %v4369_v63 = vld [vmem:[#allocation7 + $0x5c0] ss:$16 sps:$4 sm:$0xff]  }
 0x1a1   :  { %2134 = vmatprep.subr.bf16.mxu1 %v4356_v61  ;;  %v4370_v61 = vld [vmem:[#allocation7 + $0x7c0] ss:$16 sps:$4 sm:$0xff]  }
 0x1a3   :  { %2094 = vmatpush1.bf16.msra.mxu0 %v4357_v53  ;;  %v4371_v53 = vld [vmem:[#allocation7 + $0x5a4] ss:$16 sps:$4 sm:$0xff]  }
 0x1a4   :  { %2135 = vmatpush1.bf16.msra.mxu1 %v4358_v47  ;;  %2095 = vmatprep.subr.bf16.mxu0 %v4359_v2  ;;  %v4372_v47 = vld [vmem:[#allocation7 + $0x7a4] ss:$16 sps:$4 sm:$0xff]   ;;  %v4373_v2 = vld [vmem:[#allocation7 + $0x5a0] ss:$16 sps:$4 sm:$0xff]  }
 0x1a5   :  { %2136 = vmatprep.subr.bf16.mxu1 %v4360_v62  ;;  %v4374_v62 = vld [vmem:[#allocation7 + $0x7a0] ss:$16 sps:$4 sm:$0xff]  }
 0x1a7   :  { %2096 = vmatpush1.bf16.msra.mxu0 %v4361_v54  ;;  %v4375_v54 = vld [vmem:[#allocation7 + $0x584] ss:$16 sps:$4 sm:$0xff]  }
 0x1a8   :  { %2137 = vmatpush1.bf16.msra.mxu1 %v4362_v46  ;;  %2097 = vmatprep.subr.bf16.mxu0 %v4363_v58  ;;  %v4376_v46 = vld [vmem:[#allocation7 + $0x784] ss:$16 sps:$4 sm:$0xff]   ;;  %v4377_v58 = vld [vmem:[#allocation7 + $0x580] ss:$16 sps:$4 sm:$0xff]  }
 0x1a9   :  { %2138 = vmatprep.subr.bf16.mxu1 %v4364_v45  ;;  %v4378_v45 = vld [vmem:[#allocation7 + $0x780] ss:$16 sps:$4 sm:$0xff]  }
 0x1ab   :  { %2098 = vmatpush2.bf16.msra.mxu0 %v4365_v57  ;;  %v4379_v57 = vld [vmem:[#allocation7 + $0x564] ss:$16 sps:$4 sm:$0xff]  }
 0x1ac   :  { %2139 = vmatpush2.bf16.msra.mxu1 %v4366_v51  ;;  %2099 = vmatprep.subr.bf16.mxu0 %v4367_v48  ;;  %v4380_v51 = vld [vmem:[#allocation7 + $0x764] ss:$16 sps:$4 sm:$0xff]   ;;  %v4381_v48 = vld [vmem:[#allocation7 + $0x560] ss:$16 sps:$4 sm:$0xff]  }
 0x1ad   :  { %2140 = vmatprep.subr.bf16.mxu1 %v4368_v21  ;;  %v4382_v21 = vld [vmem:[#allocation7 + $0x760] ss:$16 sps:$4 sm:$0xff]  }
 0x1af   :  { %2100 = vmatpush2.bf16.msra.mxu0 %v4369_v63  ;;  %v4383_v63 = vld [vmem:[#allocation7 + $0x544] ss:$16 sps:$4 sm:$0xff]  }
 0x1b0   :  { %2141 = vmatpush2.bf16.msra.mxu1 %v4370_v61  ;;  %2101 = vmatprep.subr.bf16.mxu0 %v4371_v53  ;;  %v4384_v61 = vld [vmem:[#allocation7 + $0x744] ss:$16 sps:$4 sm:$0xff]   ;;  %v4385_v53 = vld [vmem:[#allocation7 + $0x540] ss:$16 sps:$4 sm:$0xff]  }
 0x1b1   :  { %2142 = vmatprep.subr.bf16.mxu1 %v4372_v47  ;;  %v4386_v47 = vld [vmem:[#allocation7 + $0x740] ss:$16 sps:$4 sm:$0xff]  }
 0x1b3   :  { %2102 = vmatpush2.bf16.msra.mxu0 %v4373_v2  ;;  %v4387_v2 = vld [vmem:[#allocation7 + $0x524] ss:$16 sps:$4 sm:$0xff]  }
 0x1b4   :  { %2143 = vmatpush2.bf16.msra.mxu1 %v4374_v62  ;;  %2103 = vmatprep.subr.bf16.mxu0 %v4375_v54  ;;  %v4388_v62 = vld [vmem:[#allocation7 + $0x724] ss:$16 sps:$4 sm:$0xff]   ;;  %v4389_v54 = vld [vmem:[#allocation7 + $0x520] ss:$16 sps:$4 sm:$0xff]  }
 0x1b5   :  { %2144 = vmatprep.subr.bf16.mxu1 %v4376_v46  ;;  %v4390_v46 = vld [vmem:[#allocation7 + $0x720] ss:$16 sps:$4 sm:$0xff]  }
 0x1b7   :  { %2104 = vmatpush2.bf16.msra.mxu0 %v4377_v58  ;;  %v1987_v58 = vld [vmem:[#allocation5 + $0x20] sm:$0xff] }
 0x1b8   :  { %2145 = vmatpush2.bf16.msra.mxu1 %v4378_v45  ;;  %2105 = vmatprep.subr.bf16.mxu0 %v4379_v57  ;;  %v1989_v45 = vld [vmem:[#allocation5 + $0x30] sm:$0xff] }
 0x1b9   :  { %2146 = vmatprep.subr.bf16.mxu1 %v4380_v51  ;;  %v4391_v57 = vld [vmem:[#allocation7 + $0x504] ss:$16 sps:$4 sm:$0xff]  }
 0x1ba   :  { %v4392_v51 = vld [vmem:[#allocation7 + $0x704] ss:$16 sps:$4 sm:$0xff]  }
 0x1bb   :  { %2106 = vmatpush2.bf16.msra.mxu0 %v4381_v48  ;;  %v4962_v48 = vpack.c.bf16 %v1987_v58, %v1987_v58  ;;  %v4398_v58 = vld [vmem:[#allocation7 + $0x2e8] ss:$16 sps:$4 sm:$0xff]  }
 0x1bc   :  { %2147 = vmatpush2.bf16.msra.mxu1 %v4382_v21  ;;  %2107 = vmatprep.subr.bf16.mxu0 %v4383_v63  ;;  %v4964_v21 = vpack.c.bf16 %v1989_v45, %v1989_v45  ;;  %v4393_v63 = vld [vmem:[#allocation7 + $0x500] ss:$16 sps:$4 sm:$0xff]  }
 0x1bd   :  { %2148 = vmatprep.subr.bf16.mxu1 %v4384_v61  ;;  %v4394_v61 = vld [vmem:[#allocation7 + $0x700] ss:$16 sps:$4 sm:$0xff]  }
 0x1bf   :  { %2108 = vmatpush2.bf16.msra.mxu0 %v4385_v53  ;;  %v4395_v53 = vld [vmem:[#allocation7 + $0xec] ss:$16 sps:$4 sm:$0xff]  }
 0x1c0   :  { %2149 = vmatpush2.bf16.msra.mxu1 %v4386_v47  ;;  %2109 = vmatprep.subr.bf16.mxu0 %v4387_v2  ;;  %v4396_v47 = vld [vmem:[#allocation7 + $0x2ec] ss:$16 sps:$4 sm:$0xff]  }
 0x1c1   :  { %2150 = vmatprep.subr.bf16.mxu1 %v4388_v62 }
 0x1c3   :  { %2110 = vmatpush2.bf16.msra.mxu0 %v4389_v54 }
 0x1c4   :  { %2151 = vmatpush2.bf16.msra.mxu1 %v4390_v46  ;;  %2111 = vmatprep.subr.bf16.mxu0 %v4391_v57  ;;  %v4397_v46 = vld [vmem:[#allocation7 + $0xe8] ss:$16 sps:$4 sm:$0xff]  }
 0x1c5   :  { %2152 = vmatprep.subr.bf16.mxu1 %v4392_v51  ;;  %v4399_v51 = vld [vmem:[#allocation7 + $0xcc] ss:$16 sps:$4 sm:$0xff]  }
 0x1c7   :  { %2112 = vmatpush2.bf16.msra.mxu0 %v4393_v63  ;;  %v4400_v63 = vld [vmem:[#allocation7 + $0x2cc] ss:$16 sps:$4 sm:$0xff]  }
 0x1c8   :  { %2153 = vmatpush2.bf16.msra.mxu1 %v4394_v61  ;;  %2163 = vmatprep.subr.bf16.mxu0 %v4395_v53 }
 0x1c9   :  { %2204 = vmatprep.subr.bf16.mxu1 %v4396_v47 }
 0x1ca   :  { %v1853_v2 = vpop.f32.mrf.mxu0  ;;  %2114 = vmatmul.mubr.bf16.vlgmr.msra.gmra.mxu0 %v4962_v48 }
 0x1cb   :  { %v1894_v62 = vpop.f32.mrf.mxu1  ;;  %2155 = vmatmul.mubr.bf16.vlgmr.msra.gmra.mxu1 %v4964_v21  ;;  %2164 = vmatpush1.bf16.msra.mxu0 %v4397_v46 }
 0x1cc   :  { %v4968_v54 = vadd.f32 %v1894_v62, %v1853_v2  ;;  %2205 = vmatpush1.bf16.msra.mxu1 %v4398_v58  ;;  %v1855_v45 = vpop.f32.mrf.mxu0  ;;  %2165 = vmatprep.subr.bf16.mxu0 %v4399_v51  ;;  %v4401_v2 = vld [vmem:[#allocation7 + $0xc8] ss:$16 sps:$4 sm:$0xff]  }
 0x1cd   :  { %v1896_v57 = vpop.f32.mrf.mxu1  ;;  %2206 = vmatprep.subr.bf16.mxu1 %v4400_v63  ;;  %2195 = vmatprep.mubr.bf16.mxu0 %v4932_v0  ;;  %v4402_v62 = vld [vmem:[#allocation7 + $0x2c8] ss:$16 sps:$4 sm:$0xff]   ;;  %v4408_v0 = vld [vmem:[#allocation7 + $0x28c] ss:$16 sps:$4 sm:$0xff]  }
 0x1ce   :  { %v4970_v61 = vadd.f32 %v1896_v57, %v1855_v45  ;;  %2236 = vmatprep.mubr.bf16.mxu1 %v4934_v1  ;;  %v1857_v53 = vpop.f32.mrf.mxu0  ;;  %v4405_v51 = vld [vmem:[#allocation7 + $0xa8] ss:$16 sps:$4 sm:$0xff]   ;;  %v4407_v57 = vld [vmem:[#allocation7 + $0x8c] ss:$16 sps:$4 sm:$0xff]  }
 0x1cf   :  { %v1898_v47 = vpop.f32.mrf.mxu1  ;;  %2166 = vmatpush1.bf16.msra.mxu0 %v4401_v2  ;;  %v4406_v45 = vld [vmem:[#allocation7 + $0x2a8] ss:$16 sps:$4 sm:$0xff]   ;;  %v4411_v53 = vld [vmem:[#allocation7 + $0x6c] ss:$16 sps:$4 sm:$0xff]  }
 0x1d0   :  { %2207 = vmatpush1.bf16.msra.mxu1 %v4402_v62  ;;  %v1858_v46 = vpop.f32.mrf.mxu0  ;;  %2167 = vmatprep.subr.bf16.mxu0 %v4403_v20  ;;  %v4409_v1 = vld [vmem:[#allocation7 + $0x88] ss:$16 sps:$4 sm:$0xff]   ;;  %v4412_v47 = vld [vmem:[#allocation7 + $0x26c] ss:$16 sps:$4 sm:$0xff]  }
 0x1d1   :  { %v1899_v58 = vpop.f32.mrf.mxu1  ;;  %2208 = vmatprep.subr.bf16.mxu1 %v4404_v59  ;;  %v4410_v63 = vld [vmem:[#allocation7 + $0x288] ss:$16 sps:$4 sm:$0xff]   ;;  %v4415_v59 = vld [vmem:[#allocation7 + $0x4c] ss:$16 sps:$4 sm:$0xff]  }
 0x1d2   :  { %v4413_v2 = vld [vmem:[#allocation7 + $0x68] ss:$16 sps:$4 sm:$0xff]   ;;  %v4416_v62 = vld [vmem:[#allocation7 + $0x24c] ss:$16 sps:$4 sm:$0xff]  }
 0x1d3   :  { %2168 = vmatpush1.bf16.msra.mxu0 %v4405_v51  ;;  %v4414_v20 = vld [vmem:[#allocation7 + $0x268] ss:$16 sps:$4 sm:$0xff]   ;;  %v4419_v51 = vld [vmem:[#allocation7 + $0x2c] ss:$16 sps:$4 sm:$0xff]  }
 0x1d4   :  { %2209 = vmatpush1.bf16.msra.mxu1 %v4406_v45  ;;  %2169 = vmatprep.subr.bf16.mxu0 %v4407_v57  ;;  %v4417_v46 = vld [vmem:[#allocation7 + $0x48] ss:$16 sps:$4 sm:$0xff]   ;;  %v4420_v45 = vld [vmem:[#allocation7 + $0x22c] ss:$16 sps:$4 sm:$0xff]  }
 0x1d5   :  { %2210 = vmatprep.subr.bf16.mxu1 %v4408_v0  ;;  %v4418_v58 = vld [vmem:[#allocation7 + $0x248] ss:$16 sps:$4 sm:$0xff]  }
 0x1d6   :  { %v4421_v57 = vld [vmem:[#allocation7 + $0x28] ss:$16 sps:$4 sm:$0xff]  }
 0x1d7   :  { %2170 = vmatpush1.bf16.msra.mxu0 %v4409_v1  ;;  %v4422_v0 = vld [vmem:[#allocation7 + $0x228] ss:$16 sps:$4 sm:$0xff]   ;;  %v4423_v1 = vld [vmem:[#allocation7 + $0xc] ss:$16 sps:$4 sm:$0xff]  }
 0x1d8   :  { %2211 = vmatpush1.bf16.msra.mxu1 %v4410_v63  ;;  %2171 = vmatprep.subr.bf16.mxu0 %v4411_v53  ;;  %v4424_v63 = vld [vmem:[#allocation7 + $0x20c] ss:$16 sps:$4 sm:$0xff]   ;;  %v4425_v53 = vld [vmem:[#allocation7 + $0x8] ss:$16 sps:$4 sm:$0xff]  }
 0x1d9   :  { %2212 = vmatprep.subr.bf16.mxu1 %v4412_v47  ;;  %v4426_v47 = vld [vmem:[#allocation7 + $0x208] ss:$16 sps:$4 sm:$0xff]  }
 0x1db   :  { %2172 = vmatpush1.bf16.msra.mxu0 %v4413_v2  ;;  %v4427_v2 = vld [vmem:[#allocation7 + $0x1ec] ss:$16 sps:$4 sm:$0xff]  }
 0x1dc   :  { %2213 = vmatpush1.bf16.msra.mxu1 %v4414_v20  ;;  %2173 = vmatprep.subr.bf16.mxu0 %v4415_v59  ;;  %v4428_v20 = vld [vmem:[#allocation7 + $0x3ec] ss:$16 sps:$4 sm:$0xff]   ;;  %v4429_v59 = vld [vmem:[#allocation7 + $0x1e8] ss:$16 sps:$4 sm:$0xff]  }
 0x1dd   :  { %2214 = vmatprep.subr.bf16.mxu1 %v4416_v62  ;;  %v4430_v62 = vld [vmem:[#allocation7 + $0x3e8] ss:$16 sps:$4 sm:$0xff]  }
 0x1df   :  { %2174 = vmatpush1.bf16.msra.mxu0 %v4417_v46  ;;  %v4431_v46 = vld [vmem:[#allocation7 + $0x1cc] ss:$16 sps:$4 sm:$0xff]  }
 0x1e0   :  { %2215 = vmatpush1.bf16.msra.mxu1 %v4418_v58  ;;  %2175 = vmatprep.subr.bf16.mxu0 %v4419_v51  ;;  %v4432_v58 = vld [vmem:[#allocation7 + $0x3cc] ss:$16 sps:$4 sm:$0xff]   ;;  %v4433_v51 = vld [vmem:[#allocation7 + $0x1c8] ss:$16 sps:$4 sm:$0xff]  }
 0x1e1   :  { %2216 = vmatprep.subr.bf16.mxu1 %v4420_v45  ;;  %v4434_v45 = vld [vmem:[#allocation7 + $0x3c8] ss:$16 sps:$4 sm:$0xff]  }
 0x1e3   :  { %2176 = vmatpush1.bf16.msra.mxu0 %v4421_v57  ;;  %v4435_v57 = vld [vmem:[#allocation7 + $0x1ac] ss:$16 sps:$4 sm:$0xff]  }
 0x1e4   :  { %2217 = vmatpush1.bf16.msra.mxu1 %v4422_v0  ;;  %2177 = vmatprep.subr.bf16.mxu0 %v4423_v1  ;;  %v4436_v0 = vld [vmem:[#allocation7 + $0x3ac] ss:$16 sps:$4 sm:$0xff]   ;;  %v4437_v1 = vld [vmem:[#allocation7 + $0x1a8] ss:$16 sps:$4 sm:$0xff]  }
 0x1e5   :  { %2218 = vmatprep.subr.bf16.mxu1 %v4424_v63  ;;  %v4438_v63 = vld [vmem:[#allocation7 + $0x3a8] ss:$16 sps:$4 sm:$0xff]  }
 0x1e7   :  { %2178 = vmatpush1.bf16.msra.mxu0 %v4425_v53  ;;  %v4439_v53 = vld [vmem:[#allocation7 + $0x18c] ss:$16 sps:$4 sm:$0xff]  }
 0x1e8   :  { %2219 = vmatpush1.bf16.msra.mxu1 %v4426_v47  ;;  %2179 = vmatprep.subr.bf16.mxu0 %v4427_v2  ;;  %v5240_v47 = vld [vmem:[#allocation55_spill] sm:$0xff]  ;;  %v5241_v2 = vld [vmem:[#allocation56_spill] sm:$0xff] }
 0x1e9   :  { %2220 = vmatprep.subr.bf16.mxu1 %v4428_v20  ;;  %v5242_v20 = vld [vmem:[#allocation57_spill] sm:$0xff] }
 0x1eb   :  { %2180 = vmatpush2.bf16.msra.mxu0 %v4429_v59  ;;  %v4207_v59 = vld [vmem:[#allocation8 + $0x78] sm:$0xff]  }
 0x1ec   :  { %2221 = vmatpush2.bf16.msra.mxu1 %v4430_v62  ;;  %2181 = vmatprep.subr.bf16.mxu0 %v4431_v46  ;;  %v5243_v62 = vld [vmem:[#allocation58_spill] sm:$0xff]  ;;  %v5244_v46 = vld [vmem:[#allocation59_spill] sm:$0xff] }
 0x1ed   :  { %2222 = vmatprep.subr.bf16.mxu1 %v4432_v58  ;;  %v4208_v58 = vld [vmem:[#allocation8 + $0x38] sm:$0xff]  }
 0x1ef   :  { %2182 = vmatpush2.bf16.msra.mxu0 %v4433_v51  ;;  %v4209_v51 = vld [vmem:[#allocation8 + $0x70] sm:$0xff]  }
 0x1f0   :  { %2223 = vmatpush2.bf16.msra.mxu1 %v4434_v45  ;;  %2183 = vmatprep.subr.bf16.mxu0 %v4435_v57 }
 0x1f1   :  { %2224 = vmatprep.subr.bf16.mxu1 %v4436_v0 }
 0x1f3   :  { %2184 = vmatpush2.bf16.msra.mxu0 %v4437_v1  ;;  %v4210_v1 = vld [vmem:[#allocation8 + $0x30] sm:$0xff]  }
 0x1f4   :  { %2225 = vmatpush2.bf16.msra.mxu1 %v4438_v63  ;;  %2185 = vmatprep.subr.bf16.mxu0 %v4439_v53 }
 0x1f5   :  { %2226 = vmatprep.subr.bf16.mxu1 %v4679_v3 }
 0x1f7   :  { %2186 = vmatpush2.bf16.msra.mxu0 %v4681_v4 }
 0x1f8   :  { %2227 = vmatpush2.bf16.msra.mxu1 %v4683_v5  ;;  %2187 = vmatprep.subr.bf16.mxu0 %v4685_v6 }
 0x1f9   :  { %2228 = vmatprep.subr.bf16.mxu1 %v4688_v7 }
 0x1fb   :  { %2188 = vmatpush2.bf16.msra.mxu0 %v4690_v10 }
 0x1fc   :  { %2229 = vmatpush2.bf16.msra.mxu1 %v4692_v11  ;;  %2189 = vmatprep.subr.bf16.mxu0 %v4694_v12 }
 0x1fd   :  { %2230 = vmatprep.subr.bf16.mxu1 %v4696_v13 }
 0x1ff   :  { %2190 = vmatpush2.bf16.msra.mxu0 %v4702_v14 }
 0x200   :  { %2231 = vmatpush2.bf16.msra.mxu1 %v4704_v15  ;;  %2191 = vmatprep.subr.bf16.mxu0 %v4706_v16 }
 0x201   :  { %2232 = vmatprep.subr.bf16.mxu1 %v4708_v17  ;;  %v5204_v17 = vld [vmem:[#allocation19_spill] sm:$0xff] }
 0x203   :  { %2192 = vmatpush2.bf16.msra.mxu0 %v4714_v18  ;;  %v5205_v18 = vld [vmem:[#allocation20_spill] sm:$0xff] }
 0x204   :  { %2233 = vmatpush2.bf16.msra.mxu1 %v4716_v19  ;;  %2193 = vmatprep.subr.bf16.mxu0 %v4718_v22  ;;  %v5206_v19 = vld [vmem:[#allocation21_spill] sm:$0xff]  ;;  %v5207_v22 = vld [vmem:[#allocation22_spill] sm:$0xff] }
 0x205   :  { %2234 = vmatprep.subr.bf16.mxu1 %v4720_v23  ;;  %v5208_v23 = vld [vmem:[#allocation23_spill] sm:$0xff] }
 0x207   :  { %2194 = vmatpush2.bf16.msra.mxu0 %v4726_v24  ;;  %v5209_v24 = vld [vmem:[#allocation24_spill] sm:$0xff] }
 0x208   :  { %2235 = vmatpush2.bf16.msra.mxu1 %v4728_v25  ;;  %2245 = vmatprep.subr.bf16.mxu0 %v4730_v26  ;;  %v5210_v25 = vld [vmem:[#allocation25_spill] sm:$0xff]  ;;  %v5211_v26 = vld [vmem:[#allocation26_spill] sm:$0xff] }
 0x209   :  { %2286 = vmatprep.subr.bf16.mxu1 %v4732_v27  ;;  %v5212_v27 = vld [vmem:[#allocation27_spill] sm:$0xff] }
 0x20a   :  { %v1935_v3 = vpop.f32.mrf.mxu0  ;;  %2196 = vmatmul.mubr.bf16.vlgmr.msra.gmra.mxu0 %v4944_v55  ;;  %v5235_v55 = vld [vmem:[#allocation50_spill] sm:$0xff] }
 0x20b   :  { %v1976_v4 = vpop.f32.mrf.mxu1  ;;  %2237 = vmatmul.mubr.bf16.vlgmr.msra.gmra.mxu1 %v4946_v56  ;;  %v1936_v5 = vadd.f32 %v1935_v3, %v4968_v54  ;;  %2246 = vmatpush1.bf16.msra.mxu0 %v4738_v28  ;;  %v5213_v28 = vld [vmem:[#allocation28_spill] sm:$0xff]  ;;  %v5236_v56 = vld [vmem:[#allocation51_spill] sm:$0xff]  ;;  %v5238_v54 = vld [vmem:[#allocation53_spill] sm:$0xff] }
 0x20c   :  { %2287 = vmatpush1.bf16.msra.mxu1 %v4740_v29  ;;  %v1937_v6 = vpop.f32.mrf.mxu0  ;;  %2247 = vmatprep.subr.bf16.mxu0 %v4744_v30  ;;  %v5214_v29 = vld [vmem:[#allocation29_spill] sm:$0xff]  ;;  %v5215_v30 = vld [vmem:[#allocation30_spill] sm:$0xff]  ;;  %v4211_v3 = vld [vmem:[#allocation8 + $0x68] sm:$0xff]  }
 0x20d   :  { %v1978_v7 = vpop.f32.mrf.mxu1  ;;  %2288 = vmatprep.subr.bf16.mxu1 %v4746_v31  ;;  %v5002_v10 = vadd.f32 %v1976_v4, %v1936_v5  ;;  %v1938_v11 = vadd.f32 %v1937_v6, %v4970_v61  ;;  %2277 = vmatprep.mubr.bf16.mxu0 %v4948_v60  ;;  %v5216_v31 = vld [vmem:[#allocation31_spill] sm:$0xff]  ;;  %v5237_v60 = vld [vmem:[#allocation52_spill] sm:$0xff]  ;;  %v5239_v61 = vld [vmem:[#allocation54_spill] sm:$0xff] }
 0x20e   :  { %2318 = vmatprep.mubr.bf16.mxu1 %v4950_v50  ;;  %v1939_v12 = vpop.f32.mrf.mxu0  ;;  %v5234_v50 = vld [vmem:[#allocation49_spill] sm:$0xff]  ;;  %v4212_v6 = vld [vmem:[#allocation8 + $0x28] sm:$0xff]  }
 0x20f   :  { %v1980_v13 = vpop.f32.mrf.mxu1  ;;  %v5007_v14 = vadd.f32 %v1978_v7, %v1938_v11  ;;  %2248 = vmatpush1.bf16.msra.mxu0 %v4750_v32  ;;  %v5217_v32 = vld [vmem:[#allocation32_spill] sm:$0xff]  ;;  %v4213_v7 = vld [vmem:[#allocation8 + $0x60] sm:$0xff]  }
 0x210   :  { %2289 = vmatpush1.bf16.msra.mxu1 %v4752_v33  ;;  %v1940_v15 = vpop.f32.mrf.mxu0  ;;  %2249 = vmatprep.subr.bf16.mxu0 %v4756_v34  ;;  %v5218_v33 = vld [vmem:[#allocation33_spill] sm:$0xff]  ;;  %v5219_v34 = vld [vmem:[#allocation34_spill] sm:$0xff] }
 0x211   :  { %v1981_v16 = vpop.f32.mrf.mxu1  ;;  %2290 = vmatprep.subr.bf16.mxu1 %v4758_v35  ;;  %v5220_v35 = vld [vmem:[#allocation35_spill] sm:$0xff]  ;;  %v4223_v13 = vld [vmem:[#allocation8 + $0xf8] sm:$0xff]   ;;  %v4225_v15 = vld [vmem:[#allocation8 + $0xf0] sm:$0xff]  }
 0x212   :  { %v4226_v16 = vld [vmem:[#allocation8 + $0xb0] sm:$0xff]  }
 0x213   :  { %2250 = vmatpush1.bf16.msra.mxu0 %v4764_v36  ;;  %v5221_v36 = vld [vmem:[#allocation36_spill] sm:$0xff] }
 0x214   :  { %2291 = vmatpush1.bf16.msra.mxu1 %v4766_v38  ;;  %2251 = vmatprep.subr.bf16.mxu0 %v4770_v8  ;;  %v5222_v38 = vld [vmem:[#allocation37_spill] sm:$0xff]  ;;  %v5223_v8 = vld [vmem:[#allocation38_spill] sm:$0xff] }
 0x215   :  { %2292 = vmatprep.subr.bf16.mxu1 %v4772_v9  ;;  %v5224_v9 = vld [vmem:[#allocation39_spill] sm:$0xff] }
 0x217   :  { %2252 = vmatpush1.bf16.msra.mxu0 %v4778_v39  ;;  %v5225_v39 = vld [vmem:[#allocation40_spill] sm:$0xff] }
 0x218   :  { %2293 = vmatpush1.bf16.msra.mxu1 %v4780_v49  ;;  %2253 = vmatprep.subr.bf16.mxu0 %v4782_v52  ;;  %v5226_v49 = vld [vmem:[#allocation41_spill] sm:$0xff]  ;;  %v5227_v52 = vld [vmem:[#allocation42_spill] sm:$0xff] }
 0x219   :  { %2294 = vmatprep.subr.bf16.mxu1 %v4784_v37  ;;  %v5228_v37 = vld [vmem:[#allocation43_spill] sm:$0xff] }
 0x21b   :  { %2254 = vmatpush1.bf16.msra.mxu0 %v4792_v40  ;;  %v5229_v40 = vld [vmem:[#allocation44_spill] sm:$0xff] }
 0x21c   :  { %2295 = vmatpush1.bf16.msra.mxu1 %v4794_v41  ;;  %2255 = vmatprep.subr.bf16.mxu0 %v4798_v42  ;;  %v5230_v41 = vld [vmem:[#allocation45_spill] sm:$0xff]  ;;  %v5231_v42 = vld [vmem:[#allocation46_spill] sm:$0xff] }
 0x21d   :  { %2296 = vmatprep.subr.bf16.mxu1 %v4800_v43  ;;  %v5232_v43 = vld [vmem:[#allocation47_spill] sm:$0xff] }
 0x21f   :  { %2256 = vmatpush1.bf16.msra.mxu0 %v4804_v44  ;;  %v5233_v44 = vld [vmem:[#allocation48_spill] sm:$0xff] }
 0x220   :  { %2297 = vmatpush1.bf16.msra.mxu1 %v5204_v17  ;;  %2257 = vmatprep.subr.bf16.mxu0 %v5205_v18  ;;  %v4215_v17 = vld [vmem:[#allocation8 + $0x58] sm:$0xff]   ;;  %v4227_v18 = vld [vmem:[#allocation8 + $0xe8] sm:$0xff]  }
 0x221   :  { %2298 = vmatprep.subr.bf16.mxu1 %v5206_v19  ;;  %v4216_v19 = vld [vmem:[#allocation8 + $0x18] sm:$0xff]  }
 0x223   :  { %2258 = vmatpush1.bf16.msra.mxu0 %v5207_v22  ;;  %v4228_v22 = vld [vmem:[#allocation8 + $0xa8] sm:$0xff]  }
 0x224   :  { %2299 = vmatpush1.bf16.msra.mxu1 %v5208_v23  ;;  %2259 = vmatprep.subr.bf16.mxu0 %v5209_v24  ;;  %v4217_v23 = vld [vmem:[#allocation8 + $0x50] sm:$0xff]   ;;  %v4229_v24 = vld [vmem:[#allocation8 + $0xe0] sm:$0xff]  }
 0x225   :  { %2300 = vmatprep.subr.bf16.mxu1 %v5210_v25  ;;  %v4218_v25 = vld [vmem:[#allocation8 + $0x10] sm:$0xff]  }
 0x227   :  { %2260 = vmatpush1.bf16.msra.mxu0 %v5211_v26  ;;  %v4230_v26 = vld [vmem:[#allocation8 + $0xa0] sm:$0xff]  }
 0x228   :  { %2301 = vmatpush1.bf16.msra.mxu1 %v5212_v27  ;;  %2261 = vmatprep.subr.bf16.mxu0 %v5213_v28  ;;  %v4219_v27 = vld [vmem:[#allocation8 + $0x48] sm:$0xff]   ;;  %v4231_v28 = vld [vmem:[#allocation8 + $0xd8] sm:$0xff]  }
 0x229   :  { %2302 = vmatprep.subr.bf16.mxu1 %v5214_v29  ;;  %v4220_v29 = vld [vmem:[#allocation8 + $0x8] sm:$0xff]  }
 0x22b   :  { %2262 = vmatpush2.bf16.msra.mxu0 %v5215_v30  ;;  %v4232_v30 = vld [vmem:[#allocation8 + $0x98] sm:$0xff]  }
 0x22c   :  { %2303 = vmatpush2.bf16.msra.mxu1 %v5216_v31  ;;  %2263 = vmatprep.subr.bf16.mxu0 %v5217_v32  ;;  %v4221_v31 = vld [vmem:[#allocation8 + $0x40] sm:$0xff]   ;;  %v4233_v32 = vld [vmem:[#allocation8 + $0xd0] sm:$0xff]  }
 0x22d   :  { %2304 = vmatprep.subr.bf16.mxu1 %v5218_v33  ;;  %v4222_v33 = vld [vmem:[#allocation8] sm:$0xff]  }
 0x22f   :  { %2264 = vmatpush2.bf16.msra.mxu0 %v5219_v34  ;;  %v4234_v34 = vld [vmem:[#allocation8 + $0x90] sm:$0xff]  }
 0x230   :  { %2305 = vmatpush2.bf16.msra.mxu1 %v5220_v35  ;;  %2265 = vmatprep.subr.bf16.mxu0 %v5221_v36 }
 0x231   :  { %2306 = vmatprep.subr.bf16.mxu1 %v5222_v38  ;;  %v4235_v38 = vld [vmem:[#allocation8 + $0xc8] sm:$0xff]  }
 0x233   :  { %2266 = vmatpush2.bf16.msra.mxu0 %v5223_v8 }
 0x234   :  { %2307 = vmatpush2.bf16.msra.mxu1 %v5224_v9  ;;  %2267 = vmatprep.subr.bf16.mxu0 %v5225_v39  ;;  %v4236_v39 = vld [vmem:[#allocation8 + $0x88] sm:$0xff]  }
 0x235   :  { %2308 = vmatprep.subr.bf16.mxu1 %v5226_v49 }
 0x237   :  { %2268 = vmatpush2.bf16.msra.mxu0 %v5227_v52 }
 0x238   :  { %2309 = vmatpush2.bf16.msra.mxu1 %v5228_v37  ;;  %2269 = vmatprep.subr.bf16.mxu0 %v5229_v40 }
 0x239   :  { %2310 = vmatprep.subr.bf16.mxu1 %v5230_v41 }
 0x23b   :  { %2270 = vmatpush2.bf16.msra.mxu0 %v5231_v42 }
 0x23c   :  { %2311 = vmatpush2.bf16.msra.mxu1 %v5232_v43  ;;  %2271 = vmatprep.subr.bf16.mxu0 %v5233_v44  ;;  %v4237_v43 = vld [vmem:[#allocation8 + $0xc0] sm:$0xff]   ;;  %v5245_v44 = vld [vmem:[#allocation60_spill] sm:$0xff] }
 0x23d   :  { %2312 = vmatprep.subr.bf16.mxu1 %v5234_v50 }
 0x23f   :  { %2272 = vmatpush2.bf16.msra.mxu0 %v5235_v55 }
 0x240   :  { %2313 = vmatpush2.bf16.msra.mxu1 %v5236_v56  ;;  %2273 = vmatprep.subr.bf16.mxu0 %v5237_v60  ;;  %v4238_v56 = vld [vmem:[#allocation8 + $0x80] sm:$0xff]  }
 0x241   :  { %2314 = vmatprep.subr.bf16.mxu1 %v5238_v54 }
 0x243   :  { %2274 = vmatpush2.bf16.msra.mxu0 %v5239_v61  ;;  %v5246_v61 = vld [vmem:[#allocation61_spill] sm:$0xff] }
 0x244   :  { %2315 = vmatpush2.bf16.msra.mxu1 %v5240_v47  ;;  %2275 = vmatprep.subr.bf16.mxu0 %v5241_v2 }
 0x245   :  { %2316 = vmatprep.subr.bf16.mxu1 %v5242_v20 }
 0x247   :  { %2276 = vmatpush2.bf16.msra.mxu0 %v5243_v62 }
 0x248   :  { %2317 = vmatpush2.bf16.msra.mxu1 %v5244_v46  ;;  %3657 = vmatprep.subr.bf16.mxu0 %v4207_v59 }
 0x249   :  { %3679 = vmatprep.subr.bf16.mxu1 %v4223_v13 }
 0x24a   :  { %v2033_v45 = vpop.f32.mrf.mxu0  ;;  %2278 = vmatmul.mubr.bf16.vlgmr.msra.gmra.mxu0 %v4962_v48  ;;  %v4224_v48 = vld [vmem:[#allocation8 + $0xb8] sm:$0xff]  }
 0x24b   :  { %v2074_v57 = vpop.f32.mrf.mxu1  ;;  %2319 = vmatmul.mubr.bf16.vlgmr.msra.gmra.mxu1 %v4964_v21  ;;  %3658 = vmatpush3.bf16.msra.mxu0 %v4208_v58  ;;  %v4214_v21 = vld [vmem:[#allocation8 + $0x20] sm:$0xff]  }
 0x24c   :  { %v5069_v0 = vadd.f32 %v2074_v57, %v2033_v45  ;;  %v2035_v63 = vpop.f32.mrf.mxu0  ;;  %3659 = vmatprep.subr.bf16.mxu0 %v4209_v51  ;;  %3680 = vmatpush3.bf16.msra.mxu1 %v4224_v48 }
 0x24d   :  { %v2076_v53 = vpop.f32.mrf.mxu1  ;;  %3681 = vmatprep.subr.bf16.mxu1 %v4225_v15 }
 0x24e   :  { %v2037_v4 = vpop.f32.mrf.mxu0  ;;  %v2077_v8 = vadd.f32 %v2076_v53, %v2035_v63 }
 0x24f   :  { %v2078_v5 = vpop.f32.mrf.mxu1  ;;  %3660 = vmatpush3.bf16.msra.mxu0 %v4210_v1 }
 0x250   :  { %v2038_v11 = vpop.f32.mrf.mxu0  ;;  %3661 = vmatprep.subr.bf16.mxu0 %v4211_v3  ;;  %3682 = vmatpush3.bf16.msra.mxu1 %v4226_v16  ;;  %v4239_v16 = vld [vmem:[#allocation10 + $0x38] sm:$0xff]  }
 0x251   :  { %v2079_v12 = vpop.f32.mrf.mxu1  ;;  %3683 = vmatprep.subr.bf16.mxu1 %v4227_v18  ;;  %v4240_v18 = vld [vmem:[#allocation10 + $0x30] sm:$0xff]  }
 0x253   :  { %3662 = vmatpush3.bf16.msra.mxu0 %v4212_v6 }
 0x254   :  { %3663 = vmatprep.subr.bf16.mxu0 %v4213_v7  ;;  %3684 = vmatpush3.bf16.msra.mxu1 %v4228_v22  ;;  %v4244_v22 = vld [vmem:[#allocation10 + $0x10] sm:$0xff]  }
 0x255   :  { %3685 = vmatprep.subr.bf16.mxu1 %v4229_v24  ;;  %v4246_v24 = vld [vmem:[#allocation10] sm:$0xff]  }
 0x257   :  { %3664 = vmatpush3.bf16.msra.mxu0 %v4214_v21 }
 0x258   :  { %3665 = vmatprep.subr.bf16.mxu0 %v4215_v17  ;;  %3686 = vmatpush3.bf16.msra.mxu1 %v4230_v26  ;;  %v4588_v17 = vmov 0.0  }
 0x259   :  { %3687 = vmatprep.subr.bf16.mxu1 %v4231_v28 }
 0x25b   :  { %3666 = vmatpush3.bf16.msra.mxu0 %v4216_v19  ;;  %v4243_v19 = vld [vmem:[#allocation10 + $0x18] sm:$0xff]  }
 0x25c   :  { %3667 = vmatprep.subr.bf16.mxu0 %v4217_v23  ;;  %3688 = vmatpush3.bf16.msra.mxu1 %v4232_v30  ;;  %v4245_v23 = vld [vmem:[#allocation10 + $0x8] sm:$0xff]  }
 0x25d   :  { %3689 = vmatprep.subr.bf16.mxu1 %v4233_v32 }
 0x25f   :  { %3668 = vmatpush3.bf16.msra.mxu0 %v4218_v25 }
 0x260   :  { %3669 = vmatprep.subr.bf16.mxu0 %v4219_v27  ;;  %3690 = vmatpush3.bf16.msra.mxu1 %v4234_v34 }
 0x261   :  { %3691 = vmatprep.subr.bf16.mxu1 %v4235_v38 }
 0x263   :  { %3670 = vmatpush3.bf16.msra.mxu0 %v4220_v29 }
 0x264   :  { %3671 = vmatprep.subr.bf16.mxu0 %v4221_v31  ;;  %3692 = vmatpush3.bf16.msra.mxu1 %v4236_v39 }
 0x265   :  { %3693 = vmatprep.subr.bf16.mxu1 %v4237_v43 }
 0x267   :  { %3672 = vmatpush3.bf16.msra.mxu0 %v4222_v33 }
 0x268   :  { %3694 = vmatpush3.bf16.msra.mxu1 %v4238_v56  ;;  %3736 = vmatprep.subr.bf16.mxu0 %v4588_v17 }
 0x269   :  { %3756 = vmatprep.subr.bf16.mxu1 %v4588_v17 }
 0x28a   :  { %v2115_v35 = vpop.f32.mrf.mxu0 }
 0x28b   :  { %v2156_v36 = vpop.f32.mrf.mxu1  ;;  %v2116_v9 = vadd.f32 %v2115_v35, %v5069_v0 }
 0x28c   :  { %v2117_v49 = vpop.f32.mrf.mxu0 }
 0x28d   :  { %v2158_v52 = vpop.f32.mrf.mxu1  ;;  %v2157_v37 = vadd.f32 %v2156_v36, %v2116_v9  ;;  %v2118_v40 = vadd.f32 %v2117_v49, %v2077_v8 }
 0x28e   :  { %v2119_v41 = vpop.f32.mrf.mxu0 }
 0x28f   :  { %v2160_v42 = vpop.f32.mrf.mxu1  ;;  %v2327_v50 = vpack.c.bf16 %v2157_v37, %v5245_v44  ;;  %v2159_v55 = vadd.f32 %v2158_v52, %v2118_v40 }
 0x290   :  { %v2120_v60 = vpop.f32.mrf.mxu0 }
 0x291   :  { %v2161_v54 = vpop.f32.mrf.mxu1  ;;  %v2328_v47 = vpack.c.bf16 %v2159_v55, %v5246_v61 }
 0x293   :  { %2619 = vmatprep.mubr.bf16.mxu0 %v2328_v47 }
 0x294   :  { %2620 = vmatmul.mubr.bf16.vlgmr.msra.gmra.mxu0 %v2327_v50 }
 0x295   :  { %3737 = vmatpush3.bf16.msra.mxu0 %v4239_v16  ;;  %3752 = vmatprep.mubr.msk.bf16.mxu0 %vm4589_vm0, %v4588_v17  ;;  %v4247_v16 = vld [vmem:[#allocation11 + $0x38] sm:$0xff]  }
 0x296   :  { %3738 = vmatprep.subr.bf16.mxu0 %v4588_v17 }
 0x299   :  { %3739 = vmatpush3.bf16.msra.mxu0 %v4240_v18  ;;  %v4248_v18 = vld [vmem:[#allocation11 + $0x30] sm:$0xff]  }
 0x29a   :  { %3740 = vmatprep.subr.bf16.mxu0 %v4588_v17 }
 0x2ca   :  { %v2197_v2 = vpop.f32.mrf.mxu0 }
 0x2cb   :  { %v2238_v20 = vpop.f32.mrf.mxu1 }
 0x2cc   :  { %v2239_v59 = vadd.f32 %v2238_v20, %v2197_v2  ;;  %v2199_v62 = vpop.f32.mrf.mxu0 }
 0x2cd   :  { %v2240_v46 = vpop.f32.mrf.mxu1 }
 0x2ce   :  { %v2201_v58 = vpop.f32.mrf.mxu0  ;;  %v2241_v63 = vadd.f32 %v2240_v46, %v2199_v62 }
 0x2cf   :  { %v2242_v51 = vpop.f32.mrf.mxu1 }
 0x2d0   :  { %v2202_v45 = vpop.f32.mrf.mxu0 }
 0x2d1   :  { %v2243_v57 = vpop.f32.mrf.mxu1 }
 0x30a   :  { %v2279_v0 = vpop.f32.mrf.mxu0 }
 0x30b   :  { %v2320_v1 = vpop.f32.mrf.mxu1  ;;  %v2280_v53 = vadd.f32 %v2279_v0, %v2239_v59 }
 0x30c   :  { %v2281_v3 = vpop.f32.mrf.mxu0 }
 0x30d   :  { %v2322_v4 = vpop.f32.mrf.mxu1  ;;  %v2321_v5 = vadd.f32 %v2320_v1, %v2280_v53  ;;  %v2282_v6 = vadd.f32 %v2281_v3, %v2241_v63 }
 0x30e   :  { %v2283_v7 = vpop.f32.mrf.mxu0 }
 0x30f   :  { %v2324_v11 = vpop.f32.mrf.mxu1  ;;  %v2329_v12 = vpack.c.bf16 %v2321_v5, %v5002_v10  ;;  %v2323_v13 = vadd.f32 %v2322_v4, %v2282_v6  ;;  %v4241_v10 = vld [vmem:[#allocation10 + $0x28] sm:$0xff]  }
 0x310   :  { %v2284_v48 = vpop.f32.mrf.mxu0  ;;  %3741 = vmatpush3.bf16.msra.mxu0 %v4241_v10  ;;  %v4249_v10 = vld [vmem:[#allocation11 + $0x28] sm:$0xff]  }
 0x311   :  { %v2325_v15 = vpop.f32.mrf.mxu1  ;;  %v2330_v21 = vpack.c.bf16 %v2323_v13, %v5007_v14  ;;  %3742 = vmatprep.subr.bf16.mxu0 %v4588_v17  ;;  %v4242_v14 = vld [vmem:[#allocation10 + $0x20] sm:$0xff]  }
 0x313   :  { %2660 = vmatprep.mubr.bf16.mxu1 %v2330_v21 }
 0x314   :  { %2661 = vmatmul.mubr.bf16.vlgmr.msra.gmra.mxu1 %v2329_v12  ;;  %3743 = vmatpush3.bf16.msra.mxu0 %v4242_v14  ;;  %v4250_v14 = vld [vmem:[#allocation11 + $0x20] sm:$0xff]  }
 0x315   :  { %3744 = vmatprep.subr.bf16.mxu0 %v4588_v17  ;;  %3772 = vmatprep.mubr.msk.bf16.mxu1 %vm4589_vm0, %v4588_v17 }
 0x316   :  { %3757 = vmatpush3.bf16.msra.mxu1 %v4247_v16 }
 0x317   :  { %3758 = vmatprep.subr.bf16.mxu1 %v4588_v17 }
 0x318   :  { %3745 = vmatpush3.bf16.msra.mxu0 %v4243_v19  ;;  %v4251_v19 = vld [vmem:[#allocation11 + $0x18] sm:$0xff]  }
 0x319   :  { %3746 = vmatprep.subr.bf16.mxu0 %v4588_v17 }
 0x31a   :  { %3759 = vmatpush3.bf16.msra.mxu1 %v4248_v18 }
 0x31b   :  { %3760 = vmatprep.subr.bf16.mxu1 %v4588_v17 }
 0x31c   :  { %3747 = vmatpush3.bf16.msra.mxu0 %v4244_v22  ;;  %v4252_v22 = vld [vmem:[#allocation11 + $0x10] sm:$0xff]  }
 0x31d   :  { %3748 = vmatprep.subr.bf16.mxu0 %v4588_v17 }
 0x31e   :  { %3761 = vmatpush3.bf16.msra.mxu1 %v4249_v10 }
 0x31f   :  { %3762 = vmatprep.subr.bf16.mxu1 %v4588_v17 }
 0x320   :  { %3749 = vmatpush3.bf16.msra.mxu0 %v4245_v23  ;;  %v4253_v23 = vld [vmem:[#allocation11 + $0x8] sm:$0xff]  }
 0x321   :  { %3750 = vmatprep.subr.bf16.mxu0 %v4588_v17 }
 0x322   :  { %3763 = vmatpush3.bf16.msra.mxu1 %v4250_v14 }
 0x323   :  { %3764 = vmatprep.subr.bf16.mxu1 %v4588_v17 }
 0x324   :  { %3751 = vmatpush3.bf16.msra.mxu0 %v4246_v24  ;;  %v4254_v24 = vld [vmem:[#allocation11] sm:$0xff]  }
 0x326   :  { %3765 = vmatpush3.bf16.msra.mxu1 %v4251_v19 }
 0x327   :  { %3766 = vmatprep.subr.bf16.mxu1 %v4588_v17 }
 0x32a   :  { %3767 = vmatpush3.bf16.msra.mxu1 %v4252_v22 }
 0x32b   :  { %3768 = vmatprep.subr.bf16.mxu1 %v4588_v17 }
 0x32e   :  { %3769 = vmatpush3.bf16.msra.mxu1 %v4253_v23 }
 0x32f   :  { %3770 = vmatprep.subr.bf16.mxu1 %v4588_v17 }
 0x332   :  { %3771 = vmatpush3.bf16.msra.mxu1 %v4254_v24 }
 0x354   :  { %v3673_v25 = vpop.f32.mrf.mxu0 }
 0x356   :  { %v3674_v26 = vpop.f32.mrf.mxu0 }
 0x357   :  { %v3675_v30 = vadd.f32 %v3674_v26, %v3673_v25 }
 0x358   :  { %v3676_v27 = vpop.f32.mrf.mxu0 }
 0x35a   :  { %v3677_v32 = vpop.f32.mrf.mxu0 }
 0x35b   :  { %v3678_v36 = vadd.f32 %v3677_v32, %v3676_v27 }
 0x3d4   :  { %v3695_v28 = vpop.f32.mrf.mxu1 }
 0x3d6   :  { %v3696_v29 = vpop.f32.mrf.mxu1 }
 0x3d7   :  { %v3697_v31 = vadd.f32 %v3696_v29, %v3695_v28 }
 0x3d8   :  { %v3698_v33 = vpop.f32.mrf.mxu1 }
 0x3d9   :  { %v2663_v34 = vadd.f32 %v3697_v31, %v3675_v30 }
 0x3da   :  { %v3699_v35 = vpop.f32.mrf.mxu1 }
 0x3db   :  { %v2669_v38 = vrot.slane %v2663_v34, 4  ;;  %v3700_v8 = vadd.f32 %v3699_v35, %v3698_v33 }
 0x3dd   :  { %v2670_v9 = vadd.f32 %v2669_v38, %v2663_v34  ;;  %v2666_v39 = vadd.f32 %v3700_v8, %v3678_v36 }
 0x3df   :  { %v2671_v49 = vrot.slane %v2670_v9, 2  ;;  %v2675_v52 = vrot.slane %v2666_v39, 4 }
 0x3e1   :  { %v2672_v37 = vadd.f32 %v2671_v49, %v2670_v9  ;;  %v2676_v40 = vadd.f32 %v2675_v52, %v2666_v39 }
 0x3e3   :  { %v2673_v41 = vrot.slane %v2672_v37, 1  ;;  %v2677_v42 = vrot.slane %v2676_v40, 2 }
 0x3e5   :  { %v2674_v43 = vadd.f32 %v2673_v41, %v2672_v37  ;;  %v2678_v44 = vadd.f32 %v2677_v42, %v2676_v40 }
 0x3e7   :  { %v2682_v50 = vmul.f32 0.125, %v2674_v43  ;;  %v2679_v55 = vrot.slane %v2678_v44, 1 }
 0x3e9   :  { %v2684_v56 = vsub.f32 %v2663_v34, %v2682_v50  ;;  %v2680_v60 = vadd.f32 %v2679_v55, %v2678_v44 }
 0x3eb   :  { %v2686_v54 = vmul.f32 %v2684_v56, %v2684_v56  ;;  %v2683_v61 = vmul.f32 0.125, %v2680_v60 }
 0x3ed   :  { %v2688_v47 = vrot.slane %v2686_v54, 4  ;;  %v2685_v2 = vsub.f32 %v2666_v39, %v2683_v61 }
 0x3ef   :  { %v2689_v20 = vadd.f32 %v2688_v47, %v2686_v54  ;;  %v2687_v59 = vmul.f32 %v2685_v2, %v2685_v2 }
 0x3f1   :  { %v2690_v62 = vrot.slane %v2689_v20, 2  ;;  %v2694_v46 = vrot.slane %v2687_v59, 4 }
 0x3f3   :  { %v2691_v58 = vadd.f32 %v2690_v62, %v2689_v20  ;;  %v2695_v51 = vadd.f32 %v2694_v46, %v2687_v59 }
 0x3f5   :  { %v2692_v45 = vrot.slane %v2691_v58, 1  ;;  %v2696_v57 = vrot.slane %v2695_v51, 2 }
 0x3f7   :  { %v2693_v0 = vadd.f32 %v2692_v45, %v2691_v58  ;;  %v2697_v1 = vadd.f32 %v2696_v57, %v2695_v51 }
 0x3f9   :  { %v2700_v63 = vmul.f32 0.125, %v2693_v0  ;;  %v2698_v53 = vrot.slane %v2697_v1, 1 }
 0x3fb   :  { %v2702_v3 = vadd.f32 1e-05, %v2700_v63  ;;  %v2699_v4 = vadd.f32 %v2698_v53, %v2697_v1 }
 0x3fd   :  { %4255 = vrsqrt.f32 %v2702_v3  ;;  %v2701_v5 = vmul.f32 0.125, %v2699_v4 }
 0x3ff   :  { %v2703_v6 = vadd.f32 1e-05, %v2701_v5 }
 0x401   :  { %4257 = vrsqrt.f32 %v2703_v6 }
 0x40a   :  { %v4256_v7 = vpop.eup %4255 }
 0x40b   :  { %v2706_v11 = vmul.f32 %v4256_v7, %v2684_v56 }
 0x40d   :  { %v2708_v48 = vmax.f32 %v2706_v11, 0.0 }
 0x40e   :  { %v4258_v12 = vpop.eup %4257 }
 0x40f   :  { %v2707_v13 = vmul.f32 %v4258_v12, %v2685_v2 }
 0x411   :  { %v2709_v15 = vmax.f32 %v2707_v13, 0.0 }
 0x413   :  { %v2710_v21 = vpack.c.bf16 %v2709_v15, %v2708_v48 }
 0x415   :  { %3753 = vmatmul.mubr.bf16.vlgmr.msra.gmra.mxu0 %v2710_v21 }
 0x4d5   :  { %v2809_v25 = vpop.f32.mrf.mxu0 }
 0x4d6   :  { %v2816_v26 = vrot.slane %v2809_v25, 4 }
 0x4d7   :  { %v3754_v27 = vpop.f32.mrf.mxu0 }
 0x4d8   :  { %v2817_v28 = vadd.f32 %v2816_v26, %v2809_v25 }
 0x4d9   :  { %v2812_v29 = vpop.f32.mrf.mxu0 }
 0x4da   :  { %v2818_v30 = vrot.slane %v2817_v28, 2  ;;  %v2822_v31 = vrot.slane %v2812_v29, 4 }
 0x4db   :  { %v3755_v32 = vpop.f32.mrf.mxu0 }
 0x4dc   :  { %v2819_v33 = vadd.f32 %v2818_v30, %v2817_v28  ;;  %v2823_v34 = vadd.f32 %v2822_v31, %v2812_v29 }
 0x4de   :  { %v2820_v35 = vrot.slane %v2819_v33, 1  ;;  %v2824_v36 = vrot.slane %v2823_v34, 2 }
 0x4e0   :  { %v2821_v38 = vadd.f32 %v2820_v35, %v2819_v33  ;;  %v2825_v8 = vadd.f32 %v2824_v36, %v2823_v34 }
 0x4e2   :  { %v2828_v9 = vmul.f32 0.125, %v2821_v38  ;;  %v2826_v39 = vrot.slane %v2825_v8, 1 }
 0x4e4   :  { %v2830_v49 = vsub.f32 %v2809_v25, %v2828_v9  ;;  %v2827_v17 = vadd.f32 %v2826_v39, %v2825_v8 }
 0x4e6   :  { %v2832_v52 = vmul.f32 %v2830_v49, %v2830_v49  ;;  %v2829_v37 = vmul.f32 0.125, %v2827_v17 }
 0x4e8   :  { %v2834_v40 = vrot.slane %v2832_v52, 4  ;;  %v2831_v41 = vsub.f32 %v2812_v29, %v2829_v37 }
 0x4ea   :  { %v2835_v42 = vadd.f32 %v2834_v40, %v2832_v52  ;;  %v2833_v43 = vmul.f32 %v2831_v41, %v2831_v41 }
 0x4ec   :  { %v2836_v44 = vrot.slane %v2835_v42, 2  ;;  %v2840_v50 = vrot.slane %v2833_v43, 4 }
 0x4ee   :  { %v2837_v55 = vadd.f32 %v2836_v44, %v2835_v42  ;;  %v2841_v56 = vadd.f32 %v2840_v50, %v2833_v43 }
 0x4f0   :  { %v2838_v60 = vrot.slane %v2837_v55, 1  ;;  %v2842_v54 = vrot.slane %v2841_v56, 2 }
 0x4f2   :  { %v2839_v61 = vadd.f32 %v2838_v60, %v2837_v55  ;;  %v2843_v47 = vadd.f32 %v2842_v54, %v2841_v56 }
 0x4f4   :  { %v2846_v2 = vmul.f32 0.125, %v2839_v61  ;;  %v2844_v20 = vrot.slane %v2843_v47, 1 }
 0x4f6   :  { %v2848_v59 = vadd.f32 1e-05, %v2846_v2  ;;  %v2845_v62 = vadd.f32 %v2844_v20, %v2843_v47 }
 0x4f8   :  { %4259 = vrsqrt.f32 %v2848_v59  ;;  %v2847_v46 = vmul.f32 0.125, %v2845_v62 }
 0x4fa   :  { %v2849_v58 = vadd.f32 1e-05, %v2847_v46 }
 0x4fc   :  { %4261 = vrsqrt.f32 %v2849_v58 }
 0x505   :  { %v4260_v51 = vpop.eup %4259 }
 0x506   :  { %v2852_v45 = vmul.f32 %v4260_v51, %v2830_v49 }
 0x508   :  { %v2854_v1 = vmax.f32 %v2852_v45, 0.0 }
 0x509   :  { %v4262_v57 = vpop.eup %4261 }
 0x50a   :  { %v2853_v0 = vmul.f32 %v4262_v57, %v2831_v41 }
 0x50c   :  { %v2855_v63 = vmax.f32 %v2853_v0, 0.0 }
 0x50e   :  { %v2856_v53 = vpack.c.bf16 %v2855_v63, %v2854_v1 }
 0x510   :  { %3773 = vmatmul.mubr.bf16.vlgmr.msra.gmra.mxu1 %v2856_v53 }
 0x5d0   :  { %v2955_v3 = vpop.f32.mrf.mxu1 }
 0x5d1   :  { %v2962_v4 = vrot.slane %v2955_v3, 4 }
 0x5d2   :  { %v3774_v5 = vpop.f32.mrf.mxu1 }
 0x5d3   :  { %v2963_v6 = vadd.f32 %v2962_v4, %v2955_v3 }
 0x5d4   :  { %v2958_v7 = vpop.f32.mrf.mxu1 }
 0x5d5   :  { %v2964_v11 = vrot.slane %v2963_v6, 2  ;;  %v2968_v12 = vrot.slane %v2958_v7, 4 }
 0x5d6   :  { %v3775_v13 = vpop.f32.mrf.mxu1 }
 0x5d7   :  { %v2965_v48 = vadd.f32 %v2964_v11, %v2963_v6  ;;  %v2969_v15 = vadd.f32 %v2968_v12, %v2958_v7 }
 0x5d9   :  { %v2966_v21 = vrot.slane %v2965_v48, 1  ;;  %v2970_v16 = vrot.slane %v2969_v15, 2 }
 0x5db   :  { %v2971_v18 = vadd.f32 %v2970_v16, %v2969_v15  ;;  %v2967_v10 = vadd.f32 %v2966_v21, %v2965_v48 }
 0x5dd   :  { %v2972_v14 = vrot.slane %v2971_v18, 1  ;;  %v2974_v19 = vmul.f32 0.125, %v2967_v10 }
 0x5df   :  { %v2973_v22 = vadd.f32 %v2972_v14, %v2971_v18  ;;  %v2976_v23 = vsub.f32 %v2955_v3, %v2974_v19 }
 0x5e1   :  { %v2975_v24 = vmul.f32 0.125, %v2973_v22  ;;  %v2978_v25 = vmul.f32 %v2976_v23, %v2976_v23 }
 0x5e3   :  { %v2977_v26 = vsub.f32 %v2958_v7, %v2975_v24  ;;  %v2980_v27 = vrot.slane %v2978_v25, 4 }
 0x5e5   :  { %v2979_v28 = vmul.f32 %v2977_v26, %v2977_v26  ;;  %v2981_v29 = vadd.f32 %v2980_v27, %v2978_v25 }
 0x5e7   :  { %v2986_v30 = vrot.slane %v2979_v28, 4  ;;  %v2982_v31 = vrot.slane %v2981_v29, 2 }
 0x5e9   :  { %v2987_v32 = vadd.f32 %v2986_v30, %v2979_v28  ;;  %v2983_v33 = vadd.f32 %v2982_v31, %v2981_v29 }
 0x5eb   :  { %v2988_v34 = vrot.slane %v2987_v32, 2  ;;  %v2984_v35 = vrot.slane %v2983_v33, 1 }
 0x5ed   :  { %v2989_v36 = vadd.f32 %v2988_v34, %v2987_v32  ;;  %v2985_v38 = vadd.f32 %v2984_v35, %v2983_v33 }
 0x5ef   :  { %v2990_v8 = vrot.slane %v2989_v36, 1  ;;  %v2992_v9 = vmul.f32 0.125, %v2985_v38 }
 0x5f1   :  { %v2991_v39 = vadd.f32 %v2990_v8, %v2989_v36  ;;  %v2994_v49 = vadd.f32 1e-05, %v2992_v9 }
 0x5f3   :  { %v2993_v17 = vmul.f32 0.125, %v2991_v39  ;;  %4263 = vrsqrt.f32 %v2994_v49 }
 0x5f5   :  { %v2995_v52 = vadd.f32 1e-05, %v2993_v17 }
 0x5f7   :  { %4265 = vrsqrt.f32 %v2995_v52 }
 0x600   :  { %v4264_v37 = vpop.eup %4263 }
 0x601   :  { %v2998_v40 = vmul.f32 %v4264_v37, %v2976_v23 }
 0x603   :  { %3000 = vxpose.xlu0.b32.start.end [1/1] (short) %v2998_v40, 128 }
 0x604   :  { %v4266_v41 = vpop.eup %4265 }
 0x605   :  { %v2999_v42 = vmul.f32 %v4266_v41, %v2977_v26 }
 0x607   :  { %v3282_v43 = vmul.f32 %v2999_v42, %v2998_v40  ;;  %3776 = vmatprep.subr.mxu0 %v2999_v42  ;;  %3802 = vmatprep.subr.mxu1 %v2999_v42 }
 0x608   :  { %3777 = vmatpush3.msra.mxu0 %v2999_v42  ;;  %3803 = vmatpush3.msra.mxu1 %v2999_v42 }
 0x609   :  { %v3283_v44 = vrot.slane %v3282_v43, 4 }
 0x60b   :  { %v3284_v50 = vadd.f32 %v3283_v44, %v3282_v43 }
 0x60d   :  { %v3285_v55 = vrot.slane %v3284_v50, 2 }
 0x60f   :  { %v3286_v56 = vadd.f32 %v3285_v55, %v3284_v50 }
 0x611   :  { %v3287_v60 = vrot.slane %v3286_v56, 1 }
 0x613   :  { %v3288_v54 = vadd.f32 %v3287_v60, %v3286_v56 }
 0x615   :  { %v3289_v61 = vmul.f32 0.125, %v3288_v54 }
 0x617   :  { %v3656_v47 = vadd.f32 -1.0, %v3289_v61  ;;  %v3303_v59 = vmul.f32 %v3289_v61, %v3289_v61 }
 0x619   :  { %v3291_v2 = vmul.f32 %v3656_v47, %v3656_v47  ;;  %v3304_v62 = vsel %vm3292_vm1, %v3303_v59, 0.0 }
 0x61b   :  { %v3293_v20 = vsel %vm3292_vm1, %v3291_v2, 0.0 }
 0x61c   :  { %3294 = vadd.xlane.f32.xlu1 %v3293_v20 }
 0x620   :  { %3305 = vadd.xlane.f32.xlu1 %v3304_v62 }
 0x67f   :  { %v3016_v46 = vpop.trf.xlu0 }
 0x680   :  { %3778 = vmatprep.mubr.msk.f32.mxu0 %vm3032_vm2, %v3016_v46 }
 0x683   :  { %v3017_v58 = vpop.trf.xlu0 }
 0x684   :  { %3779 = vmatmul.mubr.msk.f32.vlgmr.msra.gmra.mxu0 %vm3032_vm2, %v3017_v58 }
 0x687   :  { %v3018_v51 = vpop.trf.xlu0 }
 0x688   :  { %3781 = vmatprep.mubr.msk.f32.mxu0 %vm3032_vm2, %v3018_v51 }
 0x68b   :  { %v3019_v45 = vpop.trf.xlu0 }
 0x68c   :  { %3782 = vmatmul.mubr.msk.f32.gmra.mxu0 %vm3032_vm2, %v3019_v45 }
 0x68f   :  { %v3020_v57 = vpop.trf.xlu0 }
 0x690   :  { %3784 = vmatprep.mubr.msk.f32.mxu0 %vm3032_vm2, %v3020_v57 }
 0x693   :  { %v3021_v0 = vpop.trf.xlu0 }
 0x694   :  { %3785 = vmatmul.mubr.msk.f32.gmra.mxu0 %vm3032_vm2, %v3021_v0 }
 0x697   :  { %v3022_v1 = vpop.trf.xlu0 }
 0x698   :  { %3787 = vmatprep.mubr.msk.f32.mxu0 %vm3032_vm2, %v3022_v1 }
 0x69b   :  { %v3023_v63 = vpop.trf.xlu0 }
 0x69c   :  { %3788 = vmatmul.mubr.msk.f32.gmra.mxu0 %vm3032_vm2, %v3023_v63 }
 0x69f   :  { %v3024_v53 = vpop.trf.xlu0 }
 0x6a0   :  { %3790 = vmatprep.mubr.msk.f32.mxu1 %vm3032_vm2, %v3024_v53 }
 0x6a3   :  { %v3025_v3 = vpop.trf.xlu0 }
 0x6a4   :  { %3791 = vmatmul.mubr.msk.f32.vlgmr.msra.gmra.mxu1 %vm3032_vm2, %v3025_v3 }
 0x6a7   :  { %v3026_v4 = vpop.trf.xlu0 }
 0x6a8   :  { %3793 = vmatprep.mubr.msk.f32.mxu1 %vm3032_vm2, %v3026_v4 }
 0x6ab   :  { %v3027_v5 = vpop.trf.xlu0 }
 0x6ac   :  { %3794 = vmatmul.mubr.msk.f32.gmra.mxu1 %vm3032_vm2, %v3027_v5 }
 0x6af   :  { %v3028_v6 = vpop.trf.xlu0 }
 0x6b0   :  { %3796 = vmatprep.mubr.msk.f32.mxu1 %vm3032_vm2, %v3028_v6 }
 0x6b3   :  { %v3029_v7 = vpop.trf.xlu0 }
 0x6b4   :  { %3797 = vmatmul.mubr.msk.f32.gmra.mxu1 %vm3032_vm2, %v3029_v7 }
 0x6b7   :  { %v3030_v11 = vpop.trf.xlu0 }
 0x6b8   :  { %3799 = vmatprep.mubr.msk.f32.mxu1 %vm3032_vm2, %v3030_v11 }
 0x6bb   :  { %v3031_v12 = vpop.trf.xlu0 }
 0x6bc   :  { %3800 = vmatmul.mubr.msk.f32.gmra.mxu1 %vm3032_vm2, %v3031_v12  ;;  %v3295_v12 = vpop.xlane.xlu1 %3294 }
 0x744   :  { %v3780_v13 = vpop.f32.mrf.mxu0 }
 0x745   :  { %v3227_v10 = vmul.f32 0.125, %v3780_v13  ;;  %v3306_v13 = vpop.xlane.xlu1 %3305 }
 0x746   :  { %v3147_v48 = vpop.f32.mrf.mxu0 }
 0x747   :  { %v3226_v16 = vmul.f32 0.125, %v3147_v48  ;;  %v3243_v23 = vmul.f32 %v3227_v10, %v3227_v10  ;;  %v3296_v48 = vrot.slane %v3295_v12, 4 }
 0x749   :  { %v3242_v19 = vmul.f32 %v3226_v16, %v3226_v16 }
 0x74b   :  { %v3258_v26 = vadd.f32 %v3243_v23, %v3242_v19 }
 0x74c   :  { %v3783_v15 = vpop.f32.mrf.mxu0 }
 0x74d   :  { %v3229_v27 = vmul.f32 0.125, %v3783_v15  ;;  %v3307_v15 = vrot.slane %v3306_v13, 4 }
 0x74e   :  { %v3157_v21 = vpop.f32.mrf.mxu0 }
 0x74f   :  { %v3228_v14 = vmul.f32 0.125, %v3157_v21  ;;  %v3245_v31 = vmul.f32 %v3229_v27, %v3229_v27  ;;  %v3297_v21 = vadd.f32 %v3296_v48, %v3295_v12  ;;  %v3308_v16 = vadd.f32 %v3307_v15, %v3306_v13 }
 0x751   :  { %v3244_v24 = vmul.f32 %v3228_v14, %v3228_v14  ;;  %v3309_v14 = vrot.slane %v3308_v16, 2 }
 0x753   :  { %v3259_v29 = vadd.f32 %v3258_v26, %v3244_v24  ;;  %v3310_v24 = vadd.f32 %v3309_v14, %v3308_v16 }
 0x754   :  { %v3786_v18 = vpop.f32.mrf.mxu0 }
 0x755   :  { %v3231_v33 = vmul.f32 0.125, %v3786_v18  ;;  %v3260_v34 = vadd.f32 %v3259_v29, %v3245_v31  ;;  %v3298_v18 = vrot.slane %v3297_v21, 2  ;;  %v3311_v29 = vrot.slane %v3310_v24, 1 }
 0x756   :  { %v3167_v22 = vpop.f32.mrf.mxu0 }
 0x757   :  { %v3230_v28 = vmul.f32 0.125, %v3167_v22  ;;  %v3247_v9 = vmul.f32 %v3231_v33, %v3231_v33  ;;  %v3299_v23 = vadd.f32 %v3298_v18, %v3297_v21 }
 0x759   :  { %v3246_v32 = vmul.f32 %v3230_v28, %v3230_v28  ;;  %v3300_v27 = vrot.slane %v3299_v23, 1 }
 0x75b   :  { %v3261_v38 = vadd.f32 %v3260_v34, %v3246_v32  ;;  %v3301_v31 = vadd.f32 %v3300_v27, %v3299_v23  ;;  %v3312_v32 = vadd.f32 %v3311_v29, %v3310_v24 }
 0x75c   :  { %v3789_v25 = vpop.f32.mrf.mxu0 }
 0x75d   :  { %v3233_v49 = vmul.f32 0.125, %v3789_v25  ;;  %v3262_v17 = vadd.f32 %v3261_v38, %v3247_v9 }
 0x75e   :  { %v3177_v30 = vpop.f32.mrf.mxu0 }
 0x75f   :  { %v3232_v35 = vmul.f32 0.125, %v3177_v30  ;;  %v3249_v41 = vmul.f32 %v3233_v49, %v3233_v49 }
 0x761   :  { %v3248_v39 = vmul.f32 %v3232_v35, %v3232_v35 }
 0x763   :  { %v3263_v37 = vadd.f32 %v3262_v17, %v3248_v39 }
 0x764   :  { %v3792_v36 = vpop.f32.mrf.mxu1 }
 0x765   :  { %v3264_v44 = vadd.f32 %v3263_v37, %v3249_v41  ;;  %v3235_v50 = vmul.f32 0.125, %v3792_v36 }
 0x766   :  { %v3187_v8 = vpop.f32.mrf.mxu1 }
 0x767   :  { %v3234_v52 = vmul.f32 0.125, %v3187_v8  ;;  %v3251_v60 = vmul.f32 %v3235_v50, %v3235_v50 }
 0x769   :  { %v3250_v42 = vmul.f32 %v3234_v52, %v3234_v52 }
 0x76b   :  { %v3265_v56 = vadd.f32 %v3264_v44, %v3250_v42 }
 0x76c   :  { %v3795_v40 = vpop.f32.mrf.mxu1 }
 0x76d   :  { %v3237_v47 = vmul.f32 0.125, %v3795_v40  ;;  %v3266_v2 = vadd.f32 %v3265_v56, %v3251_v60 }
 0x76e   :  { %v3197_v43 = vpop.f32.mrf.mxu1 }
 0x76f   :  { %v3236_v55 = vmul.f32 0.125, %v3197_v43  ;;  %v3253_v46 = vmul.f32 %v3237_v47, %v3237_v47 }
 0x771   :  { %v3252_v54 = vmul.f32 %v3236_v55, %v3236_v55 }
 0x773   :  { %v3267_v59 = vadd.f32 %v3266_v2, %v3252_v54 }
 0x774   :  { %v3798_v61 = vpop.f32.mrf.mxu1 }
 0x775   :  { %v3239_v51 = vmul.f32 0.125, %v3798_v61  ;;  %v3268_v45 = vadd.f32 %v3267_v59, %v3253_v46 }
 0x776   :  { %v3207_v20 = vpop.f32.mrf.mxu1 }
 0x777   :  { %v3238_v62 = vmul.f32 0.125, %v3207_v20  ;;  %v3255_v63 = vmul.f32 %v3239_v51, %v3239_v51 }
 0x779   :  { %v3254_v58 = vmul.f32 %v3238_v62, %v3238_v62 }
 0x77b   :  { %v3269_v0 = vadd.f32 %v3268_v45, %v3254_v58 }
 0x77c   :  { %v3801_v57 = vpop.f32.mrf.mxu1 }
 0x77d   :  { %v3241_v53 = vmul.f32 0.125, %v3801_v57  ;;  %v3270_v5 = vadd.f32 %v3269_v0, %v3255_v63 }
 0x77e   :  { %v3217_v1 = vpop.f32.mrf.mxu1 }
 0x77f   :  { %v3240_v3 = vmul.f32 0.125, %v3217_v1  ;;  %v3257_v6 = vmul.f32 %v3241_v53, %v3241_v53 }
 0x781   :  { %v3256_v4 = vmul.f32 %v3240_v3, %v3240_v3 }
 0x783   :  { %v3271_v7 = vadd.f32 %v3270_v5, %v3256_v4 }
 0x785   :  { %v3272_v11 = vadd.f32 %v3271_v7, %v3257_v6 }
 0x787   :  { %3273 = vadd.xlane.f32.xlu0 %v3272_v11 }
 0x810   :  { %v3274_v10 = vpop.xlane.xlu0 %3273 }
 0x811   :  { %v3275_v19 = vrot.slane %v3274_v10, 4 }
 0x813   :  { %v3276_v22 = vadd.f32 %v3275_v19, %v3274_v10 }
 0x815   :  { %v3277_v25 = vrot.slane %v3276_v22, 2 }
 0x817   :  { %v3278_v26 = vadd.f32 %v3277_v25, %v3276_v22 }
 0x819   :  { %v3279_v28 = vrot.slane %v3278_v26, 1 }
 0x81b   :  { %v3280_v30 = vadd.f32 %v3279_v28, %v3278_v26 }
 0x81d   :  { %3804 = vpush %v3280_v30 }
 0x81e   :  { %3806 = vpush %v3301_v31 }
 0x81f   :  { %3808 = vpush %v3312_v32 }
 0x84e   :  { %s3805_s4 = spop %3804 }
 0x84f   :  { %s3807_s5 = spop %3806 }
 0x850   :  { %s3809_s27 = spop %3808 }
 0x851   :  { %s3314_s28 = ssub.f32 %s3805_s4, %s3809_s27 }
 0x853   :  { %s3315_s29 = smul.f32 0.0051, %s3314_s28 }
 0x855   :  { %s3316_s30 = sadd.f32 %s3807_s5, %s3315_s29 }
 0x857   :  { %3318 = sst [smem:[#allocation13]] %s3316_s30 }
 0x858   :  { %3326 = dma.smem_to_hbm %s4590_s7, 16, %s5119_s6, [#allocation4]  }
 0x859   :  { %4576 = dma.done.wait [#allocation4], 16  }
 0x85a   :  { %4577 = vsyncadd [#allocation4], 4294967280 }
 0x85b   :  { %3330 = sfence }
 0x85c   :  { %3331 = vsyncpa [#allocation3], 1 }
 0x85d   :  { %3332 = vsyncpa [#allocation6], 1 }
 0x85e   :  { %3333 = vsyncpa [#allocation9], 1 }
 0x85f   :  { %3334 = vsyncpa [#allocation12], 1 }
 0x860   :  { %3335 = vsyncpa [#allocation4], 1 }

</bundles_post_ra>
